<compile_context>
chip_gen: v6e
topology: v6e:2x2x1
jax: 0.10.0
libtpu: 0.0.40
codegen_flags: <defaults>
</compile_context>

<pallas_src>
import functools

import jax
import jax.numpy as jnp
import numpy as np
from jax import lax
from jax.experimental import pallas as pl
from jax.experimental.pallas import tpu as pltpu

INPUT_DIM = 2
HIDDEN = 64
OUTPUT_DIM = 2
LAST_N = 10


def lstm_fc_kernel(x_ref, wih0_ref, b0_ref, whh0_ref, w1_ref, b1_ref,
                   wfc_ref, bfc_ref, o_ref, xp_ref, *, T, B):
    """2-layer LSTM recurrence + fused final Linear, all inside one kernel.

    x_ref   : (T*B, INPUT_DIM)     time-major, batch-flattened input
    wih0_ref: (INPUT_DIM, 4H)      layer-0 input weights (gate order [i,f,o,g])
    b0_ref  : (1, 4H)              layer-0 bias (bih + bhh)
    whh0_ref: (H, 4H)              layer-0 recurrent weights
    w1_ref  : (2H, 4H)             layer-1 stacked [Wih1; Whh1]
    b1_ref  : (1, 4H)              layer-1 bias
    wfc_ref : (H, OUTPUT_DIM)      final Linear weight
    bfc_ref : (1, OUTPUT_DIM)      final Linear bias
    o_ref   : (LAST_N, B, OUTPUT_DIM)
    xp_ref  : (T*B, 4H)            scratch for the hoisted layer-0 projection
    """
    H = HIDDEN

    # --- Hoisted layer-0 input projection: one matmul for all T steps, bias folded in.
    xp_ref[...] = (jnp.dot(x_ref[...], wih0_ref[...],
                           preferred_element_type=jnp.float32)
                   + b0_ref[...])

    # --- Load weights once and hoist all bias broadcasts out of the serial loop.
    whh0 = whh0_ref[...]                                     # (H, 4H)
    w1 = w1_ref[...]                                         # (2H, 4H)
    wfc = wfc_ref[...]                                       # (H, O)
    b1 = jnp.broadcast_to(b1_ref[...], (B, 4 * H))           # (B, 4H)
    bfc = jnp.broadcast_to(bfc_ref[...], (B, OUTPUT_DIM))    # (B, O)

    def lstm_cell(gate_pre, c_prev):
        # Gate order (after wrapper reordering): [i, f, o, g]
        sig = jax.nn.sigmoid(gate_pre[:, :3 * H])            # one contiguous sigmoid
        g = jnp.tanh(gate_pre[:, 3 * H:])                    # one contiguous tanh
        i = sig[:, 0:H]
        f = sig[:, H:2 * H]
        o = sig[:, 2 * H:3 * H]
        c = f * c_prev + i * g
        h = o * jnp.tanh(c)
        return h, c

    def step(t, carry):
        h0, c0, h1, c1 = carry

        # layer 0: input projection was precomputed; only the recurrent matmul remains.
        off = pl.multiple_of(t * B, B)
        g0 = xp_ref[pl.ds(off, B), :] + jnp.dot(
            h0, whh0, preferred_element_type=jnp.float32)
        h0, c0 = lstm_cell(g0, c0)

        # layer 1: single fused K=2H matmul on [h0, h1].
        hcat = jnp.concatenate([h0, h1], axis=-1)            # (B, 2H)
        g1 = jnp.dot(hcat, w1, preferred_element_type=jnp.float32) + b1
        h1, c1 = lstm_cell(g1, c1)

        # Fused FC: only the last LAST_N steps contribute to the output.
        @pl.when(t >= T - LAST_N)
        def _():
            idx = jnp.maximum(t - (T - LAST_N), 0)
            o_ref[idx] = jnp.dot(h1, wfc,
                                 preferred_element_type=jnp.float32) + bfc

        return (h0, c0, h1, c1)

    zeros = jnp.zeros((B, H), jnp.float32)
    lax.fori_loop(0, T, step, (zeros, zeros, zeros, zeros), unroll=True)


def _reorder_gates(w):
    """PyTorch gate blocks are [i, f, g, o] along axis 0; reorder to [i, f, o, g]."""
    i, f, g, o = jnp.split(w, 4, axis=0)
    return jnp.concatenate([i, f, o, g], axis=0)


def attack_predictor_forward(x, params):
    """x: (B, T, INPUT_DIM) float32, batch-first like the PyTorch module."""
    B, T, _ = x.shape
    assert T >= LAST_N

    # Pad batch to a multiple of 8 so every (B, ...) vreg uses full sublanes.
    B_pad = ((B + 7) // 8) * 8
    x_p = jnp.zeros((B_pad, T, INPUT_DIM), jnp.float32).at[:B].set(
        x.astype(jnp.float32))
    # time-major and batch-flattened: (T*B_pad, INPUT_DIM)
    x_tm = jnp.transpose(x_p, (1, 0, 2)).reshape(T * B_pad, INPUT_DIM)

    wih0 = _reorder_gates(params["wih0"]).T                       # (2, 4H)
    whh0 = _reorder_gates(params["whh0"]).T                       # (H, 4H)
    b0 = _reorder_gates(params["bih0"] + params["bhh0"])[None, :]  # (1, 4H)
    w1 = jnp.concatenate([_reorder_gates(params["wih1"]).T,
                          _reorder_gates(params["whh1"]).T], axis=0)  # (2H, 4H)
    b1 = _reorder_gates(params["bih1"] + params["bhh1"])[None, :]  # (1, 4H)
    wfc = params["wfc"].T                                          # (H, O)
    bfc = params["bfc"][None, :]                                   # (1, O)

    args = (x_tm, wih0, b0, whh0, w1, b1, wfc, bfc)
    vmem = pl.BlockSpec(memory_space=pltpu.MemorySpace.VMEM)

    out = pl.pallas_call(
        functools.partial(lstm_fc_kernel, T=T, B=B_pad),
        out_shape=jax.ShapeDtypeStruct((LAST_N, B_pad, OUTPUT_DIM), jnp.float32),
        in_specs=[vmem] * len(args),
        out_specs=vmem,
        scratch_shapes=[pltpu.VMEM((T * B_pad, 4 * HIDDEN), jnp.float32)],
    )(*args)

    # (LAST_N, B_pad, O) -> (B, LAST_N, O)
    return jnp.transpose(out, (1, 0, 2))[:B]


def init_params(key):
    """Deterministic synthetic parameters with PyTorch nn.LSTM / nn.Linear shapes."""
    ks = jax.random.split(key, 10)
    s = 0.1
    return {
        # layer 0
        "wih0": jax.random.normal(ks[0], (4 * HIDDEN, INPUT_DIM), jnp.float32) * s,
        "whh0": jax.random.normal(ks[1], (4 * HIDDEN, HIDDEN), jnp.float32) * s,
        "bih0": jax.random.normal(ks[2], (4 * HIDDEN,), jnp.float32) * s,
        "bhh0": jax.random.normal(ks[3], (4 * HIDDEN,), jnp.float32) * s,
        # layer 1
        "wih1": jax.random.normal(ks[4], (4 * HIDDEN, HIDDEN), jnp.float32) * s,
        "whh1": jax.random.normal(ks[5], (4 * HIDDEN, HIDDEN), jnp.float32) * s,
        "bih1": jax.random.normal(ks[6], (4 * HIDDEN,), jnp.float32) * s,
        "bhh1": jax.random.normal(ks[7], (4 * HIDDEN,), jnp.float32) * s,
        # fc
        "wfc": jax.random.normal(ks[8], (OUTPUT_DIM, HIDDEN), jnp.float32) * s,
        "bfc": jax.random.normal(ks[9], (OUTPUT_DIM,), jnp.float32) * s,
    }


def reference_forward(x, params):
    """Pure-JAX reference reproducing PyTorch LSTM(batch_first=True) + Linear."""
    B, T, _ = x.shape
    H = HIDDEN

    def run_layer(inp, wih, whh, bih, bhh):
        def step(carry, x_t):
            h, c = carry
            g = x_t @ wih.T + h @ whh.T + bih + bhh
            i = jax.nn.sigmoid(g[:, :H])
            f = jax.nn.sigmoid(g[:, H:2 * H])
            gg = jnp.tanh(g[:, 2 * H:3 * H])
            o = jax.nn.sigmoid(g[:, 3 * H:])
            c = f * c + i * gg
            h = o * jnp.tanh(c)
            return (h, c), h
        zeros = jnp.zeros((B, H), jnp.float32)
        _, hs = lax.scan(step, (zeros, zeros), jnp.transpose(inp, (1, 0, 2)))
        return jnp.transpose(hs, (1, 0, 2))

    h = run_layer(x, params["wih0"], params["whh0"], params["bih0"], params["bhh0"])
    h = run_layer(h, params["wih1"], params["whh1"], params["bih1"], params["bhh1"])
    return h[:, -LAST_N:, :] @ params["wfc"].T + params["bfc"]


if __name__ == "__main__":
    key = jax.random.PRNGKey(0)
    k_param, k_x = jax.random.split(key)
    params = init_params(k_param)

    B, T = 4, 16
    x = jax.random.normal(k_x, (B, T, INPUT_DIM), jnp.float32)

    out = attack_predictor_forward(x, params)
    out = jax.block_until_ready(out)

    ref = jax.block_until_ready(reference_forward(x, params))
    assert out.shape == (B, LAST_N, OUTPUT_DIM)
    assert np.allclose(np.asarray(out), np.asarray(ref), atol=1e-4, rtol=1e-4)
    print("KERNEL_OK")
</pallas_src>

<mosaic_0001>
module attributes {stable_mosaic.version = 11 : i64} {
  func.func @lstm_fc_kernel(%arg0: memref<128x2xf32, #tpu.memory_space<vmem>>, %arg1: memref<2x256xf32, #tpu.memory_space<vmem>>, %arg2: memref<1x256xf32, #tpu.memory_space<vmem>>, %arg3: memref<64x256xf32, #tpu.memory_space<vmem>>, %arg4: memref<128x256xf32, #tpu.memory_space<vmem>>, %arg5: memref<1x256xf32, #tpu.memory_space<vmem>>, %arg6: memref<64x2xf32, #tpu.memory_space<vmem>>, %arg7: memref<1x2xf32, #tpu.memory_space<vmem>>, %arg8: memref<10x8x2xf32, #tpu.memory_space<vmem>>, %arg9: memref<128x256xf32, #tpu.memory_space<vmem>>) attributes {dimension_semantics = [], scalar_prefetch = 0 : i64, scratch_operands = 1 : i64, tpu.core_type = #tpu.core_type<tc>} {
    %c0 = arith.constant 0 : index
    %c0_0 = arith.constant 0 : index
    %0 = vector.load %arg0[%c0, %c0_0] : memref<128x2xf32, #tpu.memory_space<vmem>>, vector<128x2xf32>
    %c0_1 = arith.constant 0 : index
    %c0_2 = arith.constant 0 : index
    %1 = vector.load %arg1[%c0_1, %c0_2] : memref<2x256xf32, #tpu.memory_space<vmem>>, vector<2x256xf32>
    %cst = arith.constant dense<0.000000e+00> : vector<128x256xf32>
    %2 = tpu.matmul %0, %1, %cst {dimension_numbers = #tpu.dot_dimension_numbers<[1], [0], [0], [1], [0, 0, 1, 1], [], []>} : vector<128x2xf32>, vector<2x256xf32>, vector<128x256xf32> -> vector<128x256xf32>
    %c0_3 = arith.constant 0 : index
    %c0_4 = arith.constant 0 : index
    %3 = vector.load %arg2[%c0_3, %c0_4] : memref<1x256xf32, #tpu.memory_space<vmem>>, vector<1x256xf32>
    %4 = vector.broadcast %3 : vector<1x256xf32> to vector<128x256xf32>
    %5 = arith.addf %2, %4 : vector<128x256xf32>
    %c0_5 = arith.constant 0 : index
    %c0_6 = arith.constant 0 : index
    %6 = vector.load %arg9[%c0_5, %c0_6] : memref<128x256xf32, #tpu.memory_space<vmem>>, vector<128x256xf32>
    tpu.vector_store %arg9[%c0_5, %c0_6], %5 {strides = array<i32>} : memref<128x256xf32, #tpu.memory_space<vmem>>, vector<128x256xf32>,
    %c0_7 = arith.constant 0 : index
    %c0_8 = arith.constant 0 : index
    %7 = vector.load %arg3[%c0_7, %c0_8] : memref<64x256xf32, #tpu.memory_space<vmem>>, vector<64x256xf32>
    %c0_9 = arith.constant 0 : index
    %c0_10 = arith.constant 0 : index
    %8 = vector.load %arg4[%c0_9, %c0_10] : memref<128x256xf32, #tpu.memory_space<vmem>>, vector<128x256xf32>
    %c0_11 = arith.constant 0 : index
    %c0_12 = arith.constant 0 : index
    %9 = vector.load %arg6[%c0_11, %c0_12] : memref<64x2xf32, #tpu.memory_space<vmem>>, vector<64x2xf32>
    %c0_13 = arith.constant 0 : index
    %c0_14 = arith.constant 0 : index
    %10 = vector.load %arg5[%c0_13, %c0_14] : memref<1x256xf32, #tpu.memory_space<vmem>>, vector<1x256xf32>
    %11 = vector.shape_cast %10 : vector<1x256xf32> to vector<1x256xf32>
    %12 = vector.broadcast %11 : vector<1x256xf32> to vector<8x256xf32>
    %c0_15 = arith.constant 0 : index
    %c0_16 = arith.constant 0 : index
    %13 = vector.load %arg7[%c0_15, %c0_16] : memref<1x2xf32, #tpu.memory_space<vmem>>, vector<1x2xf32>
    %14 = vector.shape_cast %13 : vector<1x2xf32> to vector<1x2xf32>
    %15 = vector.broadcast %14 : vector<1x2xf32> to vector<8x2xf32>
    %cst_17 = arith.constant 0.000000e+00 : f32
    %16 = vector.broadcast %cst_17 : f32 to vector<8x64xf32>
    %c0_i32 = arith.constant 0 : i32
    %c8_i32 = arith.constant 8 : i32
    %17 = arith.muli %c0_i32, %c8_i32 : i32
    %18 = tpu.assume_multiple %17, 8 : i32
    %19 = arith.index_cast %18 : i32 to index
    %c0_18 = arith.constant 0 : index
    %20 = vector.load %arg9[%19, %c0_18] : memref<128x256xf32, #tpu.memory_space<vmem>>, vector<8x256xf32>
    %cst_19 = arith.constant dense<0.000000e+00> : vector<8x256xf32>
    %21 = tpu.matmul %16, %7, %cst_19 {dimension_numbers = #tpu.dot_dimension_numbers<[1], [0], [0], [1], [0, 0, 1, 1], [], []>} : vector<8x64xf32>, vector<64x256xf32>, vector<8x256xf32> -> vector<8x256xf32>
    %22 = arith.addf %20, %21 : vector<8x256xf32>
    %23 = vector.extract_strided_slice %22 {offsets = [0, 0], sizes = [8, 192], strides = [1, 1]} : vector<8x256xf32> to vector<8x192xf32>
    %24 = arith.negf %23 : vector<8x192xf32>
    %25 = math.exp %24 : vector<8x192xf32>
    %cst_20 = arith.constant 1.000000e+00 : f32
    %26 = vector.broadcast %cst_20 : f32 to vector<8x192xf32>
    %27 = arith.addf %26, %25 : vector<8x192xf32>
    %28 = arith.divf %26, %27 : vector<8x192xf32>
    %29 = vector.extract_strided_slice %22 {offsets = [0, 192], sizes = [8, 64], strides = [1, 1]} : vector<8x256xf32> to vector<8x64xf32>
    %30 = math.tanh %29 : vector<8x64xf32>
    %31 = vector.extract_strided_slice %28 {offsets = [0, 0], sizes = [8, 64], strides = [1, 1]} : vector<8x192xf32> to vector<8x64xf32>
    %32 = vector.extract_strided_slice %28 {offsets = [0, 64], sizes = [8, 64], strides = [1, 1]} : vector<8x192xf32> to vector<8x64xf32>
    %33 = vector.extract_strided_slice %28 {offsets = [0, 128], sizes = [8, 64], strides = [1, 1]} : vector<8x192xf32> to vector<8x64xf32>
    %34 = arith.mulf %32, %16 : vector<8x64xf32>
    %35 = arith.mulf %31, %30 : vector<8x64xf32>
    %36 = arith.addf %34, %35 : vector<8x64xf32>
    %37 = math.tanh %36 : vector<8x64xf32>
    %38 = arith.mulf %33, %37 : vector<8x64xf32>
    %39 = tpu.concatenate %38, %16 in 1 : vector<8x64xf32>, vector<8x64xf32> -> vector<8x128xf32>
    %cst_21 = arith.constant dense<0.000000e+00> : vector<8x256xf32>
    %40 = tpu.matmul %39, %8, %cst_21 {dimension_numbers = #tpu.dot_dimension_numbers<[1], [0], [0], [1], [0, 0, 1, 1], [], []>} : vector<8x128xf32>, vector<128x256xf32>, vector<8x256xf32> -> vector<8x256xf32>
    %41 = arith.addf %40, %12 : vector<8x256xf32>
    %42 = vector.extract_strided_slice %41 {offsets = [0, 0], sizes = [8, 192], strides = [1, 1]} : vector<8x256xf32> to vector<8x192xf32>
    %43 = arith.negf %42 : vector<8x192xf32>
    %44 = math.exp %43 : vector<8x192xf32>
    %cst_22 = arith.constant 1.000000e+00 : f32
    %45 = vector.broadcast %cst_22 : f32 to vector<8x192xf32>
    %46 = arith.addf %45, %44 : vector<8x192xf32>
    %47 = arith.divf %45, %46 : vector<8x192xf32>
    %48 = vector.extract_strided_slice %41 {offsets = [0, 192], sizes = [8, 64], strides = [1, 1]} : vector<8x256xf32> to vector<8x64xf32>
    %49 = math.tanh %48 : vector<8x64xf32>
    %50 = vector.extract_strided_slice %47 {offsets = [0, 0], sizes = [8, 64], strides = [1, 1]} : vector<8x192xf32> to vector<8x64xf32>
    %51 = vector.extract_strided_slice %47 {offsets = [0, 64], sizes = [8, 64], strides = [1, 1]} : vector<8x192xf32> to vector<8x64xf32>
    %52 = vector.extract_strided_slice %47 {offsets = [0, 128], sizes = [8, 64], strides = [1, 1]} : vector<8x192xf32> to vector<8x64xf32>
    %53 = arith.mulf %51, %16 : vector<8x64xf32>
    %54 = arith.mulf %50, %49 : vector<8x64xf32>
    %55 = arith.addf %53, %54 : vector<8x64xf32>
    %56 = math.tanh %55 : vector<8x64xf32>
    %57 = arith.mulf %52, %56 : vector<8x64xf32>
    %c6_i32 = arith.constant 6 : i32
    %58 = arith.cmpi sge, %c0_i32, %c6_i32 : i32
    %59 = arith.extui %58 : i1 to i32
    %c0_i32_23 = arith.constant 0 : i32
    %60 = arith.cmpi ne, %59, %c0_i32_23 : i32
    scf.if %60 {
      %c6_i32_146 = arith.constant 6 : i32
      %721 = arith.subi %c0_i32, %c6_i32_146 : i32
      %c0_i32_147 = arith.constant 0 : i32
      %722 = arith.maxsi %721, %c0_i32_147 : i32
      %cst_148 = arith.constant dense<0.000000e+00> : vector<8x2xf32>
      %723 = tpu.matmul %57, %9, %cst_148 {dimension_numbers = #tpu.dot_dimension_numbers<[1], [0], [0], [1], [0, 0, 1, 1], [], []>} : vector<8x64xf32>, vector<64x2xf32>, vector<8x2xf32> -> vector<8x2xf32>
      %724 = arith.addf %723, %15 : vector<8x2xf32>
      %725 = arith.index_cast %722 : i32 to index
      %c0_149 = arith.constant 0 : index
      %c0_150 = arith.constant 0 : index
      %726 = vector.load %arg8[%725, %c0_149, %c0_150] : memref<10x8x2xf32, #tpu.memory_space<vmem>>, vector<1x8x2xf32>
      %727 = vector.shape_cast %726 : vector<1x8x2xf32> to vector<8x2xf32>
      %728 = vector.shape_cast %724 : vector<8x2xf32> to vector<1x8x2xf32>
      tpu.vector_store %arg8[%725, %c0_149, %c0_150], %728 {strides = array<i32>} : memref<10x8x2xf32, #tpu.memory_space<vmem>>, vector<1x8x2xf32>,
    } else {
    }
    %c1_i32 = arith.constant 1 : i32
    %c8_i32_24 = arith.constant 8 : i32
    %61 = arith.muli %c1_i32, %c8_i32_24 : i32
    %62 = tpu.assume_multiple %61, 8 : i32
    %63 = arith.index_cast %62 : i32 to index
    %c0_25 = arith.constant 0 : index
    %64 = vector.load %arg9[%63, %c0_25] : memref<128x256xf32, #tpu.memory_space<vmem>>, vector<8x256xf32>
    %cst_26 = arith.constant dense<0.000000e+00> : vector<8x256xf32>
    %65 = tpu.matmul %38, %7, %cst_26 {dimension_numbers = #tpu.dot_dimension_numbers<[1], [0], [0], [1], [0, 0, 1, 1], [], []>} : vector<8x64xf32>, vector<64x256xf32>, vector<8x256xf32> -> vector<8x256xf32>
    %66 = arith.addf %64, %65 : vector<8x256xf32>
    %67 = vector.extract_strided_slice %66 {offsets = [0, 0], sizes = [8, 192], strides = [1, 1]} : vector<8x256xf32> to vector<8x192xf32>
    %68 = arith.negf %67 : vector<8x192xf32>
    %69 = math.exp %68 : vector<8x192xf32>
    %cst_27 = arith.constant 1.000000e+00 : f32
    %70 = vector.broadcast %cst_27 : f32 to vector<8x192xf32>
    %71 = arith.addf %70, %69 : vector<8x192xf32>
    %72 = arith.divf %70, %71 : vector<8x192xf32>
    %73 = vector.extract_strided_slice %66 {offsets = [0, 192], sizes = [8, 64], strides = [1, 1]} : vector<8x256xf32> to vector<8x64xf32>
    %74 = math.tanh %73 : vector<8x64xf32>
    %75 = vector.extract_strided_slice %72 {offsets = [0, 0], sizes = [8, 64], strides = [1, 1]} : vector<8x192xf32> to vector<8x64xf32>
    %76 = vector.extract_strided_slice %72 {offsets = [0, 64], sizes = [8, 64], strides = [1, 1]} : vector<8x192xf32> to vector<8x64xf32>
    %77 = vector.extract_strided_slice %72 {offsets = [0, 128], sizes = [8, 64], strides = [1, 1]} : vector<8x192xf32> to vector<8x64xf32>
    %78 = arith.mulf %76, %36 : vector<8x64xf32>
    %79 = arith.mulf %75, %74 : vector<8x64xf32>
    %80 = arith.addf %78, %79 : vector<8x64xf32>
    %81 = math.tanh %80 : vector<8x64xf32>
    %82 = arith.mulf %77, %81 : vector<8x64xf32>
    %83 = tpu.concatenate %82, %57 in 1 : vector<8x64xf32>, vector<8x64xf32> -> vector<8x128xf32>
    %cst_28 = arith.constant dense<0.000000e+00> : vector<8x256xf32>
    %84 = tpu.matmul %83, %8, %cst_28 {dimension_numbers = #tpu.dot_dimension_numbers<[1], [0], [0], [1], [0, 0, 1, 1], [], []>} : vector<8x128xf32>, vector<128x256xf32>, vector<8x256xf32> -> vector<8x256xf32>
    %85 = arith.addf %84, %12 : vector<8x256xf32>
    %86 = vector.extract_strided_slice %85 {offsets = [0, 0], sizes = [8, 192], strides = [1, 1]} : vector<8x256xf32> to vector<8x192xf32>
    %87 = arith.negf %86 : vector<8x192xf32>
    %88 = math.exp %87 : vector<8x192xf32>
    %cst_29 = arith.constant 1.000000e+00 : f32
    %89 = vector.broadcast %cst_29 : f32 to vector<8x192xf32>
    %90 = arith.addf %89, %88 : vector<8x192xf32>
    %91 = arith.divf %89, %90 : vector<8x192xf32>
    %92 = vector.extract_strided_slice %85 {offsets = [0, 192], sizes = [8, 64], strides = [1, 1]} : vector<8x256xf32> to vector<8x64xf32>
    %93 = math.tanh %92 : vector<8x64xf32>
    %94 = vector.extract_strided_slice %91 {offsets = [0, 0], sizes = [8, 64], strides = [1, 1]} : vector<8x192xf32> to vector<8x64xf32>
    %95 = vector.extract_strided_slice %91 {offsets = [0, 64], sizes = [8, 64], strides = [1, 1]} : vector<8x192xf32> to vector<8x64xf32>
    %96 = vector.extract_strided_slice %91 {offsets = [0, 128], sizes = [8, 64], strides = [1, 1]} : vector<8x192xf32> to vector<8x64xf32>
    %97 = arith.mulf %95, %55 : vector<8x64xf32>
    %98 = arith.mulf %94, %93 : vector<8x64xf32>
    %99 = arith.addf %97, %98 : vector<8x64xf32>
    %100 = math.tanh %99 : vector<8x64xf32>
    %101 = arith.mulf %96, %100 : vector<8x64xf32>
    %c6_i32_30 = arith.constant 6 : i32
    %102 = arith.cmpi sge, %c1_i32, %c6_i32_30 : i32
    %103 = arith.extui %102 : i1 to i32
    %c0_i32_31 = arith.constant 0 : i32
    %104 = arith.cmpi ne, %103, %c0_i32_31 : i32
    scf.if %104 {
      %c6_i32_146 = arith.constant 6 : i32
      %721 = arith.subi %c1_i32, %c6_i32_146 : i32
      %c0_i32_147 = arith.constant 0 : i32
      %722 = arith.maxsi %721, %c0_i32_147 : i32
      %cst_148 = arith.constant dense<0.000000e+00> : vector<8x2xf32>
      %723 = tpu.matmul %101, %9, %cst_148 {dimension_numbers = #tpu.dot_dimension_numbers<[1], [0], [0], [1], [0, 0, 1, 1], [], []>} : vector<8x64xf32>, vector<64x2xf32>, vector<8x2xf32> -> vector<8x2xf32>
      %724 = arith.addf %723, %15 : vector<8x2xf32>
      %725 = arith.index_cast %722 : i32 to index
      %c0_149 = arith.constant 0 : index
      %c0_150 = arith.constant 0 : index
      %726 = vector.load %arg8[%725, %c0_149, %c0_150] : memref<10x8x2xf32, #tpu.memory_space<vmem>>, vector<1x8x2xf32>
      %727 = vector.shape_cast %726 : vector<1x8x2xf32> to vector<8x2xf32>
      %728 = vector.shape_cast %724 : vector<8x2xf32> to vector<1x8x2xf32>
      tpu.vector_store %arg8[%725, %c0_149, %c0_150], %728 {strides = array<i32>} : memref<10x8x2xf32, #tpu.memory_space<vmem>>, vector<1x8x2xf32>,
    } else {
    }
    %c2_i32 = arith.constant 2 : i32
    %c8_i32_32 = arith.constant 8 : i32
    %105 = arith.muli %c2_i32, %c8_i32_32 : i32
    %106 = tpu.assume_multiple %105, 8 : i32
    %107 = arith.index_cast %106 : i32 to index
    %c0_33 = arith.constant 0 : index
    %108 = vector.load %arg9[%107, %c0_33] : memref<128x256xf32, #tpu.memory_space<vmem>>, vector<8x256xf32>
    %cst_34 = arith.constant dense<0.000000e+00> : vector<8x256xf32>
    %109 = tpu.matmul %82, %7, %cst_34 {dimension_numbers = #tpu.dot_dimension_numbers<[1], [0], [0], [1], [0, 0, 1, 1], [], []>} : vector<8x64xf32>, vector<64x256xf32>, vector<8x256xf32> -> vector<8x256xf32>
    %110 = arith.addf %108, %109 : vector<8x256xf32>
    %111 = vector.extract_strided_slice %110 {offsets = [0, 0], sizes = [8, 192], strides = [1, 1]} : vector<8x256xf32> to vector<8x192xf32>
    %112 = arith.negf %111 : vector<8x192xf32>
    %113 = math.exp %112 : vector<8x192xf32>
    %cst_35 = arith.constant 1.000000e+00 : f32
    %114 = vector.broadcast %cst_35 : f32 to vector<8x192xf32>
    %115 = arith.addf %114, %113 : vector<8x192xf32>
    %116 = arith.divf %114, %115 : vector<8x192xf32>
    %117 = vector.extract_strided_slice %110 {offsets = [0, 192], sizes = [8, 64], strides = [1, 1]} : vector<8x256xf32> to vector<8x64xf32>
    %118 = math.tanh %117 : vector<8x64xf32>
    %119 = vector.extract_strided_slice %116 {offsets = [0, 0], sizes = [8, 64], strides = [1, 1]} : vector<8x192xf32> to vector<8x64xf32>
    %120 = vector.extract_strided_slice %116 {offsets = [0, 64], sizes = [8, 64], strides = [1, 1]} : vector<8x192xf32> to vector<8x64xf32>
    %121 = vector.extract_strided_slice %116 {offsets = [0, 128], sizes = [8, 64], strides = [1, 1]} : vector<8x192xf32> to vector<8x64xf32>
    %122 = arith.mulf %120, %80 : vector<8x64xf32>
    %123 = arith.mulf %119, %118 : vector<8x64xf32>
    %124 = arith.addf %122, %123 : vector<8x64xf32>
    %125 = math.tanh %124 : vector<8x64xf32>
    %126 = arith.mulf %121, %125 : vector<8x64xf32>
    %127 = tpu.concatenate %126, %101 in 1 : vector<8x64xf32>, vector<8x64xf32> -> vector<8x128xf32>
    %cst_36 = arith.constant dense<0.000000e+00> : vector<8x256xf32>
    %128 = tpu.matmul %127, %8, %cst_36 {dimension_numbers = #tpu.dot_dimension_numbers<[1], [0], [0], [1], [0, 0, 1, 1], [], []>} : vector<8x128xf32>, vector<128x256xf32>, vector<8x256xf32> -> vector<8x256xf32>
    %129 = arith.addf %128, %12 : vector<8x256xf32>
    %130 = vector.extract_strided_slice %129 {offsets = [0, 0], sizes = [8, 192], strides = [1, 1]} : vector<8x256xf32> to vector<8x192xf32>
    %131 = arith.negf %130 : vector<8x192xf32>
    %132 = math.exp %131 : vector<8x192xf32>
    %cst_37 = arith.constant 1.000000e+00 : f32
    %133 = vector.broadcast %cst_37 : f32 to vector<8x192xf32>
    %134 = arith.addf %133, %132 : vector<8x192xf32>
    %135 = arith.divf %133, %134 : vector<8x192xf32>
    %136 = vector.extract_strided_slice %129 {offsets = [0, 192], sizes = [8, 64], strides = [1, 1]} : vector<8x256xf32> to vector<8x64xf32>
    %137 = math.tanh %136 : vector<8x64xf32>
    %138 = vector.extract_strided_slice %135 {offsets = [0, 0], sizes = [8, 64], strides = [1, 1]} : vector<8x192xf32> to vector<8x64xf32>
    %139 = vector.extract_strided_slice %135 {offsets = [0, 64], sizes = [8, 64], strides = [1, 1]} : vector<8x192xf32> to vector<8x64xf32>
    %140 = vector.extract_strided_slice %135 {offsets = [0, 128], sizes = [8, 64], strides = [1, 1]} : vector<8x192xf32> to vector<8x64xf32>
    %141 = arith.mulf %139, %99 : vector<8x64xf32>
    %142 = arith.mulf %138, %137 : vector<8x64xf32>
    %143 = arith.addf %141, %142 : vector<8x64xf32>
    %144 = math.tanh %143 : vector<8x64xf32>
    %145 = arith.mulf %140, %144 : vector<8x64xf32>
    %c6_i32_38 = arith.constant 6 : i32
    %146 = arith.cmpi sge, %c2_i32, %c6_i32_38 : i32
    %147 = arith.extui %146 : i1 to i32
    %c0_i32_39 = arith.constant 0 : i32
    %148 = arith.cmpi ne, %147, %c0_i32_39 : i32
    scf.if %148 {
      %c6_i32_146 = arith.constant 6 : i32
      %721 = arith.subi %c2_i32, %c6_i32_146 : i32
      %c0_i32_147 = arith.constant 0 : i32
      %722 = arith.maxsi %721, %c0_i32_147 : i32
      %cst_148 = arith.constant dense<0.000000e+00> : vector<8x2xf32>
      %723 = tpu.matmul %145, %9, %cst_148 {dimension_numbers = #tpu.dot_dimension_numbers<[1], [0], [0], [1], [0, 0, 1, 1], [], []>} : vector<8x64xf32>, vector<64x2xf32>, vector<8x2xf32> -> vector<8x2xf32>
      %724 = arith.addf %723, %15 : vector<8x2xf32>
      %725 = arith.index_cast %722 : i32 to index
      %c0_149 = arith.constant 0 : index
      %c0_150 = arith.constant 0 : index
      %726 = vector.load %arg8[%725, %c0_149, %c0_150] : memref<10x8x2xf32, #tpu.memory_space<vmem>>, vector<1x8x2xf32>
      %727 = vector.shape_cast %726 : vector<1x8x2xf32> to vector<8x2xf32>
      %728 = vector.shape_cast %724 : vector<8x2xf32> to vector<1x8x2xf32>
      tpu.vector_store %arg8[%725, %c0_149, %c0_150], %728 {strides = array<i32>} : memref<10x8x2xf32, #tpu.memory_space<vmem>>, vector<1x8x2xf32>,
    } else {
    }
    %c3_i32 = arith.constant 3 : i32
    %c8_i32_40 = arith.constant 8 : i32
    %149 = arith.muli %c3_i32, %c8_i32_40 : i32
    %150 = tpu.assume_multiple %149, 8 : i32
    %151 = arith.index_cast %150 : i32 to index
    %c0_41 = arith.constant 0 : index
    %152 = vector.load %arg9[%151, %c0_41] : memref<128x256xf32, #tpu.memory_space<vmem>>, vector<8x256xf32>
    %cst_42 = arith.constant dense<0.000000e+00> : vector<8x256xf32>
    %153 = tpu.matmul %126, %7, %cst_42 {dimension_numbers = #tpu.dot_dimension_numbers<[1], [0], [0], [1], [0, 0, 1, 1], [], []>} : vector<8x64xf32>, vector<64x256xf32>, vector<8x256xf32> -> vector<8x256xf32>
    %154 = arith.addf %152, %153 : vector<8x256xf32>
    %155 = vector.extract_strided_slice %154 {offsets = [0, 0], sizes = [8, 192], strides = [1, 1]} : vector<8x256xf32> to vector<8x192xf32>
    %156 = arith.negf %155 : vector<8x192xf32>
    %157 = math.exp %156 : vector<8x192xf32>
    %cst_43 = arith.constant 1.000000e+00 : f32
    %158 = vector.broadcast %cst_43 : f32 to vector<8x192xf32>
    %159 = arith.addf %158, %157 : vector<8x192xf32>
    %160 = arith.divf %158, %159 : vector<8x192xf32>
    %161 = vector.extract_strided_slice %154 {offsets = [0, 192], sizes = [8, 64], strides = [1, 1]} : vector<8x256xf32> to vector<8x64xf32>
    %162 = math.tanh %161 : vector<8x64xf32>
    %163 = vector.extract_strided_slice %160 {offsets = [0, 0], sizes = [8, 64], strides = [1, 1]} : vector<8x192xf32> to vector<8x64xf32>
    %164 = vector.extract_strided_slice %160 {offsets = [0, 64], sizes = [8, 64], strides = [1, 1]} : vector<8x192xf32> to vector<8x64xf32>
    %165 = vector.extract_strided_slice %160 {offsets = [0, 128], sizes = [8, 64], strides = [1, 1]} : vector<8x192xf32> to vector<8x64xf32>
    %166 = arith.mulf %164, %124 : vector<8x64xf32>
    %167 = arith.mulf %163, %162 : vector<8x64xf32>
    %168 = arith.addf %166, %167 : vector<8x64xf32>
    %169 = math.tanh %168 : vector<8x64xf32>
    %170 = arith.mulf %165, %169 : vector<8x64xf32>
    %171 = tpu.concatenate %170, %145 in 1 : vector<8x64xf32>, vector<8x64xf32> -> vector<8x128xf32>
    %cst_44 = arith.constant dense<0.000000e+00> : vector<8x256xf32>
    %172 = tpu.matmul %171, %8, %cst_44 {dimension_numbers = #tpu.dot_dimension_numbers<[1], [0], [0], [1], [0, 0, 1, 1], [], []>} : vector<8x128xf32>, vector<128x256xf32>, vector<8x256xf32> -> vector<8x256xf32>
    %173 = arith.addf %172, %12 : vector<8x256xf32>
    %174 = vector.extract_strided_slice %173 {offsets = [0, 0], sizes = [8, 192], strides = [1, 1]} : vector<8x256xf32> to vector<8x192xf32>
    %175 = arith.negf %174 : vector<8x192xf32>
    %176 = math.exp %175 : vector<8x192xf32>
    %cst_45 = arith.constant 1.000000e+00 : f32
    %177 = vector.broadcast %cst_45 : f32 to vector<8x192xf32>
    %178 = arith.addf %177, %176 : vector<8x192xf32>
    %179 = arith.divf %177, %178 : vector<8x192xf32>
    %180 = vector.extract_strided_slice %173 {offsets = [0, 192], sizes = [8, 64], strides = [1, 1]} : vector<8x256xf32> to vector<8x64xf32>
    %181 = math.tanh %180 : vector<8x64xf32>
    %182 = vector.extract_strided_slice %179 {offsets = [0, 0], sizes = [8, 64], strides = [1, 1]} : vector<8x192xf32> to vector<8x64xf32>
    %183 = vector.extract_strided_slice %179 {offsets = [0, 64], sizes = [8, 64], strides = [1, 1]} : vector<8x192xf32> to vector<8x64xf32>
    %184 = vector.extract_strided_slice %179 {offsets = [0, 128], sizes = [8, 64], strides = [1, 1]} : vector<8x192xf32> to vector<8x64xf32>
    %185 = arith.mulf %183, %143 : vector<8x64xf32>
    %186 = arith.mulf %182, %181 : vector<8x64xf32>
    %187 = arith.addf %185, %186 : vector<8x64xf32>
    %188 = math.tanh %187 : vector<8x64xf32>
    %189 = arith.mulf %184, %188 : vector<8x64xf32>
    %c6_i32_46 = arith.constant 6 : i32
    %190 = arith.cmpi sge, %c3_i32, %c6_i32_46 : i32
    %191 = arith.extui %190 : i1 to i32
    %c0_i32_47 = arith.constant 0 : i32
    %192 = arith.cmpi ne, %191, %c0_i32_47 : i32
    scf.if %192 {
      %c6_i32_146 = arith.constant 6 : i32
      %721 = arith.subi %c3_i32, %c6_i32_146 : i32
      %c0_i32_147 = arith.constant 0 : i32
      %722 = arith.maxsi %721, %c0_i32_147 : i32
      %cst_148 = arith.constant dense<0.000000e+00> : vector<8x2xf32>
      %723 = tpu.matmul %189, %9, %cst_148 {dimension_numbers = #tpu.dot_dimension_numbers<[1], [0], [0], [1], [0, 0, 1, 1], [], []>} : vector<8x64xf32>, vector<64x2xf32>, vector<8x2xf32> -> vector<8x2xf32>
      %724 = arith.addf %723, %15 : vector<8x2xf32>
      %725 = arith.index_cast %722 : i32 to index
      %c0_149 = arith.constant 0 : index
      %c0_150 = arith.constant 0 : index
      %726 = vector.load %arg8[%725, %c0_149, %c0_150] : memref<10x8x2xf32, #tpu.memory_space<vmem>>, vector<1x8x2xf32>
      %727 = vector.shape_cast %726 : vector<1x8x2xf32> to vector<8x2xf32>
      %728 = vector.shape_cast %724 : vector<8x2xf32> to vector<1x8x2xf32>
      tpu.vector_store %arg8[%725, %c0_149, %c0_150], %728 {strides = array<i32>} : memref<10x8x2xf32, #tpu.memory_space<vmem>>, vector<1x8x2xf32>,
    } else {
    }
    %c4_i32 = arith.constant 4 : i32
    %c8_i32_48 = arith.constant 8 : i32
    %193 = arith.muli %c4_i32, %c8_i32_48 : i32
    %194 = tpu.assume_multiple %193, 8 : i32
    %195 = arith.index_cast %194 : i32 to index
    %c0_49 = arith.constant 0 : index
    %196 = vector.load %arg9[%195, %c0_49] : memref<128x256xf32, #tpu.memory_space<vmem>>, vector<8x256xf32>
    %cst_50 = arith.constant dense<0.000000e+00> : vector<8x256xf32>
    %197 = tpu.matmul %170, %7, %cst_50 {dimension_numbers = #tpu.dot_dimension_numbers<[1], [0], [0], [1], [0, 0, 1, 1], [], []>} : vector<8x64xf32>, vector<64x256xf32>, vector<8x256xf32> -> vector<8x256xf32>
    %198 = arith.addf %196, %197 : vector<8x256xf32>
    %199 = vector.extract_strided_slice %198 {offsets = [0, 0], sizes = [8, 192], strides = [1, 1]} : vector<8x256xf32> to vector<8x192xf32>
    %200 = arith.negf %199 : vector<8x192xf32>
    %201 = math.exp %200 : vector<8x192xf32>
    %cst_51 = arith.constant 1.000000e+00 : f32
    %202 = vector.broadcast %cst_51 : f32 to vector<8x192xf32>
    %203 = arith.addf %202, %201 : vector<8x192xf32>
    %204 = arith.divf %202, %203 : vector<8x192xf32>
    %205 = vector.extract_strided_slice %198 {offsets = [0, 192], sizes = [8, 64], strides = [1, 1]} : vector<8x256xf32> to vector<8x64xf32>
    %206 = math.tanh %205 : vector<8x64xf32>
    %207 = vector.extract_strided_slice %204 {offsets = [0, 0], sizes = [8, 64], strides = [1, 1]} : vector<8x192xf32> to vector<8x64xf32>
    %208 = vector.extract_strided_slice %204 {offsets = [0, 64], sizes = [8, 64], strides = [1, 1]} : vector<8x192xf32> to vector<8x64xf32>
    %209 = vector.extract_strided_slice %204 {offsets = [0, 128], sizes = [8, 64], strides = [1, 1]} : vector<8x192xf32> to vector<8x64xf32>
    %210 = arith.mulf %208, %168 : vector<8x64xf32>
    %211 = arith.mulf %207, %206 : vector<8x64xf32>
    %212 = arith.addf %210, %211 : vector<8x64xf32>
    %213 = math.tanh %212 : vector<8x64xf32>
    %214 = arith.mulf %209, %213 : vector<8x64xf32>
    %215 = tpu.concatenate %214, %189 in 1 : vector<8x64xf32>, vector<8x64xf32> -> vector<8x128xf32>
    %cst_52 = arith.constant dense<0.000000e+00> : vector<8x256xf32>
    %216 = tpu.matmul %215, %8, %cst_52 {dimension_numbers = #tpu.dot_dimension_numbers<[1], [0], [0], [1], [0, 0, 1, 1], [], []>} : vector<8x128xf32>, vector<128x256xf32>, vector<8x256xf32> -> vector<8x256xf32>
    %217 = arith.addf %216, %12 : vector<8x256xf32>
    %218 = vector.extract_strided_slice %217 {offsets = [0, 0], sizes = [8, 192], strides = [1, 1]} : vector<8x256xf32> to vector<8x192xf32>
    %219 = arith.negf %218 : vector<8x192xf32>
    %220 = math.exp %219 : vector<8x192xf32>
    %cst_53 = arith.constant 1.000000e+00 : f32
    %221 = vector.broadcast %cst_53 : f32 to vector<8x192xf32>
    %222 = arith.addf %221, %220 : vector<8x192xf32>
    %223 = arith.divf %221, %222 : vector<8x192xf32>
    %224 = vector.extract_strided_slice %217 {offsets = [0, 192], sizes = [8, 64], strides = [1, 1]} : vector<8x256xf32> to vector<8x64xf32>
    %225 = math.tanh %224 : vector<8x64xf32>
    %226 = vector.extract_strided_slice %223 {offsets = [0, 0], sizes = [8, 64], strides = [1, 1]} : vector<8x192xf32> to vector<8x64xf32>
    %227 = vector.extract_strided_slice %223 {offsets = [0, 64], sizes = [8, 64], strides = [1, 1]} : vector<8x192xf32> to vector<8x64xf32>
    %228 = vector.extract_strided_slice %223 {offsets = [0, 128], sizes = [8, 64], strides = [1, 1]} : vector<8x192xf32> to vector<8x64xf32>
    %229 = arith.mulf %227, %187 : vector<8x64xf32>
    %230 = arith.mulf %226, %225 : vector<8x64xf32>
    %231 = arith.addf %229, %230 : vector<8x64xf32>
    %232 = math.tanh %231 : vector<8x64xf32>
    %233 = arith.mulf %228, %232 : vector<8x64xf32>
    %c6_i32_54 = arith.constant 6 : i32
    %234 = arith.cmpi sge, %c4_i32, %c6_i32_54 : i32
    %235 = arith.extui %234 : i1 to i32
    %c0_i32_55 = arith.constant 0 : i32
    %236 = arith.cmpi ne, %235, %c0_i32_55 : i32
    scf.if %236 {
      %c6_i32_146 = arith.constant 6 : i32
      %721 = arith.subi %c4_i32, %c6_i32_146 : i32
      %c0_i32_147 = arith.constant 0 : i32
      %722 = arith.maxsi %721, %c0_i32_147 : i32
      %cst_148 = arith.constant dense<0.000000e+00> : vector<8x2xf32>
      %723 = tpu.matmul %233, %9, %cst_148 {dimension_numbers = #tpu.dot_dimension_numbers<[1], [0], [0], [1], [0, 0, 1, 1], [], []>} : vector<8x64xf32>, vector<64x2xf32>, vector<8x2xf32> -> vector<8x2xf32>
      %724 = arith.addf %723, %15 : vector<8x2xf32>
      %725 = arith.index_cast %722 : i32 to index
      %c0_149 = arith.constant 0 : index
      %c0_150 = arith.constant 0 : index
      %726 = vector.load %arg8[%725, %c0_149, %c0_150] : memref<10x8x2xf32, #tpu.memory_space<vmem>>, vector<1x8x2xf32>
      %727 = vector.shape_cast %726 : vector<1x8x2xf32> to vector<8x2xf32>
      %728 = vector.shape_cast %724 : vector<8x2xf32> to vector<1x8x2xf32>
      tpu.vector_store %arg8[%725, %c0_149, %c0_150], %728 {strides = array<i32>} : memref<10x8x2xf32, #tpu.memory_space<vmem>>, vector<1x8x2xf32>,
    } else {
    }
    %c5_i32 = arith.constant 5 : i32
    %c8_i32_56 = arith.constant 8 : i32
    %237 = arith.muli %c5_i32, %c8_i32_56 : i32
    %238 = tpu.assume_multiple %237, 8 : i32
    %239 = arith.index_cast %238 : i32 to index
    %c0_57 = arith.constant 0 : index
    %240 = vector.load %arg9[%239, %c0_57] : memref<128x256xf32, #tpu.memory_space<vmem>>, vector<8x256xf32>
    %cst_58 = arith.constant dense<0.000000e+00> : vector<8x256xf32>
    %241 = tpu.matmul %214, %7, %cst_58 {dimension_numbers = #tpu.dot_dimension_numbers<[1], [0], [0], [1], [0, 0, 1, 1], [], []>} : vector<8x64xf32>, vector<64x256xf32>, vector<8x256xf32> -> vector<8x256xf32>
    %242 = arith.addf %240, %241 : vector<8x256xf32>
    %243 = vector.extract_strided_slice %242 {offsets = [0, 0], sizes = [8, 192], strides = [1, 1]} : vector<8x256xf32> to vector<8x192xf32>
    %244 = arith.negf %243 : vector<8x192xf32>
    %245 = math.exp %244 : vector<8x192xf32>
    %cst_59 = arith.constant 1.000000e+00 : f32
    %246 = vector.broadcast %cst_59 : f32 to vector<8x192xf32>
    %247 = arith.addf %246, %245 : vector<8x192xf32>
    %248 = arith.divf %246, %247 : vector<8x192xf32>
    %249 = vector.extract_strided_slice %242 {offsets = [0, 192], sizes = [8, 64], strides = [1, 1]} : vector<8x256xf32> to vector<8x64xf32>
    %250 = math.tanh %249 : vector<8x64xf32>
    %251 = vector.extract_strided_slice %248 {offsets = [0, 0], sizes = [8, 64], strides = [1, 1]} : vector<8x192xf32> to vector<8x64xf32>
    %252 = vector.extract_strided_slice %248 {offsets = [0, 64], sizes = [8, 64], strides = [1, 1]} : vector<8x192xf32> to vector<8x64xf32>
    %253 = vector.extract_strided_slice %248 {offsets = [0, 128], sizes = [8, 64], strides = [1, 1]} : vector<8x192xf32> to vector<8x64xf32>
    %254 = arith.mulf %252, %212 : vector<8x64xf32>
    %255 = arith.mulf %251, %250 : vector<8x64xf32>
    %256 = arith.addf %254, %255 : vector<8x64xf32>
    %257 = math.tanh %256 : vector<8x64xf32>
    %258 = arith.mulf %253, %257 : vector<8x64xf32>
    %259 = tpu.concatenate %258, %233 in 1 : vector<8x64xf32>, vector<8x64xf32> -> vector<8x128xf32>
    %cst_60 = arith.constant dense<0.000000e+00> : vector<8x256xf32>
    %260 = tpu.matmul %259, %8, %cst_60 {dimension_numbers = #tpu.dot_dimension_numbers<[1], [0], [0], [1], [0, 0, 1, 1], [], []>} : vector<8x128xf32>, vector<128x256xf32>, vector<8x256xf32> -> vector<8x256xf32>
    %261 = arith.addf %260, %12 : vector<8x256xf32>
    %262 = vector.extract_strided_slice %261 {offsets = [0, 0], sizes = [8, 192], strides = [1, 1]} : vector<8x256xf32> to vector<8x192xf32>
    %263 = arith.negf %262 : vector<8x192xf32>
    %264 = math.exp %263 : vector<8x192xf32>
    %cst_61 = arith.constant 1.000000e+00 : f32
    %265 = vector.broadcast %cst_61 : f32 to vector<8x192xf32>
    %266 = arith.addf %265, %264 : vector<8x192xf32>
    %267 = arith.divf %265, %266 : vector<8x192xf32>
    %268 = vector.extract_strided_slice %261 {offsets = [0, 192], sizes = [8, 64], strides = [1, 1]} : vector<8x256xf32> to vector<8x64xf32>
    %269 = math.tanh %268 : vector<8x64xf32>
    %270 = vector.extract_strided_slice %267 {offsets = [0, 0], sizes = [8, 64], strides = [1, 1]} : vector<8x192xf32> to vector<8x64xf32>
    %271 = vector.extract_strided_slice %267 {offsets = [0, 64], sizes = [8, 64], strides = [1, 1]} : vector<8x192xf32> to vector<8x64xf32>
    %272 = vector.extract_strided_slice %267 {offsets = [0, 128], sizes = [8, 64], strides = [1, 1]} : vector<8x192xf32> to vector<8x64xf32>
    %273 = arith.mulf %271, %231 : vector<8x64xf32>
    %274 = arith.mulf %270, %269 : vector<8x64xf32>
    %275 = arith.addf %273, %274 : vector<8x64xf32>
    %276 = math.tanh %275 : vector<8x64xf32>
    %277 = arith.mulf %272, %276 : vector<8x64xf32>
    %c6_i32_62 = arith.constant 6 : i32
    %278 = arith.cmpi sge, %c5_i32, %c6_i32_62 : i32
    %279 = arith.extui %278 : i1 to i32
    %c0_i32_63 = arith.constant 0 : i32
    %280 = arith.cmpi ne, %279, %c0_i32_63 : i32
    scf.if %280 {
      %c6_i32_146 = arith.constant 6 : i32
      %721 = arith.subi %c5_i32, %c6_i32_146 : i32
      %c0_i32_147 = arith.constant 0 : i32
      %722 = arith.maxsi %721, %c0_i32_147 : i32
      %cst_148 = arith.constant dense<0.000000e+00> : vector<8x2xf32>
      %723 = tpu.matmul %277, %9, %cst_148 {dimension_numbers = #tpu.dot_dimension_numbers<[1], [0], [0], [1], [0, 0, 1, 1], [], []>} : vector<8x64xf32>, vector<64x2xf32>, vector<8x2xf32> -> vector<8x2xf32>
      %724 = arith.addf %723, %15 : vector<8x2xf32>
      %725 = arith.index_cast %722 : i32 to index
      %c0_149 = arith.constant 0 : index
      %c0_150 = arith.constant 0 : index
      %726 = vector.load %arg8[%725, %c0_149, %c0_150] : memref<10x8x2xf32, #tpu.memory_space<vmem>>, vector<1x8x2xf32>
      %727 = vector.shape_cast %726 : vector<1x8x2xf32> to vector<8x2xf32>
      %728 = vector.shape_cast %724 : vector<8x2xf32> to vector<1x8x2xf32>
      tpu.vector_store %arg8[%725, %c0_149, %c0_150], %728 {strides = array<i32>} : memref<10x8x2xf32, #tpu.memory_space<vmem>>, vector<1x8x2xf32>,
    } else {
    }
    %c6_i32_64 = arith.constant 6 : i32
    %c8_i32_65 = arith.constant 8 : i32
    %281 = arith.muli %c6_i32_64, %c8_i32_65 : i32
    %282 = tpu.assume_multiple %281, 8 : i32
    %283 = arith.index_cast %282 : i32 to index
    %c0_66 = arith.constant 0 : index
    %284 = vector.load %arg9[%283, %c0_66] : memref<128x256xf32, #tpu.memory_space<vmem>>, vector<8x256xf32>
    %cst_67 = arith.constant dense<0.000000e+00> : vector<8x256xf32>
    %285 = tpu.matmul %258, %7, %cst_67 {dimension_numbers = #tpu.dot_dimension_numbers<[1], [0], [0], [1], [0, 0, 1, 1], [], []>} : vector<8x64xf32>, vector<64x256xf32>, vector<8x256xf32> -> vector<8x256xf32>
    %286 = arith.addf %284, %285 : vector<8x256xf32>
    %287 = vector.extract_strided_slice %286 {offsets = [0, 0], sizes = [8, 192], strides = [1, 1]} : vector<8x256xf32> to vector<8x192xf32>
    %288 = arith.negf %287 : vector<8x192xf32>
    %289 = math.exp %288 : vector<8x192xf32>
    %cst_68 = arith.constant 1.000000e+00 : f32
    %290 = vector.broadcast %cst_68 : f32 to vector<8x192xf32>
    %291 = arith.addf %290, %289 : vector<8x192xf32>
    %292 = arith.divf %290, %291 : vector<8x192xf32>
    %293 = vector.extract_strided_slice %286 {offsets = [0, 192], sizes = [8, 64], strides = [1, 1]} : vector<8x256xf32> to vector<8x64xf32>
    %294 = math.tanh %293 : vector<8x64xf32>
    %295 = vector.extract_strided_slice %292 {offsets = [0, 0], sizes = [8, 64], strides = [1, 1]} : vector<8x192xf32> to vector<8x64xf32>
    %296 = vector.extract_strided_slice %292 {offsets = [0, 64], sizes = [8, 64], strides = [1, 1]} : vector<8x192xf32> to vector<8x64xf32>
    %297 = vector.extract_strided_slice %292 {offsets = [0, 128], sizes = [8, 64], strides = [1, 1]} : vector<8x192xf32> to vector<8x64xf32>
    %298 = arith.mulf %296, %256 : vector<8x64xf32>
    %299 = arith.mulf %295, %294 : vector<8x64xf32>
    %300 = arith.addf %298, %299 : vector<8x64xf32>
    %301 = math.tanh %300 : vector<8x64xf32>
    %302 = arith.mulf %297, %301 : vector<8x64xf32>
    %303 = tpu.concatenate %302, %277 in 1 : vector<8x64xf32>, vector<8x64xf32> -> vector<8x128xf32>
    %cst_69 = arith.constant dense<0.000000e+00> : vector<8x256xf32>
    %304 = tpu.matmul %303, %8, %cst_69 {dimension_numbers = #tpu.dot_dimension_numbers<[1], [0], [0], [1], [0, 0, 1, 1], [], []>} : vector<8x128xf32>, vector<128x256xf32>, vector<8x256xf32> -> vector<8x256xf32>
    %305 = arith.addf %304, %12 : vector<8x256xf32>
    %306 = vector.extract_strided_slice %305 {offsets = [0, 0], sizes = [8, 192], strides = [1, 1]} : vector<8x256xf32> to vector<8x192xf32>
    %307 = arith.negf %306 : vector<8x192xf32>
    %308 = math.exp %307 : vector<8x192xf32>
    %cst_70 = arith.constant 1.000000e+00 : f32
    %309 = vector.broadcast %cst_70 : f32 to vector<8x192xf32>
    %310 = arith.addf %309, %308 : vector<8x192xf32>
    %311 = arith.divf %309, %310 : vector<8x192xf32>
    %312 = vector.extract_strided_slice %305 {offsets = [0, 192], sizes = [8, 64], strides = [1, 1]} : vector<8x256xf32> to vector<8x64xf32>
    %313 = math.tanh %312 : vector<8x64xf32>
    %314 = vector.extract_strided_slice %311 {offsets = [0, 0], sizes = [8, 64], strides = [1, 1]} : vector<8x192xf32> to vector<8x64xf32>
    %315 = vector.extract_strided_slice %311 {offsets = [0, 64], sizes = [8, 64], strides = [1, 1]} : vector<8x192xf32> to vector<8x64xf32>
    %316 = vector.extract_strided_slice %311 {offsets = [0, 128], sizes = [8, 64], strides = [1, 1]} : vector<8x192xf32> to vector<8x64xf32>
    %317 = arith.mulf %315, %275 : vector<8x64xf32>
    %318 = arith.mulf %314, %313 : vector<8x64xf32>
    %319 = arith.addf %317, %318 : vector<8x64xf32>
    %320 = math.tanh %319 : vector<8x64xf32>
    %321 = arith.mulf %316, %320 : vector<8x64xf32>
    %c6_i32_71 = arith.constant 6 : i32
    %322 = arith.cmpi sge, %c6_i32_64, %c6_i32_71 : i32
    %323 = arith.extui %322 : i1 to i32
    %c0_i32_72 = arith.constant 0 : i32
    %324 = arith.cmpi ne, %323, %c0_i32_72 : i32
    scf.if %324 {
      %c6_i32_146 = arith.constant 6 : i32
      %721 = arith.subi %c6_i32_64, %c6_i32_146 : i32
      %c0_i32_147 = arith.constant 0 : i32
      %722 = arith.maxsi %721, %c0_i32_147 : i32
      %cst_148 = arith.constant dense<0.000000e+00> : vector<8x2xf32>
      %723 = tpu.matmul %321, %9, %cst_148 {dimension_numbers = #tpu.dot_dimension_numbers<[1], [0], [0], [1], [0, 0, 1, 1], [], []>} : vector<8x64xf32>, vector<64x2xf32>, vector<8x2xf32> -> vector<8x2xf32>
      %724 = arith.addf %723, %15 : vector<8x2xf32>
      %725 = arith.index_cast %722 : i32 to index
      %c0_149 = arith.constant 0 : index
      %c0_150 = arith.constant 0 : index
      %726 = vector.load %arg8[%725, %c0_149, %c0_150] : memref<10x8x2xf32, #tpu.memory_space<vmem>>, vector<1x8x2xf32>
      %727 = vector.shape_cast %726 : vector<1x8x2xf32> to vector<8x2xf32>
      %728 = vector.shape_cast %724 : vector<8x2xf32> to vector<1x8x2xf32>
      tpu.vector_store %arg8[%725, %c0_149, %c0_150], %728 {strides = array<i32>} : memref<10x8x2xf32, #tpu.memory_space<vmem>>, vector<1x8x2xf32>,
    } else {
    }
    %c7_i32 = arith.constant 7 : i32
    %c8_i32_73 = arith.constant 8 : i32
    %325 = arith.muli %c7_i32, %c8_i32_73 : i32
    %326 = tpu.assume_multiple %325, 8 : i32
    %327 = arith.index_cast %326 : i32 to index
    %c0_74 = arith.constant 0 : index
    %328 = vector.load %arg9[%327, %c0_74] : memref<128x256xf32, #tpu.memory_space<vmem>>, vector<8x256xf32>
    %cst_75 = arith.constant dense<0.000000e+00> : vector<8x256xf32>
    %329 = tpu.matmul %302, %7, %cst_75 {dimension_numbers = #tpu.dot_dimension_numbers<[1], [0], [0], [1], [0, 0, 1, 1], [], []>} : vector<8x64xf32>, vector<64x256xf32>, vector<8x256xf32> -> vector<8x256xf32>
    %330 = arith.addf %328, %329 : vector<8x256xf32>
    %331 = vector.extract_strided_slice %330 {offsets = [0, 0], sizes = [8, 192], strides = [1, 1]} : vector<8x256xf32> to vector<8x192xf32>
    %332 = arith.negf %331 : vector<8x192xf32>
    %333 = math.exp %332 : vector<8x192xf32>
    %cst_76 = arith.constant 1.000000e+00 : f32
    %334 = vector.broadcast %cst_76 : f32 to vector<8x192xf32>
    %335 = arith.addf %334, %333 : vector<8x192xf32>
    %336 = arith.divf %334, %335 : vector<8x192xf32>
    %337 = vector.extract_strided_slice %330 {offsets = [0, 192], sizes = [8, 64], strides = [1, 1]} : vector<8x256xf32> to vector<8x64xf32>
    %338 = math.tanh %337 : vector<8x64xf32>
    %339 = vector.extract_strided_slice %336 {offsets = [0, 0], sizes = [8, 64], strides = [1, 1]} : vector<8x192xf32> to vector<8x64xf32>
    %340 = vector.extract_strided_slice %336 {offsets = [0, 64], sizes = [8, 64], strides = [1, 1]} : vector<8x192xf32> to vector<8x64xf32>
    %341 = vector.extract_strided_slice %336 {offsets = [0, 128], sizes = [8, 64], strides = [1, 1]} : vector<8x192xf32> to vector<8x64xf32>
    %342 = arith.mulf %340, %300 : vector<8x64xf32>
    %343 = arith.mulf %339, %338 : vector<8x64xf32>
    %344 = arith.addf %342, %343 : vector<8x64xf32>
    %345 = math.tanh %344 : vector<8x64xf32>
    %346 = arith.mulf %341, %345 : vector<8x64xf32>
    %347 = tpu.concatenate %346, %321 in 1 : vector<8x64xf32>, vector<8x64xf32> -> vector<8x128xf32>
    %cst_77 = arith.constant dense<0.000000e+00> : vector<8x256xf32>
    %348 = tpu.matmul %347, %8, %cst_77 {dimension_numbers = #tpu.dot_dimension_numbers<[1], [0], [0], [1], [0, 0, 1, 1], [], []>} : vector<8x128xf32>, vector<128x256xf32>, vector<8x256xf32> -> vector<8x256xf32>
    %349 = arith.addf %348, %12 : vector<8x256xf32>
    %350 = vector.extract_strided_slice %349 {offsets = [0, 0], sizes = [8, 192], strides = [1, 1]} : vector<8x256xf32> to vector<8x192xf32>
    %351 = arith.negf %350 : vector<8x192xf32>
    %352 = math.exp %351 : vector<8x192xf32>
    %cst_78 = arith.constant 1.000000e+00 : f32
    %353 = vector.broadcast %cst_78 : f32 to vector<8x192xf32>
    %354 = arith.addf %353, %352 : vector<8x192xf32>
    %355 = arith.divf %353, %354 : vector<8x192xf32>
    %356 = vector.extract_strided_slice %349 {offsets = [0, 192], sizes = [8, 64], strides = [1, 1]} : vector<8x256xf32> to vector<8x64xf32>
    %357 = math.tanh %356 : vector<8x64xf32>
    %358 = vector.extract_strided_slice %355 {offsets = [0, 0], sizes = [8, 64], strides = [1, 1]} : vector<8x192xf32> to vector<8x64xf32>
    %359 = vector.extract_strided_slice %355 {offsets = [0, 64], sizes = [8, 64], strides = [1, 1]} : vector<8x192xf32> to vector<8x64xf32>
    %360 = vector.extract_strided_slice %355 {offsets = [0, 128], sizes = [8, 64], strides = [1, 1]} : vector<8x192xf32> to vector<8x64xf32>
    %361 = arith.mulf %359, %319 : vector<8x64xf32>
    %362 = arith.mulf %358, %357 : vector<8x64xf32>
    %363 = arith.addf %361, %362 : vector<8x64xf32>
    %364 = math.tanh %363 : vector<8x64xf32>
    %365 = arith.mulf %360, %364 : vector<8x64xf32>
    %c6_i32_79 = arith.constant 6 : i32
    %366 = arith.cmpi sge, %c7_i32, %c6_i32_79 : i32
    %367 = arith.extui %366 : i1 to i32
    %c0_i32_80 = arith.constant 0 : i32
    %368 = arith.cmpi ne, %367, %c0_i32_80 : i32
    scf.if %368 {
      %c6_i32_146 = arith.constant 6 : i32
      %721 = arith.subi %c7_i32, %c6_i32_146 : i32
      %c0_i32_147 = arith.constant 0 : i32
      %722 = arith.maxsi %721, %c0_i32_147 : i32
      %cst_148 = arith.constant dense<0.000000e+00> : vector<8x2xf32>
      %723 = tpu.matmul %365, %9, %cst_148 {dimension_numbers = #tpu.dot_dimension_numbers<[1], [0], [0], [1], [0, 0, 1, 1], [], []>} : vector<8x64xf32>, vector<64x2xf32>, vector<8x2xf32> -> vector<8x2xf32>
      %724 = arith.addf %723, %15 : vector<8x2xf32>
      %725 = arith.index_cast %722 : i32 to index
      %c0_149 = arith.constant 0 : index
      %c0_150 = arith.constant 0 : index
      %726 = vector.load %arg8[%725, %c0_149, %c0_150] : memref<10x8x2xf32, #tpu.memory_space<vmem>>, vector<1x8x2xf32>
      %727 = vector.shape_cast %726 : vector<1x8x2xf32> to vector<8x2xf32>
      %728 = vector.shape_cast %724 : vector<8x2xf32> to vector<1x8x2xf32>
      tpu.vector_store %arg8[%725, %c0_149, %c0_150], %728 {strides = array<i32>} : memref<10x8x2xf32, #tpu.memory_space<vmem>>, vector<1x8x2xf32>,
    } else {
    }
    %c8_i32_81 = arith.constant 8 : i32
    %c8_i32_82 = arith.constant 8 : i32
    %369 = arith.muli %c8_i32_81, %c8_i32_82 : i32
    %370 = tpu.assume_multiple %369, 8 : i32
    %371 = arith.index_cast %370 : i32 to index
    %c0_83 = arith.constant 0 : index
    %372 = vector.load %arg9[%371, %c0_83] : memref<128x256xf32, #tpu.memory_space<vmem>>, vector<8x256xf32>
    %cst_84 = arith.constant dense<0.000000e+00> : vector<8x256xf32>
    %373 = tpu.matmul %346, %7, %cst_84 {dimension_numbers = #tpu.dot_dimension_numbers<[1], [0], [0], [1], [0, 0, 1, 1], [], []>} : vector<8x64xf32>, vector<64x256xf32>, vector<8x256xf32> -> vector<8x256xf32>
    %374 = arith.addf %372, %373 : vector<8x256xf32>
    %375 = vector.extract_strided_slice %374 {offsets = [0, 0], sizes = [8, 192], strides = [1, 1]} : vector<8x256xf32> to vector<8x192xf32>
    %376 = arith.negf %375 : vector<8x192xf32>
    %377 = math.exp %376 : vector<8x192xf32>
    %cst_85 = arith.constant 1.000000e+00 : f32
    %378 = vector.broadcast %cst_85 : f32 to vector<8x192xf32>
    %379 = arith.addf %378, %377 : vector<8x192xf32>
    %380 = arith.divf %378, %379 : vector<8x192xf32>
    %381 = vector.extract_strided_slice %374 {offsets = [0, 192], sizes = [8, 64], strides = [1, 1]} : vector<8x256xf32> to vector<8x64xf32>
    %382 = math.tanh %381 : vector<8x64xf32>
    %383 = vector.extract_strided_slice %380 {offsets = [0, 0], sizes = [8, 64], strides = [1, 1]} : vector<8x192xf32> to vector<8x64xf32>
    %384 = vector.extract_strided_slice %380 {offsets = [0, 64], sizes = [8, 64], strides = [1, 1]} : vector<8x192xf32> to vector<8x64xf32>
    %385 = vector.extract_strided_slice %380 {offsets = [0, 128], sizes = [8, 64], strides = [1, 1]} : vector<8x192xf32> to vector<8x64xf32>
    %386 = arith.mulf %384, %344 : vector<8x64xf32>
    %387 = arith.mulf %383, %382 : vector<8x64xf32>
    %388 = arith.addf %386, %387 : vector<8x64xf32>
    %389 = math.tanh %388 : vector<8x64xf32>
    %390 = arith.mulf %385, %389 : vector<8x64xf32>
    %391 = tpu.concatenate %390, %365 in 1 : vector<8x64xf32>, vector<8x64xf32> -> vector<8x128xf32>
    %cst_86 = arith.constant dense<0.000000e+00> : vector<8x256xf32>
    %392 = tpu.matmul %391, %8, %cst_86 {dimension_numbers = #tpu.dot_dimension_numbers<[1], [0], [0], [1], [0, 0, 1, 1], [], []>} : vector<8x128xf32>, vector<128x256xf32>, vector<8x256xf32> -> vector<8x256xf32>
    %393 = arith.addf %392, %12 : vector<8x256xf32>
    %394 = vector.extract_strided_slice %393 {offsets = [0, 0], sizes = [8, 192], strides = [1, 1]} : vector<8x256xf32> to vector<8x192xf32>
    %395 = arith.negf %394 : vector<8x192xf32>
    %396 = math.exp %395 : vector<8x192xf32>
    %cst_87 = arith.constant 1.000000e+00 : f32
    %397 = vector.broadcast %cst_87 : f32 to vector<8x192xf32>
    %398 = arith.addf %397, %396 : vector<8x192xf32>
    %399 = arith.divf %397, %398 : vector<8x192xf32>
    %400 = vector.extract_strided_slice %393 {offsets = [0, 192], sizes = [8, 64], strides = [1, 1]} : vector<8x256xf32> to vector<8x64xf32>
    %401 = math.tanh %400 : vector<8x64xf32>
    %402 = vector.extract_strided_slice %399 {offsets = [0, 0], sizes = [8, 64], strides = [1, 1]} : vector<8x192xf32> to vector<8x64xf32>
    %403 = vector.extract_strided_slice %399 {offsets = [0, 64], sizes = [8, 64], strides = [1, 1]} : vector<8x192xf32> to vector<8x64xf32>
    %404 = vector.extract_strided_slice %399 {offsets = [0, 128], sizes = [8, 64], strides = [1, 1]} : vector<8x192xf32> to vector<8x64xf32>
    %405 = arith.mulf %403, %363 : vector<8x64xf32>
    %406 = arith.mulf %402, %401 : vector<8x64xf32>
    %407 = arith.addf %405, %406 : vector<8x64xf32>
    %408 = math.tanh %407 : vector<8x64xf32>
    %409 = arith.mulf %404, %408 : vector<8x64xf32>
    %c6_i32_88 = arith.constant 6 : i32
    %410 = arith.cmpi sge, %c8_i32_81, %c6_i32_88 : i32
    %411 = arith.extui %410 : i1 to i32
    %c0_i32_89 = arith.constant 0 : i32
    %412 = arith.cmpi ne, %411, %c0_i32_89 : i32
    scf.if %412 {
      %c6_i32_146 = arith.constant 6 : i32
      %721 = arith.subi %c8_i32_81, %c6_i32_146 : i32
      %c0_i32_147 = arith.constant 0 : i32
      %722 = arith.maxsi %721, %c0_i32_147 : i32
      %cst_148 = arith.constant dense<0.000000e+00> : vector<8x2xf32>
      %723 = tpu.matmul %409, %9, %cst_148 {dimension_numbers = #tpu.dot_dimension_numbers<[1], [0], [0], [1], [0, 0, 1, 1], [], []>} : vector<8x64xf32>, vector<64x2xf32>, vector<8x2xf32> -> vector<8x2xf32>
      %724 = arith.addf %723, %15 : vector<8x2xf32>
      %725 = arith.index_cast %722 : i32 to index
      %c0_149 = arith.constant 0 : index
      %c0_150 = arith.constant 0 : index
      %726 = vector.load %arg8[%725, %c0_149, %c0_150] : memref<10x8x2xf32, #tpu.memory_space<vmem>>, vector<1x8x2xf32>
      %727 = vector.shape_cast %726 : vector<1x8x2xf32> to vector<8x2xf32>
      %728 = vector.shape_cast %724 : vector<8x2xf32> to vector<1x8x2xf32>
      tpu.vector_store %arg8[%725, %c0_149, %c0_150], %728 {strides = array<i32>} : memref<10x8x2xf32, #tpu.memory_space<vmem>>, vector<1x8x2xf32>,
    } else {
    }
    %c9_i32 = arith.constant 9 : i32
    %c8_i32_90 = arith.constant 8 : i32
    %413 = arith.muli %c9_i32, %c8_i32_90 : i32
    %414 = tpu.assume_multiple %413, 8 : i32
    %415 = arith.index_cast %414 : i32 to index
    %c0_91 = arith.constant 0 : index
    %416 = vector.load %arg9[%415, %c0_91] : memref<128x256xf32, #tpu.memory_space<vmem>>, vector<8x256xf32>
    %cst_92 = arith.constant dense<0.000000e+00> : vector<8x256xf32>
    %417 = tpu.matmul %390, %7, %cst_92 {dimension_numbers = #tpu.dot_dimension_numbers<[1], [0], [0], [1], [0, 0, 1, 1], [], []>} : vector<8x64xf32>, vector<64x256xf32>, vector<8x256xf32> -> vector<8x256xf32>
    %418 = arith.addf %416, %417 : vector<8x256xf32>
    %419 = vector.extract_strided_slice %418 {offsets = [0, 0], sizes = [8, 192], strides = [1, 1]} : vector<8x256xf32> to vector<8x192xf32>
    %420 = arith.negf %419 : vector<8x192xf32>
    %421 = math.exp %420 : vector<8x192xf32>
    %cst_93 = arith.constant 1.000000e+00 : f32
    %422 = vector.broadcast %cst_93 : f32 to vector<8x192xf32>
    %423 = arith.addf %422, %421 : vector<8x192xf32>
    %424 = arith.divf %422, %423 : vector<8x192xf32>
    %425 = vector.extract_strided_slice %418 {offsets = [0, 192], sizes = [8, 64], strides = [1, 1]} : vector<8x256xf32> to vector<8x64xf32>
    %426 = math.tanh %425 : vector<8x64xf32>
    %427 = vector.extract_strided_slice %424 {offsets = [0, 0], sizes = [8, 64], strides = [1, 1]} : vector<8x192xf32> to vector<8x64xf32>
    %428 = vector.extract_strided_slice %424 {offsets = [0, 64], sizes = [8, 64], strides = [1, 1]} : vector<8x192xf32> to vector<8x64xf32>
    %429 = vector.extract_strided_slice %424 {offsets = [0, 128], sizes = [8, 64], strides = [1, 1]} : vector<8x192xf32> to vector<8x64xf32>
    %430 = arith.mulf %428, %388 : vector<8x64xf32>
    %431 = arith.mulf %427, %426 : vector<8x64xf32>
    %432 = arith.addf %430, %431 : vector<8x64xf32>
    %433 = math.tanh %432 : vector<8x64xf32>
    %434 = arith.mulf %429, %433 : vector<8x64xf32>
    %435 = tpu.concatenate %434, %409 in 1 : vector<8x64xf32>, vector<8x64xf32> -> vector<8x128xf32>
    %cst_94 = arith.constant dense<0.000000e+00> : vector<8x256xf32>
    %436 = tpu.matmul %435, %8, %cst_94 {dimension_numbers = #tpu.dot_dimension_numbers<[1], [0], [0], [1], [0, 0, 1, 1], [], []>} : vector<8x128xf32>, vector<128x256xf32>, vector<8x256xf32> -> vector<8x256xf32>
    %437 = arith.addf %436, %12 : vector<8x256xf32>
    %438 = vector.extract_strided_slice %437 {offsets = [0, 0], sizes = [8, 192], strides = [1, 1]} : vector<8x256xf32> to vector<8x192xf32>
    %439 = arith.negf %438 : vector<8x192xf32>
    %440 = math.exp %439 : vector<8x192xf32>
    %cst_95 = arith.constant 1.000000e+00 : f32
    %441 = vector.broadcast %cst_95 : f32 to vector<8x192xf32>
    %442 = arith.addf %441, %440 : vector<8x192xf32>
    %443 = arith.divf %441, %442 : vector<8x192xf32>
    %444 = vector.extract_strided_slice %437 {offsets = [0, 192], sizes = [8, 64], strides = [1, 1]} : vector<8x256xf32> to vector<8x64xf32>
    %445 = math.tanh %444 : vector<8x64xf32>
    %446 = vector.extract_strided_slice %443 {offsets = [0, 0], sizes = [8, 64], strides = [1, 1]} : vector<8x192xf32> to vector<8x64xf32>
    %447 = vector.extract_strided_slice %443 {offsets = [0, 64], sizes = [8, 64], strides = [1, 1]} : vector<8x192xf32> to vector<8x64xf32>
    %448 = vector.extract_strided_slice %443 {offsets = [0, 128], sizes = [8, 64], strides = [1, 1]} : vector<8x192xf32> to vector<8x64xf32>
    %449 = arith.mulf %447, %407 : vector<8x64xf32>
    %450 = arith.mulf %446, %445 : vector<8x64xf32>
    %451 = arith.addf %449, %450 : vector<8x64xf32>
    %452 = math.tanh %451 : vector<8x64xf32>
    %453 = arith.mulf %448, %452 : vector<8x64xf32>
    %c6_i32_96 = arith.constant 6 : i32
    %454 = arith.cmpi sge, %c9_i32, %c6_i32_96 : i32
    %455 = arith.extui %454 : i1 to i32
    %c0_i32_97 = arith.constant 0 : i32
    %456 = arith.cmpi ne, %455, %c0_i32_97 : i32
    scf.if %456 {
      %c6_i32_146 = arith.constant 6 : i32
      %721 = arith.subi %c9_i32, %c6_i32_146 : i32
      %c0_i32_147 = arith.constant 0 : i32
      %722 = arith.maxsi %721, %c0_i32_147 : i32
      %cst_148 = arith.constant dense<0.000000e+00> : vector<8x2xf32>
      %723 = tpu.matmul %453, %9, %cst_148 {dimension_numbers = #tpu.dot_dimension_numbers<[1], [0], [0], [1], [0, 0, 1, 1], [], []>} : vector<8x64xf32>, vector<64x2xf32>, vector<8x2xf32> -> vector<8x2xf32>
      %724 = arith.addf %723, %15 : vector<8x2xf32>
      %725 = arith.index_cast %722 : i32 to index
      %c0_149 = arith.constant 0 : index
      %c0_150 = arith.constant 0 : index
      %726 = vector.load %arg8[%725, %c0_149, %c0_150] : memref<10x8x2xf32, #tpu.memory_space<vmem>>, vector<1x8x2xf32>
      %727 = vector.shape_cast %726 : vector<1x8x2xf32> to vector<8x2xf32>
      %728 = vector.shape_cast %724 : vector<8x2xf32> to vector<1x8x2xf32>
      tpu.vector_store %arg8[%725, %c0_149, %c0_150], %728 {strides = array<i32>} : memref<10x8x2xf32, #tpu.memory_space<vmem>>, vector<1x8x2xf32>,
    } else {
    }
    %c10_i32 = arith.constant 10 : i32
    %c8_i32_98 = arith.constant 8 : i32
    %457 = arith.muli %c10_i32, %c8_i32_98 : i32
    %458 = tpu.assume_multiple %457, 8 : i32
    %459 = arith.index_cast %458 : i32 to index
    %c0_99 = arith.constant 0 : index
    %460 = vector.load %arg9[%459, %c0_99] : memref<128x256xf32, #tpu.memory_space<vmem>>, vector<8x256xf32>
    %cst_100 = arith.constant dense<0.000000e+00> : vector<8x256xf32>
    %461 = tpu.matmul %434, %7, %cst_100 {dimension_numbers = #tpu.dot_dimension_numbers<[1], [0], [0], [1], [0, 0, 1, 1], [], []>} : vector<8x64xf32>, vector<64x256xf32>, vector<8x256xf32> -> vector<8x256xf32>
    %462 = arith.addf %460, %461 : vector<8x256xf32>
    %463 = vector.extract_strided_slice %462 {offsets = [0, 0], sizes = [8, 192], strides = [1, 1]} : vector<8x256xf32> to vector<8x192xf32>
    %464 = arith.negf %463 : vector<8x192xf32>
    %465 = math.exp %464 : vector<8x192xf32>
    %cst_101 = arith.constant 1.000000e+00 : f32
    %466 = vector.broadcast %cst_101 : f32 to vector<8x192xf32>
    %467 = arith.addf %466, %465 : vector<8x192xf32>
    %468 = arith.divf %466, %467 : vector<8x192xf32>
    %469 = vector.extract_strided_slice %462 {offsets = [0, 192], sizes = [8, 64], strides = [1, 1]} : vector<8x256xf32> to vector<8x64xf32>
    %470 = math.tanh %469 : vector<8x64xf32>
    %471 = vector.extract_strided_slice %468 {offsets = [0, 0], sizes = [8, 64], strides = [1, 1]} : vector<8x192xf32> to vector<8x64xf32>
    %472 = vector.extract_strided_slice %468 {offsets = [0, 64], sizes = [8, 64], strides = [1, 1]} : vector<8x192xf32> to vector<8x64xf32>
    %473 = vector.extract_strided_slice %468 {offsets = [0, 128], sizes = [8, 64], strides = [1, 1]} : vector<8x192xf32> to vector<8x64xf32>
    %474 = arith.mulf %472, %432 : vector<8x64xf32>
    %475 = arith.mulf %471, %470 : vector<8x64xf32>
    %476 = arith.addf %474, %475 : vector<8x64xf32>
    %477 = math.tanh %476 : vector<8x64xf32>
    %478 = arith.mulf %473, %477 : vector<8x64xf32>
    %479 = tpu.concatenate %478, %453 in 1 : vector<8x64xf32>, vector<8x64xf32> -> vector<8x128xf32>
    %cst_102 = arith.constant dense<0.000000e+00> : vector<8x256xf32>
    %480 = tpu.matmul %479, %8, %cst_102 {dimension_numbers = #tpu.dot_dimension_numbers<[1], [0], [0], [1], [0, 0, 1, 1], [], []>} : vector<8x128xf32>, vector<128x256xf32>, vector<8x256xf32> -> vector<8x256xf32>
    %481 = arith.addf %480, %12 : vector<8x256xf32>
    %482 = vector.extract_strided_slice %481 {offsets = [0, 0], sizes = [8, 192], strides = [1, 1]} : vector<8x256xf32> to vector<8x192xf32>
    %483 = arith.negf %482 : vector<8x192xf32>
    %484 = math.exp %483 : vector<8x192xf32>
    %cst_103 = arith.constant 1.000000e+00 : f32
    %485 = vector.broadcast %cst_103 : f32 to vector<8x192xf32>
    %486 = arith.addf %485, %484 : vector<8x192xf32>
    %487 = arith.divf %485, %486 : vector<8x192xf32>
    %488 = vector.extract_strided_slice %481 {offsets = [0, 192], sizes = [8, 64], strides = [1, 1]} : vector<8x256xf32> to vector<8x64xf32>
    %489 = math.tanh %488 : vector<8x64xf32>
    %490 = vector.extract_strided_slice %487 {offsets = [0, 0], sizes = [8, 64], strides = [1, 1]} : vector<8x192xf32> to vector<8x64xf32>
    %491 = vector.extract_strided_slice %487 {offsets = [0, 64], sizes = [8, 64], strides = [1, 1]} : vector<8x192xf32> to vector<8x64xf32>
    %492 = vector.extract_strided_slice %487 {offsets = [0, 128], sizes = [8, 64], strides = [1, 1]} : vector<8x192xf32> to vector<8x64xf32>
    %493 = arith.mulf %491, %451 : vector<8x64xf32>
    %494 = arith.mulf %490, %489 : vector<8x64xf32>
    %495 = arith.addf %493, %494 : vector<8x64xf32>
    %496 = math.tanh %495 : vector<8x64xf32>
    %497 = arith.mulf %492, %496 : vector<8x64xf32>
    %c6_i32_104 = arith.constant 6 : i32
    %498 = arith.cmpi sge, %c10_i32, %c6_i32_104 : i32
    %499 = arith.extui %498 : i1 to i32
    %c0_i32_105 = arith.constant 0 : i32
    %500 = arith.cmpi ne, %499, %c0_i32_105 : i32
    scf.if %500 {
      %c6_i32_146 = arith.constant 6 : i32
      %721 = arith.subi %c10_i32, %c6_i32_146 : i32
      %c0_i32_147 = arith.constant 0 : i32
      %722 = arith.maxsi %721, %c0_i32_147 : i32
      %cst_148 = arith.constant dense<0.000000e+00> : vector<8x2xf32>
      %723 = tpu.matmul %497, %9, %cst_148 {dimension_numbers = #tpu.dot_dimension_numbers<[1], [0], [0], [1], [0, 0, 1, 1], [], []>} : vector<8x64xf32>, vector<64x2xf32>, vector<8x2xf32> -> vector<8x2xf32>
      %724 = arith.addf %723, %15 : vector<8x2xf32>
      %725 = arith.index_cast %722 : i32 to index
      %c0_149 = arith.constant 0 : index
      %c0_150 = arith.constant 0 : index
      %726 = vector.load %arg8[%725, %c0_149, %c0_150] : memref<10x8x2xf32, #tpu.memory_space<vmem>>, vector<1x8x2xf32>
      %727 = vector.shape_cast %726 : vector<1x8x2xf32> to vector<8x2xf32>
      %728 = vector.shape_cast %724 : vector<8x2xf32> to vector<1x8x2xf32>
      tpu.vector_store %arg8[%725, %c0_149, %c0_150], %728 {strides = array<i32>} : memref<10x8x2xf32, #tpu.memory_space<vmem>>, vector<1x8x2xf32>,
    } else {
    }
    %c11_i32 = arith.constant 11 : i32
    %c8_i32_106 = arith.constant 8 : i32
    %501 = arith.muli %c11_i32, %c8_i32_106 : i32
    %502 = tpu.assume_multiple %501, 8 : i32
    %503 = arith.index_cast %502 : i32 to index
    %c0_107 = arith.constant 0 : index
    %504 = vector.load %arg9[%503, %c0_107] : memref<128x256xf32, #tpu.memory_space<vmem>>, vector<8x256xf32>
    %cst_108 = arith.constant dense<0.000000e+00> : vector<8x256xf32>
    %505 = tpu.matmul %478, %7, %cst_108 {dimension_numbers = #tpu.dot_dimension_numbers<[1], [0], [0], [1], [0, 0, 1, 1], [], []>} : vector<8x64xf32>, vector<64x256xf32>, vector<8x256xf32> -> vector<8x256xf32>
    %506 = arith.addf %504, %505 : vector<8x256xf32>
    %507 = vector.extract_strided_slice %506 {offsets = [0, 0], sizes = [8, 192], strides = [1, 1]} : vector<8x256xf32> to vector<8x192xf32>
    %508 = arith.negf %507 : vector<8x192xf32>
    %509 = math.exp %508 : vector<8x192xf32>
    %cst_109 = arith.constant 1.000000e+00 : f32
    %510 = vector.broadcast %cst_109 : f32 to vector<8x192xf32>
    %511 = arith.addf %510, %509 : vector<8x192xf32>
    %512 = arith.divf %510, %511 : vector<8x192xf32>
    %513 = vector.extract_strided_slice %506 {offsets = [0, 192], sizes = [8, 64], strides = [1, 1]} : vector<8x256xf32> to vector<8x64xf32>
    %514 = math.tanh %513 : vector<8x64xf32>
    %515 = vector.extract_strided_slice %512 {offsets = [0, 0], sizes = [8, 64], strides = [1, 1]} : vector<8x192xf32> to vector<8x64xf32>
    %516 = vector.extract_strided_slice %512 {offsets = [0, 64], sizes = [8, 64], strides = [1, 1]} : vector<8x192xf32> to vector<8x64xf32>
    %517 = vector.extract_strided_slice %512 {offsets = [0, 128], sizes = [8, 64], strides = [1, 1]} : vector<8x192xf32> to vector<8x64xf32>
    %518 = arith.mulf %516, %476 : vector<8x64xf32>
    %519 = arith.mulf %515, %514 : vector<8x64xf32>
    %520 = arith.addf %518, %519 : vector<8x64xf32>
    %521 = math.tanh %520 : vector<8x64xf32>
    %522 = arith.mulf %517, %521 : vector<8x64xf32>
    %523 = tpu.concatenate %522, %497 in 1 : vector<8x64xf32>, vector<8x64xf32> -> vector<8x128xf32>
    %cst_110 = arith.constant dense<0.000000e+00> : vector<8x256xf32>
    %524 = tpu.matmul %523, %8, %cst_110 {dimension_numbers = #tpu.dot_dimension_numbers<[1], [0], [0], [1], [0, 0, 1, 1], [], []>} : vector<8x128xf32>, vector<128x256xf32>, vector<8x256xf32> -> vector<8x256xf32>
    %525 = arith.addf %524, %12 : vector<8x256xf32>
    %526 = vector.extract_strided_slice %525 {offsets = [0, 0], sizes = [8, 192], strides = [1, 1]} : vector<8x256xf32> to vector<8x192xf32>
    %527 = arith.negf %526 : vector<8x192xf32>
    %528 = math.exp %527 : vector<8x192xf32>
    %cst_111 = arith.constant 1.000000e+00 : f32
    %529 = vector.broadcast %cst_111 : f32 to vector<8x192xf32>
    %530 = arith.addf %529, %528 : vector<8x192xf32>
    %531 = arith.divf %529, %530 : vector<8x192xf32>
    %532 = vector.extract_strided_slice %525 {offsets = [0, 192], sizes = [8, 64], strides = [1, 1]} : vector<8x256xf32> to vector<8x64xf32>
    %533 = math.tanh %532 : vector<8x64xf32>
    %534 = vector.extract_strided_slice %531 {offsets = [0, 0], sizes = [8, 64], strides = [1, 1]} : vector<8x192xf32> to vector<8x64xf32>
    %535 = vector.extract_strided_slice %531 {offsets = [0, 64], sizes = [8, 64], strides = [1, 1]} : vector<8x192xf32> to vector<8x64xf32>
    %536 = vector.extract_strided_slice %531 {offsets = [0, 128], sizes = [8, 64], strides = [1, 1]} : vector<8x192xf32> to vector<8x64xf32>
    %537 = arith.mulf %535, %495 : vector<8x64xf32>
    %538 = arith.mulf %534, %533 : vector<8x64xf32>
    %539 = arith.addf %537, %538 : vector<8x64xf32>
    %540 = math.tanh %539 : vector<8x64xf32>
    %541 = arith.mulf %536, %540 : vector<8x64xf32>
    %c6_i32_112 = arith.constant 6 : i32
    %542 = arith.cmpi sge, %c11_i32, %c6_i32_112 : i32
    %543 = arith.extui %542 : i1 to i32
    %c0_i32_113 = arith.constant 0 : i32
    %544 = arith.cmpi ne, %543, %c0_i32_113 : i32
    scf.if %544 {
      %c6_i32_146 = arith.constant 6 : i32
      %721 = arith.subi %c11_i32, %c6_i32_146 : i32
      %c0_i32_147 = arith.constant 0 : i32
      %722 = arith.maxsi %721, %c0_i32_147 : i32
      %cst_148 = arith.constant dense<0.000000e+00> : vector<8x2xf32>
      %723 = tpu.matmul %541, %9, %cst_148 {dimension_numbers = #tpu.dot_dimension_numbers<[1], [0], [0], [1], [0, 0, 1, 1], [], []>} : vector<8x64xf32>, vector<64x2xf32>, vector<8x2xf32> -> vector<8x2xf32>
      %724 = arith.addf %723, %15 : vector<8x2xf32>
      %725 = arith.index_cast %722 : i32 to index
      %c0_149 = arith.constant 0 : index
      %c0_150 = arith.constant 0 : index
      %726 = vector.load %arg8[%725, %c0_149, %c0_150] : memref<10x8x2xf32, #tpu.memory_space<vmem>>, vector<1x8x2xf32>
      %727 = vector.shape_cast %726 : vector<1x8x2xf32> to vector<8x2xf32>
      %728 = vector.shape_cast %724 : vector<8x2xf32> to vector<1x8x2xf32>
      tpu.vector_store %arg8[%725, %c0_149, %c0_150], %728 {strides = array<i32>} : memref<10x8x2xf32, #tpu.memory_space<vmem>>, vector<1x8x2xf32>,
    } else {
    }
    %c12_i32 = arith.constant 12 : i32
    %c8_i32_114 = arith.constant 8 : i32
    %545 = arith.muli %c12_i32, %c8_i32_114 : i32
    %546 = tpu.assume_multiple %545, 8 : i32
    %547 = arith.index_cast %546 : i32 to index
    %c0_115 = arith.constant 0 : index
    %548 = vector.load %arg9[%547, %c0_115] : memref<128x256xf32, #tpu.memory_space<vmem>>, vector<8x256xf32>
    %cst_116 = arith.constant dense<0.000000e+00> : vector<8x256xf32>
    %549 = tpu.matmul %522, %7, %cst_116 {dimension_numbers = #tpu.dot_dimension_numbers<[1], [0], [0], [1], [0, 0, 1, 1], [], []>} : vector<8x64xf32>, vector<64x256xf32>, vector<8x256xf32> -> vector<8x256xf32>
    %550 = arith.addf %548, %549 : vector<8x256xf32>
    %551 = vector.extract_strided_slice %550 {offsets = [0, 0], sizes = [8, 192], strides = [1, 1]} : vector<8x256xf32> to vector<8x192xf32>
    %552 = arith.negf %551 : vector<8x192xf32>
    %553 = math.exp %552 : vector<8x192xf32>
    %cst_117 = arith.constant 1.000000e+00 : f32
    %554 = vector.broadcast %cst_117 : f32 to vector<8x192xf32>
    %555 = arith.addf %554, %553 : vector<8x192xf32>
    %556 = arith.divf %554, %555 : vector<8x192xf32>
    %557 = vector.extract_strided_slice %550 {offsets = [0, 192], sizes = [8, 64], strides = [1, 1]} : vector<8x256xf32> to vector<8x64xf32>
    %558 = math.tanh %557 : vector<8x64xf32>
    %559 = vector.extract_strided_slice %556 {offsets = [0, 0], sizes = [8, 64], strides = [1, 1]} : vector<8x192xf32> to vector<8x64xf32>
    %560 = vector.extract_strided_slice %556 {offsets = [0, 64], sizes = [8, 64], strides = [1, 1]} : vector<8x192xf32> to vector<8x64xf32>
    %561 = vector.extract_strided_slice %556 {offsets = [0, 128], sizes = [8, 64], strides = [1, 1]} : vector<8x192xf32> to vector<8x64xf32>
    %562 = arith.mulf %560, %520 : vector<8x64xf32>
    %563 = arith.mulf %559, %558 : vector<8x64xf32>
    %564 = arith.addf %562, %563 : vector<8x64xf32>
    %565 = math.tanh %564 : vector<8x64xf32>
    %566 = arith.mulf %561, %565 : vector<8x64xf32>
    %567 = tpu.concatenate %566, %541 in 1 : vector<8x64xf32>, vector<8x64xf32> -> vector<8x128xf32>
    %cst_118 = arith.constant dense<0.000000e+00> : vector<8x256xf32>
    %568 = tpu.matmul %567, %8, %cst_118 {dimension_numbers = #tpu.dot_dimension_numbers<[1], [0], [0], [1], [0, 0, 1, 1], [], []>} : vector<8x128xf32>, vector<128x256xf32>, vector<8x256xf32> -> vector<8x256xf32>
    %569 = arith.addf %568, %12 : vector<8x256xf32>
    %570 = vector.extract_strided_slice %569 {offsets = [0, 0], sizes = [8, 192], strides = [1, 1]} : vector<8x256xf32> to vector<8x192xf32>
    %571 = arith.negf %570 : vector<8x192xf32>
    %572 = math.exp %571 : vector<8x192xf32>
    %cst_119 = arith.constant 1.000000e+00 : f32
    %573 = vector.broadcast %cst_119 : f32 to vector<8x192xf32>
    %574 = arith.addf %573, %572 : vector<8x192xf32>
    %575 = arith.divf %573, %574 : vector<8x192xf32>
    %576 = vector.extract_strided_slice %569 {offsets = [0, 192], sizes = [8, 64], strides = [1, 1]} : vector<8x256xf32> to vector<8x64xf32>
    %577 = math.tanh %576 : vector<8x64xf32>
    %578 = vector.extract_strided_slice %575 {offsets = [0, 0], sizes = [8, 64], strides = [1, 1]} : vector<8x192xf32> to vector<8x64xf32>
    %579 = vector.extract_strided_slice %575 {offsets = [0, 64], sizes = [8, 64], strides = [1, 1]} : vector<8x192xf32> to vector<8x64xf32>
    %580 = vector.extract_strided_slice %575 {offsets = [0, 128], sizes = [8, 64], strides = [1, 1]} : vector<8x192xf32> to vector<8x64xf32>
    %581 = arith.mulf %579, %539 : vector<8x64xf32>
    %582 = arith.mulf %578, %577 : vector<8x64xf32>
    %583 = arith.addf %581, %582 : vector<8x64xf32>
    %584 = math.tanh %583 : vector<8x64xf32>
    %585 = arith.mulf %580, %584 : vector<8x64xf32>
    %c6_i32_120 = arith.constant 6 : i32
    %586 = arith.cmpi sge, %c12_i32, %c6_i32_120 : i32
    %587 = arith.extui %586 : i1 to i32
    %c0_i32_121 = arith.constant 0 : i32
    %588 = arith.cmpi ne, %587, %c0_i32_121 : i32
    scf.if %588 {
      %c6_i32_146 = arith.constant 6 : i32
      %721 = arith.subi %c12_i32, %c6_i32_146 : i32
      %c0_i32_147 = arith.constant 0 : i32
      %722 = arith.maxsi %721, %c0_i32_147 : i32
      %cst_148 = arith.constant dense<0.000000e+00> : vector<8x2xf32>
      %723 = tpu.matmul %585, %9, %cst_148 {dimension_numbers = #tpu.dot_dimension_numbers<[1], [0], [0], [1], [0, 0, 1, 1], [], []>} : vector<8x64xf32>, vector<64x2xf32>, vector<8x2xf32> -> vector<8x2xf32>
      %724 = arith.addf %723, %15 : vector<8x2xf32>
      %725 = arith.index_cast %722 : i32 to index
      %c0_149 = arith.constant 0 : index
      %c0_150 = arith.constant 0 : index
      %726 = vector.load %arg8[%725, %c0_149, %c0_150] : memref<10x8x2xf32, #tpu.memory_space<vmem>>, vector<1x8x2xf32>
      %727 = vector.shape_cast %726 : vector<1x8x2xf32> to vector<8x2xf32>
      %728 = vector.shape_cast %724 : vector<8x2xf32> to vector<1x8x2xf32>
      tpu.vector_store %arg8[%725, %c0_149, %c0_150], %728 {strides = array<i32>} : memref<10x8x2xf32, #tpu.memory_space<vmem>>, vector<1x8x2xf32>,
    } else {
    }
    %c13_i32 = arith.constant 13 : i32
    %c8_i32_122 = arith.constant 8 : i32
    %589 = arith.muli %c13_i32, %c8_i32_122 : i32
    %590 = tpu.assume_multiple %589, 8 : i32
    %591 = arith.index_cast %590 : i32 to index
    %c0_123 = arith.constant 0 : index
    %592 = vector.load %arg9[%591, %c0_123] : memref<128x256xf32, #tpu.memory_space<vmem>>, vector<8x256xf32>
    %cst_124 = arith.constant dense<0.000000e+00> : vector<8x256xf32>
    %593 = tpu.matmul %566, %7, %cst_124 {dimension_numbers = #tpu.dot_dimension_numbers<[1], [0], [0], [1], [0, 0, 1, 1], [], []>} : vector<8x64xf32>, vector<64x256xf32>, vector<8x256xf32> -> vector<8x256xf32>
    %594 = arith.addf %592, %593 : vector<8x256xf32>
    %595 = vector.extract_strided_slice %594 {offsets = [0, 0], sizes = [8, 192], strides = [1, 1]} : vector<8x256xf32> to vector<8x192xf32>
    %596 = arith.negf %595 : vector<8x192xf32>
    %597 = math.exp %596 : vector<8x192xf32>
    %cst_125 = arith.constant 1.000000e+00 : f32
    %598 = vector.broadcast %cst_125 : f32 to vector<8x192xf32>
    %599 = arith.addf %598, %597 : vector<8x192xf32>
    %600 = arith.divf %598, %599 : vector<8x192xf32>
    %601 = vector.extract_strided_slice %594 {offsets = [0, 192], sizes = [8, 64], strides = [1, 1]} : vector<8x256xf32> to vector<8x64xf32>
    %602 = math.tanh %601 : vector<8x64xf32>
    %603 = vector.extract_strided_slice %600 {offsets = [0, 0], sizes = [8, 64], strides = [1, 1]} : vector<8x192xf32> to vector<8x64xf32>
    %604 = vector.extract_strided_slice %600 {offsets = [0, 64], sizes = [8, 64], strides = [1, 1]} : vector<8x192xf32> to vector<8x64xf32>
    %605 = vector.extract_strided_slice %600 {offsets = [0, 128], sizes = [8, 64], strides = [1, 1]} : vector<8x192xf32> to vector<8x64xf32>
    %606 = arith.mulf %604, %564 : vector<8x64xf32>
    %607 = arith.mulf %603, %602 : vector<8x64xf32>
    %608 = arith.addf %606, %607 : vector<8x64xf32>
    %609 = math.tanh %608 : vector<8x64xf32>
    %610 = arith.mulf %605, %609 : vector<8x64xf32>
    %611 = tpu.concatenate %610, %585 in 1 : vector<8x64xf32>, vector<8x64xf32> -> vector<8x128xf32>
    %cst_126 = arith.constant dense<0.000000e+00> : vector<8x256xf32>
    %612 = tpu.matmul %611, %8, %cst_126 {dimension_numbers = #tpu.dot_dimension_numbers<[1], [0], [0], [1], [0, 0, 1, 1], [], []>} : vector<8x128xf32>, vector<128x256xf32>, vector<8x256xf32> -> vector<8x256xf32>
    %613 = arith.addf %612, %12 : vector<8x256xf32>
    %614 = vector.extract_strided_slice %613 {offsets = [0, 0], sizes = [8, 192], strides = [1, 1]} : vector<8x256xf32> to vector<8x192xf32>
    %615 = arith.negf %614 : vector<8x192xf32>
    %616 = math.exp %615 : vector<8x192xf32>
    %cst_127 = arith.constant 1.000000e+00 : f32
    %617 = vector.broadcast %cst_127 : f32 to vector<8x192xf32>
    %618 = arith.addf %617, %616 : vector<8x192xf32>
    %619 = arith.divf %617, %618 : vector<8x192xf32>
    %620 = vector.extract_strided_slice %613 {offsets = [0, 192], sizes = [8, 64], strides = [1, 1]} : vector<8x256xf32> to vector<8x64xf32>
    %621 = math.tanh %620 : vector<8x64xf32>
    %622 = vector.extract_strided_slice %619 {offsets = [0, 0], sizes = [8, 64], strides = [1, 1]} : vector<8x192xf32> to vector<8x64xf32>
    %623 = vector.extract_strided_slice %619 {offsets = [0, 64], sizes = [8, 64], strides = [1, 1]} : vector<8x192xf32> to vector<8x64xf32>
    %624 = vector.extract_strided_slice %619 {offsets = [0, 128], sizes = [8, 64], strides = [1, 1]} : vector<8x192xf32> to vector<8x64xf32>
    %625 = arith.mulf %623, %583 : vector<8x64xf32>
    %626 = arith.mulf %622, %621 : vector<8x64xf32>
    %627 = arith.addf %625, %626 : vector<8x64xf32>
    %628 = math.tanh %627 : vector<8x64xf32>
    %629 = arith.mulf %624, %628 : vector<8x64xf32>
    %c6_i32_128 = arith.constant 6 : i32
    %630 = arith.cmpi sge, %c13_i32, %c6_i32_128 : i32
    %631 = arith.extui %630 : i1 to i32
    %c0_i32_129 = arith.constant 0 : i32
    %632 = arith.cmpi ne, %631, %c0_i32_129 : i32
    scf.if %632 {
      %c6_i32_146 = arith.constant 6 : i32
      %721 = arith.subi %c13_i32, %c6_i32_146 : i32
      %c0_i32_147 = arith.constant 0 : i32
      %722 = arith.maxsi %721, %c0_i32_147 : i32
      %cst_148 = arith.constant dense<0.000000e+00> : vector<8x2xf32>
      %723 = tpu.matmul %629, %9, %cst_148 {dimension_numbers = #tpu.dot_dimension_numbers<[1], [0], [0], [1], [0, 0, 1, 1], [], []>} : vector<8x64xf32>, vector<64x2xf32>, vector<8x2xf32> -> vector<8x2xf32>
      %724 = arith.addf %723, %15 : vector<8x2xf32>
      %725 = arith.index_cast %722 : i32 to index
      %c0_149 = arith.constant 0 : index
      %c0_150 = arith.constant 0 : index
      %726 = vector.load %arg8[%725, %c0_149, %c0_150] : memref<10x8x2xf32, #tpu.memory_space<vmem>>, vector<1x8x2xf32>
      %727 = vector.shape_cast %726 : vector<1x8x2xf32> to vector<8x2xf32>
      %728 = vector.shape_cast %724 : vector<8x2xf32> to vector<1x8x2xf32>
      tpu.vector_store %arg8[%725, %c0_149, %c0_150], %728 {strides = array<i32>} : memref<10x8x2xf32, #tpu.memory_space<vmem>>, vector<1x8x2xf32>,
    } else {
    }
    %c14_i32 = arith.constant 14 : i32
    %c8_i32_130 = arith.constant 8 : i32
    %633 = arith.muli %c14_i32, %c8_i32_130 : i32
    %634 = tpu.assume_multiple %633, 8 : i32
    %635 = arith.index_cast %634 : i32 to index
    %c0_131 = arith.constant 0 : index
    %636 = vector.load %arg9[%635, %c0_131] : memref<128x256xf32, #tpu.memory_space<vmem>>, vector<8x256xf32>
    %cst_132 = arith.constant dense<0.000000e+00> : vector<8x256xf32>
    %637 = tpu.matmul %610, %7, %cst_132 {dimension_numbers = #tpu.dot_dimension_numbers<[1], [0], [0], [1], [0, 0, 1, 1], [], []>} : vector<8x64xf32>, vector<64x256xf32>, vector<8x256xf32> -> vector<8x256xf32>
    %638 = arith.addf %636, %637 : vector<8x256xf32>
    %639 = vector.extract_strided_slice %638 {offsets = [0, 0], sizes = [8, 192], strides = [1, 1]} : vector<8x256xf32> to vector<8x192xf32>
    %640 = arith.negf %639 : vector<8x192xf32>
    %641 = math.exp %640 : vector<8x192xf32>
    %cst_133 = arith.constant 1.000000e+00 : f32
    %642 = vector.broadcast %cst_133 : f32 to vector<8x192xf32>
    %643 = arith.addf %642, %641 : vector<8x192xf32>
    %644 = arith.divf %642, %643 : vector<8x192xf32>
    %645 = vector.extract_strided_slice %638 {offsets = [0, 192], sizes = [8, 64], strides = [1, 1]} : vector<8x256xf32> to vector<8x64xf32>
    %646 = math.tanh %645 : vector<8x64xf32>
    %647 = vector.extract_strided_slice %644 {offsets = [0, 0], sizes = [8, 64], strides = [1, 1]} : vector<8x192xf32> to vector<8x64xf32>
    %648 = vector.extract_strided_slice %644 {offsets = [0, 64], sizes = [8, 64], strides = [1, 1]} : vector<8x192xf32> to vector<8x64xf32>
    %649 = vector.extract_strided_slice %644 {offsets = [0, 128], sizes = [8, 64], strides = [1, 1]} : vector<8x192xf32> to vector<8x64xf32>
    %650 = arith.mulf %648, %608 : vector<8x64xf32>
    %651 = arith.mulf %647, %646 : vector<8x64xf32>
    %652 = arith.addf %650, %651 : vector<8x64xf32>
    %653 = math.tanh %652 : vector<8x64xf32>
    %654 = arith.mulf %649, %653 : vector<8x64xf32>
    %655 = tpu.concatenate %654, %629 in 1 : vector<8x64xf32>, vector<8x64xf32> -> vector<8x128xf32>
    %cst_134 = arith.constant dense<0.000000e+00> : vector<8x256xf32>
    %656 = tpu.matmul %655, %8, %cst_134 {dimension_numbers = #tpu.dot_dimension_numbers<[1], [0], [0], [1], [0, 0, 1, 1], [], []>} : vector<8x128xf32>, vector<128x256xf32>, vector<8x256xf32> -> vector<8x256xf32>
    %657 = arith.addf %656, %12 : vector<8x256xf32>
    %658 = vector.extract_strided_slice %657 {offsets = [0, 0], sizes = [8, 192], strides = [1, 1]} : vector<8x256xf32> to vector<8x192xf32>
    %659 = arith.negf %658 : vector<8x192xf32>
    %660 = math.exp %659 : vector<8x192xf32>
    %cst_135 = arith.constant 1.000000e+00 : f32
    %661 = vector.broadcast %cst_135 : f32 to vector<8x192xf32>
    %662 = arith.addf %661, %660 : vector<8x192xf32>
    %663 = arith.divf %661, %662 : vector<8x192xf32>
    %664 = vector.extract_strided_slice %657 {offsets = [0, 192], sizes = [8, 64], strides = [1, 1]} : vector<8x256xf32> to vector<8x64xf32>
    %665 = math.tanh %664 : vector<8x64xf32>
    %666 = vector.extract_strided_slice %663 {offsets = [0, 0], sizes = [8, 64], strides = [1, 1]} : vector<8x192xf32> to vector<8x64xf32>
    %667 = vector.extract_strided_slice %663 {offsets = [0, 64], sizes = [8, 64], strides = [1, 1]} : vector<8x192xf32> to vector<8x64xf32>
    %668 = vector.extract_strided_slice %663 {offsets = [0, 128], sizes = [8, 64], strides = [1, 1]} : vector<8x192xf32> to vector<8x64xf32>
    %669 = arith.mulf %667, %627 : vector<8x64xf32>
    %670 = arith.mulf %666, %665 : vector<8x64xf32>
    %671 = arith.addf %669, %670 : vector<8x64xf32>
    %672 = math.tanh %671 : vector<8x64xf32>
    %673 = arith.mulf %668, %672 : vector<8x64xf32>
    %c6_i32_136 = arith.constant 6 : i32
    %674 = arith.cmpi sge, %c14_i32, %c6_i32_136 : i32
    %675 = arith.extui %674 : i1 to i32
    %c0_i32_137 = arith.constant 0 : i32
    %676 = arith.cmpi ne, %675, %c0_i32_137 : i32
    scf.if %676 {
      %c6_i32_146 = arith.constant 6 : i32
      %721 = arith.subi %c14_i32, %c6_i32_146 : i32
      %c0_i32_147 = arith.constant 0 : i32
      %722 = arith.maxsi %721, %c0_i32_147 : i32
      %cst_148 = arith.constant dense<0.000000e+00> : vector<8x2xf32>
      %723 = tpu.matmul %673, %9, %cst_148 {dimension_numbers = #tpu.dot_dimension_numbers<[1], [0], [0], [1], [0, 0, 1, 1], [], []>} : vector<8x64xf32>, vector<64x2xf32>, vector<8x2xf32> -> vector<8x2xf32>
      %724 = arith.addf %723, %15 : vector<8x2xf32>
      %725 = arith.index_cast %722 : i32 to index
      %c0_149 = arith.constant 0 : index
      %c0_150 = arith.constant 0 : index
      %726 = vector.load %arg8[%725, %c0_149, %c0_150] : memref<10x8x2xf32, #tpu.memory_space<vmem>>, vector<1x8x2xf32>
      %727 = vector.shape_cast %726 : vector<1x8x2xf32> to vector<8x2xf32>
      %728 = vector.shape_cast %724 : vector<8x2xf32> to vector<1x8x2xf32>
      tpu.vector_store %arg8[%725, %c0_149, %c0_150], %728 {strides = array<i32>} : memref<10x8x2xf32, #tpu.memory_space<vmem>>, vector<1x8x2xf32>,
    } else {
    }
    %c15_i32 = arith.constant 15 : i32
    %c8_i32_138 = arith.constant 8 : i32
    %677 = arith.muli %c15_i32, %c8_i32_138 : i32
    %678 = tpu.assume_multiple %677, 8 : i32
    %679 = arith.index_cast %678 : i32 to index
    %c0_139 = arith.constant 0 : index
    %680 = vector.load %arg9[%679, %c0_139] : memref<128x256xf32, #tpu.memory_space<vmem>>, vector<8x256xf32>
    %cst_140 = arith.constant dense<0.000000e+00> : vector<8x256xf32>
    %681 = tpu.matmul %654, %7, %cst_140 {dimension_numbers = #tpu.dot_dimension_numbers<[1], [0], [0], [1], [0, 0, 1, 1], [], []>} : vector<8x64xf32>, vector<64x256xf32>, vector<8x256xf32> -> vector<8x256xf32>
    %682 = arith.addf %680, %681 : vector<8x256xf32>
    %683 = vector.extract_strided_slice %682 {offsets = [0, 0], sizes = [8, 192], strides = [1, 1]} : vector<8x256xf32> to vector<8x192xf32>
    %684 = arith.negf %683 : vector<8x192xf32>
    %685 = math.exp %684 : vector<8x192xf32>
    %cst_141 = arith.constant 1.000000e+00 : f32
    %686 = vector.broadcast %cst_141 : f32 to vector<8x192xf32>
    %687 = arith.addf %686, %685 : vector<8x192xf32>
    %688 = arith.divf %686, %687 : vector<8x192xf32>
    %689 = vector.extract_strided_slice %682 {offsets = [0, 192], sizes = [8, 64], strides = [1, 1]} : vector<8x256xf32> to vector<8x64xf32>
    %690 = math.tanh %689 : vector<8x64xf32>
    %691 = vector.extract_strided_slice %688 {offsets = [0, 0], sizes = [8, 64], strides = [1, 1]} : vector<8x192xf32> to vector<8x64xf32>
    %692 = vector.extract_strided_slice %688 {offsets = [0, 64], sizes = [8, 64], strides = [1, 1]} : vector<8x192xf32> to vector<8x64xf32>
    %693 = vector.extract_strided_slice %688 {offsets = [0, 128], sizes = [8, 64], strides = [1, 1]} : vector<8x192xf32> to vector<8x64xf32>
    %694 = arith.mulf %692, %652 : vector<8x64xf32>
    %695 = arith.mulf %691, %690 : vector<8x64xf32>
    %696 = arith.addf %694, %695 : vector<8x64xf32>
    %697 = math.tanh %696 : vector<8x64xf32>
    %698 = arith.mulf %693, %697 : vector<8x64xf32>
    %699 = tpu.concatenate %698, %673 in 1 : vector<8x64xf32>, vector<8x64xf32> -> vector<8x128xf32>
    %cst_142 = arith.constant dense<0.000000e+00> : vector<8x256xf32>
    %700 = tpu.matmul %699, %8, %cst_142 {dimension_numbers = #tpu.dot_dimension_numbers<[1], [0], [0], [1], [0, 0, 1, 1], [], []>} : vector<8x128xf32>, vector<128x256xf32>, vector<8x256xf32> -> vector<8x256xf32>
    %701 = arith.addf %700, %12 : vector<8x256xf32>
    %702 = vector.extract_strided_slice %701 {offsets = [0, 0], sizes = [8, 192], strides = [1, 1]} : vector<8x256xf32> to vector<8x192xf32>
    %703 = arith.negf %702 : vector<8x192xf32>
    %704 = math.exp %703 : vector<8x192xf32>
    %cst_143 = arith.constant 1.000000e+00 : f32
    %705 = vector.broadcast %cst_143 : f32 to vector<8x192xf32>
    %706 = arith.addf %705, %704 : vector<8x192xf32>
    %707 = arith.divf %705, %706 : vector<8x192xf32>
    %708 = vector.extract_strided_slice %701 {offsets = [0, 192], sizes = [8, 64], strides = [1, 1]} : vector<8x256xf32> to vector<8x64xf32>
    %709 = math.tanh %708 : vector<8x64xf32>
    %710 = vector.extract_strided_slice %707 {offsets = [0, 0], sizes = [8, 64], strides = [1, 1]} : vector<8x192xf32> to vector<8x64xf32>
    %711 = vector.extract_strided_slice %707 {offsets = [0, 64], sizes = [8, 64], strides = [1, 1]} : vector<8x192xf32> to vector<8x64xf32>
    %712 = vector.extract_strided_slice %707 {offsets = [0, 128], sizes = [8, 64], strides = [1, 1]} : vector<8x192xf32> to vector<8x64xf32>
    %713 = arith.mulf %711, %671 : vector<8x64xf32>
    %714 = arith.mulf %710, %709 : vector<8x64xf32>
    %715 = arith.addf %713, %714 : vector<8x64xf32>
    %716 = math.tanh %715 : vector<8x64xf32>
    %717 = arith.mulf %712, %716 : vector<8x64xf32>
    %c6_i32_144 = arith.constant 6 : i32
    %718 = arith.cmpi sge, %c15_i32, %c6_i32_144 : i32
    %719 = arith.extui %718 : i1 to i32
    %c0_i32_145 = arith.constant 0 : i32
    %720 = arith.cmpi ne, %719, %c0_i32_145 : i32
    scf.if %720 {
      %c6_i32_146 = arith.constant 6 : i32
      %721 = arith.subi %c15_i32, %c6_i32_146 : i32
      %c0_i32_147 = arith.constant 0 : i32
      %722 = arith.maxsi %721, %c0_i32_147 : i32
      %cst_148 = arith.constant dense<0.000000e+00> : vector<8x2xf32>
      %723 = tpu.matmul %717, %9, %cst_148 {dimension_numbers = #tpu.dot_dimension_numbers<[1], [0], [0], [1], [0, 0, 1, 1], [], []>} : vector<8x64xf32>, vector<64x2xf32>, vector<8x2xf32> -> vector<8x2xf32>
      %724 = arith.addf %723, %15 : vector<8x2xf32>
      %725 = arith.index_cast %722 : i32 to index
      %c0_149 = arith.constant 0 : index
      %c0_150 = arith.constant 0 : index
      %726 = vector.load %arg8[%725, %c0_149, %c0_150] : memref<10x8x2xf32, #tpu.memory_space<vmem>>, vector<1x8x2xf32>
      %727 = vector.shape_cast %726 : vector<1x8x2xf32> to vector<8x2xf32>
      %728 = vector.shape_cast %724 : vector<8x2xf32> to vector<1x8x2xf32>
      tpu.vector_store %arg8[%725, %c0_149, %c0_150], %728 {strides = array<i32>} : memref<10x8x2xf32, #tpu.memory_space<vmem>>, vector<1x8x2xf32>,
    } else {
    }
    %c16_i32 = arith.constant 16 : i32
    return
  }
}

</mosaic_0001>

<bundles_post_ra>
// kernel: tpu_custom_call.1
= control target key start
LH: loop header
LB: loop body
LE: loop exit
PB: predicated region body
PF: predicated region fallthrough
CT: control target
= control target key end

     0   :  { %13 = vsyncpa [#allocation4], 0  ;;  %s5605_s27 = smov [#allocation3]   ;;  %s7995_s0 = inlined_call_operand.vmem [shape: f32[128,2], index: 0, kind: input, shape index: {}]   ;;  %s7996_s1 = inlined_call_operand.vmem [shape: f32[2,256], index: 1, kind: input, shape index: {}]   ;;  %s7997_s2 = inlined_call_operand.vmem [shape: f32[1,256], index: 2, kind: input, shape index: {}]   ;;  %s7998_s3 = inlined_call_operand.vmem [shape: f32[64,256], index: 3, kind: input, shape index: {}]   ;;  %s7999_s4 = inlined_call_operand.hbm [shape: f32[128,256], index: 4, kind: input, shape index: {}]   ;;  %s8000_s5 = inlined_call_operand.vmem [shape: f32[1,256], index: 5, kind: input, shape index: {}]   ;;  %s8001_s6 = inlined_call_operand.vmem [shape: f32[64,2], index: 6, kind: input, shape index: {}]   ;;  %s8002_s7 = inlined_call_operand.vmem [shape: f32[1,2], index: 7, kind: input, shape index: {}]   ;;  %s8003_s8 = inlined_call_operand.vmem [shape: f32[10,8,2], index: 8, kind: output, shape index: {}]  }
   0x1   :  { %s27_s28 = sshll.u32 %s5605_s27, 4  ;;  %s28_s28 = int_to_ptr.vmem [resolvable:$true] %s27_s28 }
   0x2   :  { %s5591_s29 = scalar_lea.vmem %s28_s28, 4096  ;;  %p5596_p1 = scmp.lt.s32.totalorder %s28_s28, %s28_s28 }
   0x3   :  { %p5592_p0 = scmp.ne.s32.totalorder %s28_s28, %s5591_s29  ;;  %p5597_p2 = scmp.lt.s32.totalorder %s5591_s29, %s5591_s29 }
   0x5   :  { %p5598_p3 = por %p5597_p2, %p5596_p1 }
   0x7   :  { %p5599_p4 = pnand %p5598_p3, %p5592_p0 }
   0x9   :  { %5602 = shalt.err (!%p5599_p4)
}
   0xa   :  { %s5606_s30 = smov 256   ;;  %s5607_s9 = smov 16  }
   0xb   :  { %33 = dma.hbm_to_vmem [thread:$0]  %s7999_s4, 4096, %s28_s28, [#allocation4], %s5606_s30, %s5606_s30, %s5607_s9  }
   0xc   :  { %5603 = dma.done.wait [#allocation4], 4096  }
   0xd   :  { %5604 = vsyncadd [#allocation4], 4294963200  ;;  %v8004_v0 = vmov 0.0   ;;  %v5664_v1 = vld [vmem:[%s7998_s3 + $0x78] sm:$0xff]  ;;  %v5669_v2 = vld [vmem:[%s7998_s3 + $0x70] sm:$0xff]  ;;  %vm130_vm0 = vcmask 1041408   ;;  %v62_v20 = vlaneseq }
   0xe   :  { %199 = vmatprep.mubr.f32.mxu0 %v8004_v0  ;;  %476 = vmatprep.mubr.f32.mxu1 %v8004_v0  ;;  %8103 = vst [vmem:[#allocation6_spill] sm:$0xff] %v5664_v1  ;;  %v5674_v3 = vld [vmem:[%s7998_s3 + $0x68] sm:$0xff]  ;;  %v5680_v4 = vld [vmem:[%s7998_s3 + $0x60] sm:$0xff]  ;;  %v5686_v5 = vld [vmem:[%s7998_s3 + $0x58] sm:$0xff]  ;;  %vm81_vm1 = vcmask 15360   ;;  %vm408_vm2 = vcmask 523264  }
   0xf   :  { %428 = vmatprep.subr.mxu1 %v5664_v1  ;;  %v5692_v6 = vld [vmem:[%s7998_s3 + $0x50] sm:$0xff]  ;;  %v4632_v7 = vld.sshfl [vmem:[%s7996_s1] sm:$0x33 pattern:$0x76325410]  ;;  %v5701_v8 = vld [vmem:[%s7998_s3 + $0x48] sm:$0xff] }
  0x10   :  { %429 = vmatpush1.msra.mxu1 %v5669_v2  ;;  %v80_v9 = vcombine.high %v4632_v7, %v4632_v7  ;;  %v5707_v10 = vld [vmem:[%s7998_s3 + $0x40] sm:$0xff]  ;;  %v5716_v12 = vld [vmem:[%s7998_s3 + $0x38] sm:$0xff]  ;;  %v5722_v13 = vld [vmem:[%s7998_s3 + $0x30] sm:$0xff]  ;;  %v5767_v21 = vshrl.u32 %v62_v20, 7  ;;  %vm5610_vm3 = vmmov 0  }
  0x11   :  { %430 = vmatprep.subr.mxu1 %v5674_v3  ;;  %v43_v11 = vld [vmem:[%s7995_s0] sm:$0xff]  ;;  %v5728_v14 = vld [vmem:[%s7998_s3 + $0x28] sm:$0xff]  ;;  %v5742_v16 = vld [vmem:[%s7998_s3 + $0x18] sm:$0xff] }
  0x12   :  { %431 = vmatpush1.msra.mxu1 %v5680_v4  ;;  %4633 = vmatprep.subr.msk.mxu0 %vm130_vm0, %v80_v9  ;;  %v5735_v15 = vld [vmem:[%s7998_s3 + $0x20] sm:$0xff]  ;;  %v5748_v17 = vld [vmem:[%s7998_s3 + $0x10] sm:$0xff]  ;;  %v5754_v18 = vld [vmem:[%s7998_s3 + $0x8] sm:$0xff]  ;;  %v8006_v22 = vsub.s32 0, %v5767_v21  ;;  %v68_v25 = vsub.s32 1, %v5767_v21 }
  0x13   :  { %432 = vmatprep.subr.mxu1 %v5686_v5  ;;  %4634 = vmatpush1.msk.msra.mxu0 %vm130_vm0, %v4632_v7  ;;  %v5760_v19 = vld [vmem:[%s7998_s3] sm:$0xff]  ;;  %v5792_v42 = vld [vmem:[#allocation3 + $0xf8] sm:$0xff]  ;;  %v5794_v43 = vld [vmem:[#allocation3 + $0xf0] sm:$0xff] }
  0x14   :  { %433 = vmatpush1.msra.mxu1 %v5692_v6  ;;  %4635 = vmatmul.mubr.msk.f32.vlgmr.msra.gmra.mxu0 %vm81_vm1, %v43_v11  ;;  %v60_v23 = vld [vmem:[%s7997_s2] sm:$0x3]  ;;  %s5609_s2 = smov 64   ;;  %v5796_v44 = vld [vmem:[#allocation3 + $0xe8] sm:$0xff]  ;;  %v5803_v46 = vld [vmem:[#allocation3 + $0xd8] sm:$0xff] }
  0x15   :  { %434 = vmatprep.subr.mxu1 %v5701_v8  ;;  %205 = vmatprep.mubr.f32.mxu0 %v8004_v0  ;;  %v5775_v24 = vrot.slane %v60_v23, %v8006_v22  ;;  %v5781_v28 = vrot.slane %v60_v23, %v68_v25  ;;  %v5799_v45 = vld [vmem:[#allocation3 + $0xe0] sm:$0xff]  ;;  %v5807_v47 = vld [vmem:[#allocation3 + $0xd0] sm:$0xff]  ;;  %v5811_v48 = vld [vmem:[#allocation3 + $0xc8] sm:$0xff] }
  0x16   :  { %435 = vmatpush1.msra.mxu1 %v5707_v10  ;;  %733 = vmatprep.subr.mxu0 %v5792_v42  ;;  %v5815_v49 = vld [vmem:[#allocation3 + $0xc0] sm:$0xff]  ;;  %v5819_v50 = vld [vmem:[#allocation3 + $0xb8] sm:$0xff]  ;;  %v5823_v51 = vld [vmem:[#allocation3 + $0xb0] sm:$0xff] }
  0x17   :  { %436 = vmatprep.subr.mxu1 %v5716_v12  ;;  %8104 = vst [vmem:[#allocation7_spill] sm:$0xff] %v5775_v24  ;;  %8105 = vst [vmem:[#allocation8_spill] sm:$0xff] %v5781_v28  ;;  %734 = vmatpush1.msra.mxu0 %v5794_v43  ;;  %v5827_v52 = vld [vmem:[#allocation3 + $0xa8] sm:$0xff]  ;;  %v5831_v53 = vld [vmem:[#allocation3 + $0xa0] sm:$0xff] }
  0x18   :  { %437 = vmatpush1.msra.mxu1 %v5722_v13  ;;  %735 = vmatprep.subr.mxu0 %v5796_v44  ;;  %v5835_v54 = vld [vmem:[#allocation3 + $0x98] sm:$0xff]  ;;  %v5839_v55 = vld [vmem:[#allocation3 + $0x90] sm:$0xff]  ;;  %v5843_v56 = vld [vmem:[#allocation3 + $0x88] sm:$0xff] }
  0x19   :  { %438 = vmatprep.subr.mxu1 %v5728_v14  ;;  %736 = vmatpush1.msra.mxu0 %v5799_v45  ;;  %v5847_v57 = vld [vmem:[#allocation3 + $0x80] sm:$0xff]  ;;  %v5851_v58 = vld [vmem:[#allocation3 + $0x78] sm:$0xff]  ;;  %v5855_v59 = vld [vmem:[#allocation3 + $0x70] sm:$0xff] }
  0x1a   :  { %439 = vmatpush1.msra.mxu1 %v5735_v15  ;;  %737 = vmatprep.subr.mxu0 %v5803_v46  ;;  %v5859_v60 = vld [vmem:[#allocation3 + $0x68] sm:$0xff]  ;;  %v5863_v61 = vld [vmem:[#allocation3 + $0x60] sm:$0xff]  ;;  %v5867_v62 = vld [vmem:[#allocation3 + $0x58] sm:$0xff] }
  0x1b   :  { %440 = vmatprep.subr.mxu1 %v5742_v16  ;;  %738 = vmatpush1.msra.mxu0 %v5807_v47  ;;  %v5871_v63 = vld [vmem:[#allocation3 + $0x50] sm:$0xff]  ;;  %v5875_v7 = vld [vmem:[#allocation3 + $0x48] sm:$0xff]  ;;  %v5879_v9 = vld [vmem:[#allocation3 + $0x40] sm:$0xff] }
  0x1c   :  { %441 = vmatpush1.msra.mxu1 %v5748_v17  ;;  %739 = vmatprep.subr.mxu0 %v5811_v48  ;;  %v5883_v11 = vld [vmem:[#allocation3 + $0x38] sm:$0xff]  ;;  %v5887_v20 = vld [vmem:[#allocation3 + $0x30] sm:$0xff]  ;;  %v5891_v23 = vld [vmem:[#allocation3 + $0x28] sm:$0xff] }
  0x1d   :  { %442 = vmatprep.subr.mxu1 %v5754_v18  ;;  %740 = vmatpush1.msra.mxu0 %v5815_v49 }
  0x1e   :  { %443 = vmatpush1.msra.mxu1 %v5760_v19  ;;  %741 = vmatprep.subr.mxu0 %v5819_v50 }
  0x1f   :  { %477 = vmatmul.mubr.f32.vlgmr.msra.gmra.mxu1 %v8004_v0  ;;  %516 = vmatprep.subr.mxu1 %v5792_v42 }
  0x20   :  { %580 = vmatprep.mubr.f32.mxu1 %v8004_v0  ;;  %517 = vmatpush1.msra.mxu1 %v5794_v43 }
  0x21   :  { %518 = vmatprep.subr.mxu1 %v5796_v44  ;;  %742 = vmatpush1.msra.mxu0 %v5823_v51 }
  0x22   :  { %519 = vmatpush1.msra.mxu1 %v5799_v45  ;;  %743 = vmatprep.subr.mxu0 %v5827_v52 }
  0x23   :  { %520 = vmatprep.subr.mxu1 %v5803_v46  ;;  %744 = vmatpush1.msra.mxu0 %v5831_v53 }
  0x24   :  { %521 = vmatpush1.msra.mxu1 %v5807_v47  ;;  %745 = vmatprep.subr.mxu0 %v5835_v54 }
  0x25   :  { %522 = vmatprep.subr.mxu1 %v5811_v48  ;;  %746 = vmatpush1.msra.mxu0 %v5839_v55 }
  0x26   :  { %523 = vmatpush1.msra.mxu1 %v5815_v49  ;;  %747 = vmatprep.subr.mxu0 %v5843_v56 }
  0x27   :  { %524 = vmatprep.subr.mxu1 %v5819_v50  ;;  %748 = vmatpush1.msra.mxu0 %v5847_v57 }
  0x28   :  { %525 = vmatpush1.msra.mxu1 %v5823_v51  ;;  %749 = vmatprep.subr.mxu0 %v5851_v58 }
  0x29   :  { %526 = vmatprep.subr.mxu1 %v5827_v52  ;;  %750 = vmatpush1.msra.mxu0 %v5855_v59 }
  0x2a   :  { %527 = vmatpush1.msra.mxu1 %v5831_v53  ;;  %751 = vmatprep.subr.mxu0 %v5859_v60 }
  0x2b   :  { %528 = vmatprep.subr.mxu1 %v5835_v54  ;;  %752 = vmatpush1.msra.mxu0 %v5863_v61 }
  0x2c   :  { %529 = vmatpush1.msra.mxu1 %v5839_v55  ;;  %753 = vmatprep.subr.mxu0 %v5867_v62 }
  0x2d   :  { %530 = vmatprep.subr.mxu1 %v5843_v56  ;;  %754 = vmatpush1.msra.mxu0 %v5871_v63 }
  0x2e   :  { %531 = vmatpush1.msra.mxu1 %v5847_v57  ;;  %755 = vmatprep.subr.mxu0 %v5875_v7 }
  0x2f   :  { %532 = vmatprep.subr.mxu1 %v5851_v58  ;;  %756 = vmatpush1.msra.mxu0 %v5879_v9 }
  0x30   :  { %533 = vmatpush1.msra.mxu1 %v5855_v59  ;;  %757 = vmatprep.subr.mxu0 %v5883_v11 }
  0x31   :  { %534 = vmatprep.subr.mxu1 %v5859_v60  ;;  %758 = vmatpush1.msra.mxu0 %v5887_v20 }
  0x32   :  { %535 = vmatpush1.msra.mxu1 %v5863_v61  ;;  %759 = vmatprep.subr.mxu0 %v5891_v23 }
  0x33   :  { %536 = vmatprep.subr.mxu1 %v5867_v62 }
  0x34   :  { %537 = vmatpush1.msra.mxu1 %v5871_v63 }
  0x35   :  { %538 = vmatprep.subr.mxu1 %v5875_v7 }
  0x36   :  { %539 = vmatpush1.msra.mxu1 %v5879_v9 }
  0x37   :  { %540 = vmatprep.subr.mxu1 %v5883_v11 }
  0x38   :  { %541 = vmatpush1.msra.mxu1 %v5887_v20 }
  0x39   :  { %542 = vmatprep.subr.mxu1 %v5891_v23 }
  0xd4   :  { %v201_v26 = vpop.f32.mrf.mxu0 }
  0xd5   :  { %v202_v27 = vadd.f32 %v201_v26, %v5775_v24  ;;  %v5895_v26 = vld [vmem:[#allocation3 + $0x20] sm:$0xff] }
  0xd6   :  { %v203_v29 = vpop.f32.mrf.mxu0  ;;  %543 = vmatpush1.msra.mxu1 %v5895_v26  ;;  %760 = vmatpush1.msra.mxu0 %v5895_v26 }
  0xd7   :  { %v204_v31 = vadd.f32 %v203_v29, %v5781_v28  ;;  %v5903_v29 = vld [vmem:[#allocation3 + $0x10] sm:$0xff] }
  0xd8   :  { %8106 = vst [vmem:[#allocation9_spill] sm:$0xff] %v5903_v29 }
  0xdf   :  { %v478_v30 = vpop.f32.mrf.mxu1 }
  0xe0   :  { %v483_v32 = vadd.f32 %v478_v30, %v202_v27  ;;  %v5899_v27 = vld [vmem:[#allocation3 + $0x18] sm:$0xff]  ;;  %v5907_v30 = vld [vmem:[#allocation3 + $0x8] sm:$0xff] }
  0xe1   :  { %v480_v33 = vpop.f32.mrf.mxu1  ;;  %8107 = vst [vmem:[#allocation10_spill] sm:$0xff] %v5907_v30  ;;  %544 = vmatprep.subr.mxu1 %v5899_v27  ;;  %761 = vmatprep.subr.mxu0 %v5899_v27 }
  0xe2   :  { %v5784_v34 = vadd.f32 %v480_v33, %v204_v31  ;;  %v4652_v36 = vmul.f32 -1.442695, %v483_v32  ;;  %545 = vmatpush1.msra.mxu1 %v5903_v29  ;;  %762 = vmatpush1.msra.mxu0 %v5903_v29 }
  0xe3   :  { %546 = vmatprep.subr.mxu1 %v5907_v30  ;;  %763 = vmatprep.subr.mxu0 %v5907_v30 }
  0xe4   :  { %5037 = vtanh.f32 %v5784_v34 }
  0xe5   :  { %5039 = vpow2.f32 %v4652_v36 }
  0xf1   :  { %v5038_v35 = vpop.eup %5037 }
  0xf2   :  { %500 = vrot.lane.b32.xlu0 %v5038_v35, %s5609_s2  ;;  %v5040_v37 = vpop.eup %5039  ;;  %v5920_v35 = vld [vmem:[#allocation3] sm:$0xff] }
  0xf3   :  { %v491_v38 = vadd.f32 1.0, %v5040_v37  ;;  %8108 = vst [vmem:[#allocation11_spill] sm:$0xff] %v5920_v35  ;;  %547 = vmatpush1.msra.mxu1 %v5920_v35  ;;  %764 = vmatpush1.msra.mxu0 %v5920_v35  ;;  %v44_v37 = vld [vmem:[%s7995_s0 + $0x8] sm:$0xff] }
  0xf4   :  { %641 = vmatprep.subr.mxu1 %v5664_v1  ;;  %950 = vmatprep.subr.mxu0 %v5792_v42 }
  0xf5   :  { %5041 = vrcp.f32 %v491_v38  ;;  %4636 = vmatmul.mubr.msk.f32.gmra.mxu0 %vm81_vm1, %v44_v37  ;;  %v4653_v38 = vmul.f32 -1.442695, %v5784_v34  ;;  %v384_v34 = vld [vmem:[%s8000_s5] sm:$0x3] }
  0xf6   :  { %211 = vmatprep.mubr.f32.mxu0 %v8004_v0 }
 0x102   :  { %v5788_v39 = vpop.eup %5041 }
 0x103   :  { %v498_v31 = vmul.f32 0.0, %v5788_v39 }
 0x164   :  { %v501_v40 = vpop.permute.xlu0 %500 }
 0x165   :  { %v503_v41 = vmul.f32 %v5788_v39, %v501_v40 }
 0x167   :  { %505 = vrot.lane.b32.xlu0 %v503_v41, %s5609_s2 }
 0x1d9   :  { %v506_v32 = vpop.permute.xlu0 %505 }
 0x1da   :  { %v5917_v33 = vadd.f32 %v506_v32, %v498_v31 }
 0x1dc   :  { %5043 = vtanh.f32 %v5917_v33 }
 0x1dd   :  { %5045 = vpow2.f32 %v4653_v38 }
 0x1e9   :  { %v5044_v36 = vpop.eup %5043 }
 0x1ea   :  { %511 = vrot.lane.b32.xlu1 %v5044_v36, %s5609_s2  ;;  %v5046_v39 = vpop.eup %5045  ;;  %v5974_v36 = vrot.slane %v384_v34, %v68_v25 }
 0x1eb   :  { %v492_v40 = vadd.f32 1.0, %v5046_v39 }
 0x1ec   :  { %8109 = vst [vmem:[#allocation12_spill] sm:$0xff] %v5974_v36 }
 0x1ed   :  { %5047 = vrcp.f32 %v492_v40  ;;  %v207_v40 = vpop.f32.mrf.mxu0 }
 0x1fa   :  { %v5048_v41 = vpop.eup %5047 }
 0x25c   :  { %v512_v31 = vpop.permute.xlu1 %511 }
 0x25d   :  { %v514_v32 = vmul.f32 %v5048_v41, %v512_v31  ;;  %v208_v41 = vadd.f32 %v207_v40, %v5775_v24  ;;  %v209_v31 = vpop.f32.mrf.mxu0 }
 0x25f   :  { %4654 = vmatmul.mubr.msk.f32.vlgmr.msra.gmra.mxu1 %vm408_vm2, %v514_v32 }
 0x260   :  { %642 = vmatpush1.msra.mxu1 %v5669_v2  ;;  %689 = vmatprep.mubr.f32.mxu1 %v8004_v0 }
 0x261   :  { %643 = vmatprep.subr.mxu1 %v5674_v3 }
 0x262   :  { %644 = vmatpush1.msra.mxu1 %v5680_v4 }
 0x263   :  { %645 = vmatprep.subr.mxu1 %v5686_v5 }
 0x264   :  { %646 = vmatpush1.msra.mxu1 %v5692_v6 }
 0x265   :  { %647 = vmatprep.subr.mxu1 %v5701_v8 }
 0x266   :  { %648 = vmatpush1.msra.mxu1 %v5707_v10 }
 0x267   :  { %649 = vmatprep.subr.mxu1 %v5716_v12 }
 0x268   :  { %650 = vmatpush1.msra.mxu1 %v5722_v13 }
 0x269   :  { %651 = vmatprep.subr.mxu1 %v5728_v14 }
 0x26a   :  { %652 = vmatpush1.msra.mxu1 %v5735_v15 }
 0x26b   :  { %653 = vmatprep.subr.mxu1 %v5742_v16 }
 0x26c   :  { %654 = vmatpush1.msra.mxu1 %v5748_v17 }
 0x26d   :  { %655 = vmatprep.subr.mxu1 %v5754_v18 }
 0x26e   :  { %656 = vmatpush1.msra.mxu1 %v5760_v19 }
 0x26f   :  { %4657 = vmatmul.mubr.msk.f32.vlgmr.msra.gmra.mxu1 %vm408_vm2, %v514_v32  ;;  %858 = vmatprep.subr.mxu1 %v5664_v1 }
 0x270   :  { %859 = vmatpush1.msra.mxu1 %v5669_v2  ;;  %906 = vmatprep.mubr.f32.mxu1 %v8004_v0  ;;  %v210_v0 = vadd.f32 %v209_v31, %v5781_v28 }
 0x271   :  { %860 = vmatprep.subr.mxu1 %v5674_v3 }
 0x272   :  { %861 = vmatpush1.msra.mxu1 %v5680_v4 }
 0x273   :  { %862 = vmatprep.subr.mxu1 %v5686_v5 }
 0x274   :  { %863 = vmatpush1.msra.mxu1 %v5692_v6 }
 0x275   :  { %864 = vmatprep.subr.mxu1 %v5701_v8 }
 0x276   :  { %865 = vmatpush1.msra.mxu1 %v5707_v10 }
 0x277   :  { %866 = vmatprep.subr.mxu1 %v5716_v12 }
 0x278   :  { %867 = vmatpush1.msra.mxu1 %v5722_v13 }
 0x279   :  { %868 = vmatprep.subr.mxu1 %v5728_v14 }
 0x27a   :  { %869 = vmatpush1.msra.mxu1 %v5735_v15 }
 0x27b   :  { %870 = vmatprep.subr.mxu1 %v5742_v16 }
 0x27c   :  { %871 = vmatpush1.msra.mxu1 %v5748_v17 }
 0x27d   :  { %872 = vmatprep.subr.mxu1 %v5754_v18 }
 0x27e   :  { %873 = vmatpush1.msra.mxu1 %v5760_v19 }
 0x27f   :  { %1075 = vmatprep.subr.mxu1 %v5664_v1 }
 0x31f   :  { %v582_v37 = vpop.f32.mrf.mxu1 }
 0x321   :  { %v584_v38 = vpop.f32.mrf.mxu1 }
 0x322   :  { %v5977_v39 = vadd.f32 %v584_v38, %v5974_v36  ;;  %v8110_v36 = vsub.s32 0, %v5767_v21 }
 0x324   :  { %5049 = vtanh.f32 %v5977_v39  ;;  %v5989_v30 = vrot.slane %v384_v34, %v8110_v36 }
 0x326   :  { %8111 = vst [vmem:[#allocation13_spill] sm:$0xff] %v5989_v30  ;;  %v583_v40 = vadd.f32 %v582_v37, %v5989_v30 }
 0x328   :  { %v4655_v24 = vmul.f32 -1.442695, %v583_v40 }
 0x32f   :  { %v691_v32 = vpop.f32.mrf.mxu1 }
 0x330   :  { %v696_v22 = vadd.f32 %v691_v32, %v208_v41 }
 0x331   :  { %v693_v1 = vpop.f32.mrf.mxu1  ;;  %v5050_v35 = vpop.eup %5049 }
 0x332   :  { %602 = vrot.lane.b32.xlu1 %v5050_v35, %s5609_s2  ;;  %v5983_v25 = vadd.f32 %v693_v1, %v210_v0  ;;  %v4658_v31 = vmul.f32 -1.442695, %v696_v22 }
 0x334   :  { %5051 = vtanh.f32 %v5983_v25 }
 0x335   :  { %5053 = vpow2.f32 %v4655_v24 }
 0x336   :  { %5055 = vpow2.f32 %v4658_v31 }
 0x341   :  { %v5052_v38 = vpop.eup %5051 }
 0x342   :  { %713 = vrot.lane.b32.xlu0 %v5052_v38, %s5609_s2  ;;  %v5054_v41 = vpop.eup %5053 }
 0x343   :  { %v593_v32 = vadd.f32 1.0, %v5054_v41  ;;  %v5056_v0 = vpop.eup %5055 }
 0x344   :  { %v704_v29 = vadd.f32 1.0, %v5056_v0  ;;  %v48_v0 = vld [vmem:[%s7995_s0 + $0x28] sm:$0xff] }
 0x345   :  { %5057 = vrcp.f32 %v593_v32  ;;  %v46_v32 = vld [vmem:[%s7995_s0 + $0x18] sm:$0xff] }
 0x346   :  { %5059 = vrcp.f32 %v704_v29  ;;  %v8112_v29 = vmov 0.0  }
 0x352   :  { %v5058_v1 = vpop.eup %5057 }
 0x353   :  { %v5060_v21 = vpop.eup %5059  ;;  %v600_v37 = vmul.f32 0.0, %v5058_v1 }
 0x354   :  { %v711_v40 = vmul.f32 %v5060_v21, %v5917_v33  ;;  %v47_v33 = vld [vmem:[%s7995_s0 + $0x20] sm:$0xff] }
 0x3a4   :  { %v603_v35 = vpop.permute.xlu1 %602 }
 0x3a5   :  { %v605_v28 = vmul.f32 %v5058_v1, %v603_v35  ;;  %v49_v35 = vld [vmem:[%s7995_s0 + $0x30] sm:$0xff] }
 0x3a7   :  { %607 = vrot.lane.b32.xlu1 %v605_v28, %s5609_s2  ;;  %v45_v28 = vld [vmem:[%s7995_s0 + $0x10] sm:$0xff] }
 0x3a8   :  { %4637 = vmatmul.mubr.msk.f32.gmra.mxu0 %vm81_vm1, %v45_v28  ;;  %v58_v28 = vld [vmem:[%s7995_s0 + $0x78] sm:$0xff] }
 0x3a9   :  { %217 = vmatprep.mubr.f32.mxu0 %v8112_v29 }
 0x3ac   :  { %4638 = vmatmul.mubr.msk.f32.gmra.mxu0 %vm81_vm1, %v46_v32  ;;  %v4656_v32 = vmul.f32 -1.442695, %v5977_v39 }
 0x3ad   :  { %223 = vmatprep.mubr.f32.mxu0 %v8112_v29 }
 0x3b0   :  { %4639 = vmatmul.mubr.msk.f32.gmra.mxu0 %vm81_vm1, %v47_v33 }
 0x3b1   :  { %229 = vmatprep.mubr.f32.mxu0 %v8112_v29 }
 0x3b4   :  { %v714_v34 = vpop.permute.xlu0 %713  ;;  %4640 = vmatmul.mubr.msk.f32.gmra.mxu0 %vm81_vm1, %v48_v0  ;;  %v4659_v0 = vmul.f32 -1.442695, %v5983_v25  ;;  %v8117_v25 = vld [vmem:[#allocation7_spill] sm:$0xff] }
 0x3b5   :  { %v716_v36 = vmul.f32 %v5060_v21, %v714_v34  ;;  %235 = vmatprep.mubr.f32.mxu0 %v8112_v29  ;;  %v50_v21 = vld [vmem:[%s7995_s0 + $0x38] sm:$0xff]  ;;  %v51_v34 = vld [vmem:[%s7995_s0 + $0x40] sm:$0xff] }
 0x3b7   :  { %718 = vrot.lane.b32.xlu0 %v716_v36, %s5609_s2  ;;  %v52_v36 = vld [vmem:[%s7995_s0 + $0x48] sm:$0xff] }
 0x3b8   :  { %4641 = vmatmul.mubr.msk.f32.gmra.mxu0 %vm81_vm1, %v49_v35 }
 0x3b9   :  { %241 = vmatprep.mubr.f32.mxu0 %v8112_v29 }
 0x3bc   :  { %4642 = vmatmul.mubr.msk.f32.gmra.mxu0 %vm81_vm1, %v50_v21 }
 0x3bd   :  { %247 = vmatprep.mubr.f32.mxu0 %v8112_v29 }
 0x3c0   :  { %4643 = vmatmul.mubr.msk.f32.gmra.mxu0 %vm81_vm1, %v51_v34 }
 0x3c1   :  { %253 = vmatprep.mubr.f32.mxu0 %v8112_v29 }
 0x3c4   :  { %4644 = vmatmul.mubr.msk.f32.gmra.mxu0 %vm81_vm1, %v52_v36 }
 0x3c5   :  { %259 = vmatprep.mubr.f32.mxu0 %v8112_v29 }
 0x419   :  { %v608_v24 = vpop.permute.xlu1 %607 }
 0x41a   :  { %v5994_v38 = vadd.f32 %v608_v24, %v600_v37  ;;  %v53_v37 = vld [vmem:[%s7995_s0 + $0x50] sm:$0xff]  ;;  %v54_v24 = vld [vmem:[%s7995_s0 + $0x58] sm:$0xff] }
 0x41b   :  { %4645 = vmatmul.mubr.msk.f32.gmra.mxu0 %vm81_vm1, %v53_v37 }
 0x41c   :  { %5061 = vtanh.f32 %v5994_v38  ;;  %265 = vmatprep.mubr.f32.mxu0 %v8112_v29 }
 0x41f   :  { %4646 = vmatmul.mubr.msk.f32.gmra.mxu0 %vm81_vm1, %v54_v24 }
 0x420   :  { %271 = vmatprep.mubr.f32.mxu0 %v8112_v29 }
 0x429   :  { %v5062_v22 = vpop.eup %5061  ;;  %v719_v41 = vpop.permute.xlu0 %718 }
 0x42a   :  { %613 = vrot.lane.b32.xlu1 %v5062_v22, %s5609_s2  ;;  %v5999_v31 = vadd.f32 %v719_v41, %v711_v40  ;;  %v55_v22 = vld [vmem:[%s7995_s0 + $0x60] sm:$0xff]  ;;  %v56_v40 = vld [vmem:[%s7995_s0 + $0x68] sm:$0xff]  ;;  %v57_v41 = vld [vmem:[%s7995_s0 + $0x70] sm:$0xff] }
 0x42b   :  { %4647 = vmatmul.mubr.msk.f32.gmra.mxu0 %vm81_vm1, %v55_v22 }
 0x42c   :  { %5063 = vtanh.f32 %v5999_v31  ;;  %277 = vmatprep.mubr.f32.mxu0 %v8112_v29 }
 0x42d   :  { %5065 = vpow2.f32 %v4656_v32 }
 0x42e   :  { %5067 = vpow2.f32 %v4659_v0 }
 0x42f   :  { %4648 = vmatmul.mubr.msk.f32.gmra.mxu0 %vm81_vm1, %v56_v40 }
 0x430   :  { %283 = vmatprep.mubr.f32.mxu0 %v8112_v29 }
 0x433   :  { %4649 = vmatmul.mubr.msk.f32.gmra.mxu0 %vm81_vm1, %v57_v41 }
 0x434   :  { %289 = vmatprep.mubr.f32.mxu0 %v8112_v29 }
 0x437   :  { %4650 = vmatmul.mubr.msk.f32.gmra.mxu0 %vm81_vm1, %v58_v28  ;;  %v8118_v28 = vld [vmem:[#allocation8_spill] sm:$0xff] }
 0x438   :  { %797 = vmatprep.mubr.f32.mxu0 %v8112_v29 }
 0x439   :  { %v5064_v1 = vpop.eup %5063 }
 0x43a   :  { %724 = vrot.lane.b32.xlu0 %v5064_v1, %s5609_s2  ;;  %v5066_v33 = vpop.eup %5065 }
 0x43b   :  { %v594_v1 = vadd.f32 1.0, %v5066_v33  ;;  %v5068_v35 = vpop.eup %5067 }
 0x43c   :  { %v705_v37 = vadd.f32 1.0, %v5068_v35 }
 0x43d   :  { %5069 = vrcp.f32 %v594_v1 }
 0x43e   :  { %5071 = vrcp.f32 %v705_v37 }
 0x44a   :  { %v5070_v21 = vpop.eup %5069 }
 0x44b   :  { %v5072_v24 = vpop.eup %5071 }
 0x49c   :  { %v614_v34 = vpop.permute.xlu1 %613 }
 0x49d   :  { %v616_v36 = vmul.f32 %v5070_v21, %v614_v34 }
 0x49f   :  { %729 = vrot.lane.b32.xlu1 %v616_v36, %s5609_s2 }
 0x4ac   :  { %v725_v22 = vpop.permute.xlu0 %724 }
 0x4ad   :  { %v727_v40 = vmul.f32 %v5072_v24, %v725_v22 }
 0x4af   :  { %4662 = vmatmul.mubr.msk.f32.vlgmr.msra.gmra.mxu1 %vm408_vm2, %v727_v40 }
 0x4b0   :  { %1076 = vmatpush1.msra.mxu1 %v5669_v2  ;;  %1123 = vmatprep.mubr.f32.mxu1 %v8112_v29 }
 0x4b1   :  { %1077 = vmatprep.subr.mxu1 %v5674_v3 }
 0x4b2   :  { %1078 = vmatpush1.msra.mxu1 %v5680_v4  ;;  %v8113_v4 = vld [vmem:[#allocation9_spill] sm:$0xff] }
 0x4b3   :  { %1079 = vmatprep.subr.mxu1 %v5686_v5  ;;  %v8114_v5 = vld [vmem:[#allocation10_spill] sm:$0xff] }
 0x4b4   :  { %1080 = vmatpush1.msra.mxu1 %v5692_v6  ;;  %v8115_v6 = vld [vmem:[#allocation11_spill] sm:$0xff] }
 0x4b5   :  { %1081 = vmatprep.subr.mxu1 %v5701_v8  ;;  %v8116_v8 = vld [vmem:[#allocation6_spill] sm:$0xff] }
 0x4b6   :  { %1082 = vmatpush1.msra.mxu1 %v5707_v10  ;;  %v213_v10 = vpop.f32.mrf.mxu0 }
 0x4b7   :  { %1083 = vmatprep.subr.mxu1 %v5716_v12  ;;  %v214_v41 = vadd.f32 %v213_v10, %v8117_v25 }
 0x4b8   :  { %1084 = vmatpush1.msra.mxu1 %v5722_v13  ;;  %v215_v12 = vpop.f32.mrf.mxu0 }
 0x4b9   :  { %1085 = vmatprep.subr.mxu1 %v5728_v14  ;;  %v216_v32 = vadd.f32 %v215_v12, %v8118_v28 }
 0x4ba   :  { %1086 = vmatpush1.msra.mxu1 %v5735_v15  ;;  %v6128_v39 = vpop.f32.mrf.mxu0 }
 0x4bb   :  { %1087 = vmatprep.subr.mxu1 %v5742_v16 }
 0x4bc   :  { %1088 = vmatpush1.msra.mxu1 %v5748_v17  ;;  %v6132_v33 = vpop.f32.mrf.mxu0 }
 0x4bd   :  { %1089 = vmatprep.subr.mxu1 %v5754_v18 }
 0x4be   :  { %1090 = vmatpush1.msra.mxu1 %v5760_v19  ;;  %v6134_v34 = vpop.f32.mrf.mxu0 }
 0x4bf   :  { %1167 = vmatprep.subr.mxu1 %v5792_v42  ;;  %8119 = vst [vmem:[#allocation9_spill] sm:$0xff] %v6134_v34 }
 0x4c0   :  { %v6136_v36 = vpop.f32.mrf.mxu0 }
 0x4c1   :  { %8120 = vst [vmem:[#allocation10_spill] sm:$0xff] %v6136_v36 }
 0x4c2   :  { %v6138_v37 = vpop.f32.mrf.mxu0 }
 0x4c3   :  { %8121 = vst [vmem:[#allocation11_spill] sm:$0xff] %v6138_v37 }
 0x4c4   :  { %v6140_v24 = vpop.f32.mrf.mxu0 }
 0x4c5   :  { %8122 = vst [vmem:[#allocation6_spill] sm:$0xff] %v6140_v24 }
 0x511   :  { %v730_v2 = vpop.permute.xlu1 %729 }
 0x512   :  { %v732_v3 = vsel %vm408_vm2, %v727_v40, %v730_v2  ;;  %v6142_v40 = vpop.f32.mrf.mxu0 }
 0x513   :  { %798 = vmatmul.mubr.f32.vlgmr.msra.gmra.mxu0 %v732_v3  ;;  %8123 = vst [vmem:[#allocation8_spill] sm:$0xff] %v6142_v40 }
 0x514   :  { %951 = vmatpush1.msra.mxu0 %v5794_v43  ;;  %1014 = vmatprep.mubr.f32.mxu0 %v8112_v29  ;;  %v6145_v2 = vpop.f32.mrf.mxu0 }
 0x515   :  { %952 = vmatprep.subr.mxu0 %v5796_v44  ;;  %8124 = vst [vmem:[#allocation14_spill] sm:$0xff] %v6145_v2 }
 0x516   :  { %953 = vmatpush1.msra.mxu0 %v5799_v45  ;;  %v6147_v3 = vpop.f32.mrf.mxu0 }
 0x517   :  { %954 = vmatprep.subr.mxu0 %v5803_v46  ;;  %8125 = vst [vmem:[#allocation15_spill] sm:$0xff] %v6147_v3 }
 0x518   :  { %955 = vmatpush1.msra.mxu0 %v5807_v47  ;;  %v6149_v10 = vpop.f32.mrf.mxu0 }
 0x519   :  { %956 = vmatprep.subr.mxu0 %v5811_v48  ;;  %8126 = vst [vmem:[#allocation16_spill] sm:$0xff] %v6149_v10 }
 0x51a   :  { %957 = vmatpush1.msra.mxu0 %v5815_v49  ;;  %v6151_v12 = vpop.f32.mrf.mxu0 }
 0x51b   :  { %958 = vmatprep.subr.mxu0 %v5819_v50  ;;  %8127 = vst [vmem:[#allocation17_spill] sm:$0xff] %v6151_v12 }
 0x51c   :  { %959 = vmatpush1.msra.mxu0 %v5823_v51 }
 0x51d   :  { %960 = vmatprep.subr.mxu0 %v5827_v52 }
 0x51e   :  { %961 = vmatpush1.msra.mxu0 %v5831_v53 }
 0x51f   :  { %962 = vmatprep.subr.mxu0 %v5835_v54 }
 0x520   :  { %963 = vmatpush1.msra.mxu0 %v5839_v55 }
 0x521   :  { %964 = vmatprep.subr.mxu0 %v5843_v56 }
 0x522   :  { %965 = vmatpush1.msra.mxu0 %v5847_v57 }
 0x523   :  { %966 = vmatprep.subr.mxu0 %v5851_v58 }
 0x524   :  { %967 = vmatpush1.msra.mxu0 %v5855_v59 }
 0x525   :  { %968 = vmatprep.subr.mxu0 %v5859_v60 }
 0x526   :  { %969 = vmatpush1.msra.mxu0 %v5863_v61 }
 0x527   :  { %970 = vmatprep.subr.mxu0 %v5867_v62 }
 0x528   :  { %971 = vmatpush1.msra.mxu0 %v5871_v63 }
 0x529   :  { %972 = vmatprep.subr.mxu0 %v5875_v7 }
 0x52a   :  { %973 = vmatpush1.msra.mxu0 %v5879_v9 }
 0x52b   :  { %974 = vmatprep.subr.mxu0 %v5883_v11 }
 0x52c   :  { %975 = vmatpush1.msra.mxu0 %v5887_v20 }
 0x52d   :  { %976 = vmatprep.subr.mxu0 %v5891_v23 }
 0x52e   :  { %977 = vmatpush1.msra.mxu0 %v5895_v26 }
 0x52f   :  { %978 = vmatprep.subr.mxu0 %v5899_v27 }
 0x530   :  { %979 = vmatpush1.msra.mxu0 %v8113_v4 }
 0x531   :  { %980 = vmatprep.subr.mxu0 %v8114_v5 }
 0x532   :  { %981 = vmatpush1.msra.mxu0 %v8115_v6 }
 0x533   :  { %1292 = vmatprep.subr.mxu0 %v8116_v8 }
 0x56f   :  { %v908_v0 = vpop.f32.mrf.mxu1 }
 0x570   :  { %v913_v1 = vadd.f32 %v908_v0, %v214_v41  ;;  %v6153_v41 = vpop.f32.mrf.mxu0 }
 0x571   :  { %v910_v35 = vpop.f32.mrf.mxu1  ;;  %8128 = vst [vmem:[#allocation18_spill] sm:$0xff] %v6153_v41 }
 0x572   :  { %v914_v21 = vadd.f32 %v910_v35, %v216_v32  ;;  %v6155_v32 = vpop.f32.mrf.mxu0 }
 0x573   :  { %8129 = vst [vmem:[#allocation19_spill] sm:$0xff] %v6155_v32 }
 0x574   :  { %5073 = vtanh.f32 %v914_v21  ;;  %v6157_v0 = vpop.f32.mrf.mxu0 }
 0x575   :  { %8130 = vst [vmem:[#allocation20_spill] sm:$0xff] %v6157_v0 }
 0x576   :  { %v6159_v35 = vpop.f32.mrf.mxu0 }
 0x577   :  { %8131 = vst [vmem:[#allocation21_spill] sm:$0xff] %v6159_v35 }
 0x578   :  { %v6161_v24 = vpop.f32.mrf.mxu0 }
 0x579   :  { %8132 = vst [vmem:[#allocation22_spill] sm:$0xff] %v6161_v24  ;;  %v4663_v24 = vmul.f32 -1.442695, %v913_v1 }
 0x57a   :  { %v6163_v40 = vpop.f32.mrf.mxu0 }
 0x57b   :  { %8133 = vst [vmem:[#allocation23_spill] sm:$0xff] %v6163_v40  ;;  %5075 = vpow2.f32 %v4663_v24 }
 0x581   :  { %v5074_v22 = vpop.eup %5073 }
 0x582   :  { %930 = vrot.lane.b32.xlu1 %v5074_v22, %s5609_s2  ;;  %v6165_v22 = vpop.f32.mrf.mxu0 }
 0x583   :  { %8134 = vst [vmem:[#allocation24_spill] sm:$0xff] %v6165_v22  ;;  %v8143_v22 = vld [vmem:[#allocation12_spill] sm:$0xff] }
 0x584   :  { %v6167_v2 = vpop.f32.mrf.mxu0 }
 0x585   :  { %8135 = vst [vmem:[#allocation25_spill] sm:$0xff] %v6167_v2 }
 0x586   :  { %v6169_v3 = vpop.f32.mrf.mxu0 }
 0x587   :  { %8136 = vst [vmem:[#allocation26_spill] sm:$0xff] %v6169_v3 }
 0x588   :  { %v6171_v10 = vpop.f32.mrf.mxu0 }
 0x589   :  { %8137 = vst [vmem:[#allocation27_spill] sm:$0xff] %v6171_v10  ;;  %v5076_v10 = vpop.eup %5075 }
 0x58a   :  { %v6173_v12 = vpop.f32.mrf.mxu0 }
 0x58b   :  { %8138 = vst [vmem:[#allocation28_spill] sm:$0xff] %v6173_v12  ;;  %v921_v12 = vadd.f32 1.0, %v5076_v10 }
 0x58c   :  { %v6175_v41 = vpop.f32.mrf.mxu0 }
 0x58d   :  { %8139 = vst [vmem:[#allocation29_spill] sm:$0xff] %v6175_v41 }
 0x58e   :  { %v6177_v32 = vpop.f32.mrf.mxu0 }
 0x58f   :  { %8140 = vst [vmem:[#allocation30_spill] sm:$0xff] %v6177_v32 }
 0x590   :  { %v6179_v0 = vpop.f32.mrf.mxu0 }
 0x591   :  { %8141 = vst [vmem:[#allocation31_spill] sm:$0xff] %v6179_v0 }
 0x592   :  { %v6181_v35 = vpop.f32.mrf.mxu0 }
 0x593   :  { %8142 = vst [vmem:[#allocation32_spill] sm:$0xff] %v6181_v35 }
 0x5d3   :  { %v799_v40 = vpop.f32.mrf.mxu0 }
 0x5d4   :  { %v800_v1 = vadd.f32 %v799_v40, %v5989_v30  ;;  %v4664_v40 = vmul.f32 -1.442695, %v914_v21 }
 0x5d5   :  { %v801_v37 = vpop.f32.mrf.mxu0 }
 0x5d6   :  { %v6184_v36 = vadd.f32 %v801_v37, %v8143_v22  ;;  %v4660_v35 = vmul.f32 -1.442695, %v800_v1 }
 0x5d8   :  { %5077 = vtanh.f32 %v6184_v36 }
 0x5d9   :  { %5079 = vrcp.f32 %v921_v12 }
 0x5da   :  { %5081 = vpow2.f32 %v4660_v35 }
 0x5e5   :  { %v5078_v3 = vpop.eup %5077 }
 0x5e6   :  { %819 = vrot.lane.b32.xlu0 %v5078_v3, %s5609_s2  ;;  %v5080_v32 = vpop.eup %5079 }
 0x5e7   :  { %v5082_v37 = vpop.eup %5081  ;;  %v928_v3 = vmul.f32 %v5080_v32, %v5999_v31 }
 0x5e8   :  { %v810_v2 = vadd.f32 1.0, %v5082_v37 }
 0x5ea   :  { %5083 = vrcp.f32 %v810_v2 }
 0x5f4   :  { %v931_v41 = vpop.permute.xlu1 %930 }
 0x5f5   :  { %v933_v0 = vmul.f32 %v5080_v32, %v931_v41 }
 0x5f7   :  { %935 = vrot.lane.b32.xlu1 %v933_v0, %s5609_s2  ;;  %v5084_v24 = vpop.eup %5083 }
 0x5f8   :  { %v817_v0 = vmul.f32 %v5084_v24, %v5994_v38  ;;  %v4661_v38 = vmul.f32 -1.442695, %v6184_v36 }
 0x658   :  { %v820_v34 = vpop.permute.xlu0 %819 }
 0x659   :  { %v822_v22 = vmul.f32 %v5084_v24, %v820_v34 }
 0x65b   :  { %824 = vrot.lane.b32.xlu0 %v822_v22, %s5609_s2 }
 0x669   :  { %v936_v10 = vpop.permute.xlu1 %935 }
 0x66a   :  { %v6192_v12 = vadd.f32 %v936_v10, %v928_v3 }
 0x66c   :  { %5085 = vtanh.f32 %v6192_v12 }
 0x66d   :  { %5087 = vpow2.f32 %v4664_v40  ;;  %v220_v40 = vadd.f32 %v6128_v39, %v8117_v25  ;;  %v6253_v39 = vld [vmem:[%s7998_s3 + $0x68] sm:$0xff] }
 0x679   :  { %v5086_v41 = vpop.eup %5085 }
 0x67a   :  { %941 = vrot.lane.b32.xlu1 %v5086_v41, %s5609_s2  ;;  %v5088_v34 = vpop.eup %5087 }
 0x67b   :  { %v922_v31 = vadd.f32 1.0, %v5088_v34 }
 0x6cd   :  { %v825_v35 = vpop.permute.xlu0 %824 }
 0x6ce   :  { %v6197_v2 = vadd.f32 %v825_v35, %v817_v0  ;;  %v222_v35 = vadd.f32 %v6132_v33, %v8118_v28  ;;  %v6259_v33 = vld [vmem:[%s7998_s3 + $0x60] sm:$0xff] }
 0x6d0   :  { %5089 = vtanh.f32 %v6197_v2 }
 0x6d1   :  { %5091 = vrcp.f32 %v922_v31 }
 0x6d2   :  { %5093 = vpow2.f32 %v4661_v38  ;;  %v6271_v38 = vld [vmem:[%s7998_s3 + $0x50] sm:$0xff] }
 0x6dd   :  { %v5090_v22 = vpop.eup %5089 }
 0x6de   :  { %830 = vrot.lane.b32.xlu0 %v5090_v22, %s5609_s2  ;;  %v5092_v32 = vpop.eup %5091 }
 0x6df   :  { %v5094_v21 = vpop.eup %5093 }
 0x6e0   :  { %v811_v24 = vadd.f32 1.0, %v5094_v21  ;;  %v6277_v21 = vld [vmem:[%s7998_s3 + $0x48] sm:$0xff] }
 0x6e2   :  { %5095 = vrcp.f32 %v811_v24  ;;  %v6283_v24 = vld [vmem:[%s7998_s3 + $0x40] sm:$0xff] }
 0x6ec   :  { %v942_v1 = vpop.permute.xlu1 %941 }
 0x6ed   :  { %v944_v37 = vmul.f32 %v5092_v32, %v942_v1  ;;  %v6246_v1 = vld [vmem:[%s7998_s3 + $0x70] sm:$0xff] }
 0x6ef   :  { %4667 = vmatmul.mubr.msk.f32.vlgmr.msra.gmra.mxu1 %vm408_vm2, %v944_v37  ;;  %v5096_v3 = vpop.eup %5095 }
 0x6f0   :  { %1168 = vmatpush1.msra.mxu1 %v5794_v43  ;;  %1231 = vmatprep.mubr.f32.mxu1 %v8112_v29 }
 0x6f1   :  { %1169 = vmatprep.subr.mxu1 %v5796_v44 }
 0x6f2   :  { %1170 = vmatpush1.msra.mxu1 %v5799_v45 }
 0x6f3   :  { %1171 = vmatprep.subr.mxu1 %v5803_v46 }
 0x6f4   :  { %1172 = vmatpush1.msra.mxu1 %v5807_v47 }
 0x6f5   :  { %1173 = vmatprep.subr.mxu1 %v5811_v48 }
 0x6f6   :  { %1174 = vmatpush1.msra.mxu1 %v5815_v49 }
 0x6f7   :  { %1175 = vmatprep.subr.mxu1 %v5819_v50 }
 0x6f8   :  { %1176 = vmatpush1.msra.mxu1 %v5823_v51 }
 0x6f9   :  { %1177 = vmatprep.subr.mxu1 %v5827_v52 }
 0x6fa   :  { %1178 = vmatpush1.msra.mxu1 %v5831_v53 }
 0x6fb   :  { %1179 = vmatprep.subr.mxu1 %v5835_v54 }
 0x6fc   :  { %1180 = vmatpush1.msra.mxu1 %v5839_v55 }
 0x6fd   :  { %1181 = vmatprep.subr.mxu1 %v5843_v56 }
 0x6fe   :  { %1182 = vmatpush1.msra.mxu1 %v5847_v57 }
 0x6ff   :  { %1183 = vmatprep.subr.mxu1 %v5851_v58 }
 0x700   :  { %1184 = vmatpush1.msra.mxu1 %v5855_v59 }
 0x701   :  { %1185 = vmatprep.subr.mxu1 %v5859_v60 }
 0x702   :  { %1186 = vmatpush1.msra.mxu1 %v5863_v61 }
 0x703   :  { %1187 = vmatprep.subr.mxu1 %v5867_v62 }
 0x704   :  { %1188 = vmatpush1.msra.mxu1 %v5871_v63 }
 0x705   :  { %1189 = vmatprep.subr.mxu1 %v5875_v7 }
 0x706   :  { %1190 = vmatpush1.msra.mxu1 %v5879_v9 }
 0x707   :  { %1191 = vmatprep.subr.mxu1 %v5883_v11 }
 0x708   :  { %1192 = vmatpush1.msra.mxu1 %v5887_v20 }
 0x709   :  { %1193 = vmatprep.subr.mxu1 %v5891_v23 }
 0x70a   :  { %1194 = vmatpush1.msra.mxu1 %v5895_v26 }
 0x70b   :  { %1195 = vmatprep.subr.mxu1 %v5899_v27 }
 0x70c   :  { %1196 = vmatpush1.msra.mxu1 %v8113_v4 }
 0x70d   :  { %1197 = vmatprep.subr.mxu1 %v8114_v5 }
 0x70e   :  { %1198 = vmatpush1.msra.mxu1 %v8115_v6 }
 0x70f   :  { %1509 = vmatprep.subr.mxu1 %v8116_v8 }
 0x750   :  { %v831_v10 = vpop.permute.xlu0 %830 }
 0x751   :  { %v833_v41 = vmul.f32 %v5096_v3, %v831_v10  ;;  %v6289_v3 = vld [vmem:[%s7998_s3 + $0x38] sm:$0xff] }
 0x753   :  { %946 = vrot.lane.b32.xlu0 %v833_v41, %s5609_s2 }
 0x7af   :  { %v1125_v0 = vpop.f32.mrf.mxu1 }
 0x7b0   :  { %v1130_v34 = vadd.f32 %v1125_v0, %v220_v40 }
 0x7b1   :  { %v1127_v8 = vpop.f32.mrf.mxu1 }
 0x7b2   :  { %v1131_v22 = vadd.f32 %v1127_v8, %v222_v35  ;;  %v4668_v10 = vmul.f32 -1.442695, %v1130_v34  ;;  %v8144_v35 = vld [vmem:[#allocation12_spill] sm:$0xff] }
 0x7b4   :  { %5097 = vtanh.f32 %v1131_v22 }
 0x7b5   :  { %5099 = vpow2.f32 %v4668_v10 }
 0x7c1   :  { %v5098_v36 = vpop.eup %5097 }
 0x7c2   :  { %1147 = vrot.lane.b32.xlu0 %v5098_v36, %s5609_s2  ;;  %v5100_v41 = vpop.eup %5099 }
 0x7c3   :  { %v1138_v40 = vadd.f32 1.0, %v5100_v41  ;;  %v4669_v41 = vmul.f32 -1.442695, %v1131_v22  ;;  %v6406_v22 = vld [vmem:[%s7998_s3 + $0x10] sm:$0xff] }
 0x7c4   :  { %8151 = vst [vmem:[#allocation34_spill] sm:$0xff] %v6406_v22 }
 0x7c5   :  { %v947_v31 = vpop.permute.xlu0 %946  ;;  %5101 = vrcp.f32 %v1138_v40 }
 0x7c6   :  { %v949_v32 = vsel %vm408_vm2, %v944_v37, %v947_v31  ;;  %v6265_v37 = vld [vmem:[%s7998_s3 + $0x58] sm:$0xff] }
 0x7c7   :  { %1015 = vmatmul.mubr.f32.vlgmr.msra.gmra.mxu0 %v949_v32 }
 0x7c8   :  { %1293 = vmatpush1.msra.mxu0 %v6246_v1  ;;  %1340 = vmatprep.mubr.f32.mxu0 %v8112_v29 }
 0x7c9   :  { %1294 = vmatprep.subr.mxu0 %v6253_v39 }
 0x7ca   :  { %1295 = vmatpush1.msra.mxu0 %v6259_v33 }
 0x7cb   :  { %1296 = vmatprep.subr.mxu0 %v6265_v37 }
 0x7cc   :  { %1297 = vmatpush1.msra.mxu0 %v6271_v38 }
 0x7cd   :  { %1298 = vmatprep.subr.mxu0 %v6277_v21 }
 0x7ce   :  { %1299 = vmatpush1.msra.mxu0 %v6283_v24 }
 0x7cf   :  { %1300 = vmatprep.subr.mxu0 %v6289_v3 }
 0x7d0   :  { %1301 = vmatpush1.msra.mxu0 %v5722_v13 }
 0x7d1   :  { %1302 = vmatprep.subr.mxu0 %v5728_v14 }
 0x7d2   :  { %1303 = vmatpush1.msra.mxu0 %v5735_v15  ;;  %v5102_v13 = vpop.eup %5101 }
 0x7d3   :  { %1304 = vmatprep.subr.mxu0 %v5742_v16 }
 0x7d4   :  { %1305 = vmatpush1.msra.mxu0 %v5748_v17 }
 0x7d5   :  { %1306 = vmatprep.subr.mxu0 %v5754_v18 }
 0x7d6   :  { %1307 = vmatpush1.msra.mxu0 %v5760_v19  ;;  %v1145_v19 = vmul.f32 %v5102_v13, %v6192_v12 }
 0x7d7   :  { %1384 = vmatprep.subr.mxu0 %v5792_v42 }
 0x834   :  { %v1148_v0 = vpop.permute.xlu0 %1147 }
 0x835   :  { %v1150_v14 = vmul.f32 %v5102_v13, %v1148_v0 }
 0x837   :  { %1152 = vrot.lane.b32.xlu0 %v1150_v14, %s5609_s2 }
 0x887   :  { %v1016_v15 = vpop.f32.mrf.mxu0 }
 0x888   :  { %v1017_v36 = vadd.f32 %v1016_v15, %v5989_v30  ;;  %v6412_v15 = vld [vmem:[%s7998_s3 + $0x8] sm:$0xff] }
 0x889   :  { %v1018_v16 = vpop.f32.mrf.mxu0  ;;  %8152 = vst [vmem:[#allocation35_spill] sm:$0xff] %v6412_v15 }
 0x88a   :  { %v6302_v17 = vadd.f32 %v1018_v16, %v8144_v35  ;;  %v4665_v31 = vmul.f32 -1.442695, %v1017_v36 }
 0x88c   :  { %5103 = vtanh.f32 %v6302_v17 }
 0x899   :  { %v5104_v18 = vpop.eup %5103 }
 0x89a   :  { %1036 = vrot.lane.b32.xlu1 %v5104_v18, %s5609_s2 }
 0x8a9   :  { %v1153_v42 = vpop.permute.xlu0 %1152 }
 0x8aa   :  { %v6307_v34 = vadd.f32 %v1153_v42, %v1145_v19  ;;  %v6421_v42 = vld [vmem:[#allocation3 + $0xf8] sm:$0xff] }
 0x8ac   :  { %5105 = vtanh.f32 %v6307_v34 }
 0x8ad   :  { %5107 = vpow2.f32 %v4665_v31 }
 0x8b9   :  { %v5106_v8 = vpop.eup %5105 }
 0x8ba   :  { %1158 = vrot.lane.b32.xlu0 %v5106_v8, %s5609_s2  ;;  %v5108_v32 = vpop.eup %5107 }
 0x8bb   :  { %v1027_v10 = vadd.f32 1.0, %v5108_v32 }
 0x8bd   :  { %5109 = vrcp.f32 %v1027_v10 }
 0x8be   :  { %5111 = vpow2.f32 %v4669_v41 }
 0x8ca   :  { %v5110_v40 = vpop.eup %5109 }
 0x8cb   :  { %v5112_v12 = vpop.eup %5111 }
 0x8cc   :  { %v1139_v13 = vadd.f32 1.0, %v5112_v12 }
 0x8ce   :  { %5113 = vrcp.f32 %v1139_v13 }
 0x8db   :  { %v5114_v16 = vpop.eup %5113 }
 0x90c   :  { %v1037_v0 = vpop.permute.xlu1 %1036 }
 0x90d   :  { %v1039_v14 = vmul.f32 %v5110_v40, %v1037_v0 }
 0x90f   :  { %1041 = vrot.lane.b32.xlu1 %v1039_v14, %s5609_s2 }
 0x92c   :  { %v1159_v18 = vpop.permute.xlu0 %1158 }
 0x92d   :  { %v6313_v19 = vmul.f32 %v5114_v16, %v1159_v18 }
 0x92f   :  { %4672 = vmatmul.mubr.msk.f32.vlgmr.msra.gmra.mxu0 %vm408_vm2, %v6313_v19 }
 0x930   :  { %1385 = vmatpush1.msra.mxu0 %v5794_v43  ;;  %1448 = vmatprep.mubr.f32.mxu0 %v8112_v29  ;;  %v6352_v43 = vld [vmem:[%s7998_s3 + $0x78] sm:$0xff] }
 0x931   :  { %1386 = vmatprep.subr.mxu0 %v5796_v44  ;;  %8145 = vst [vmem:[#allocation12_spill] sm:$0xff] %v6352_v43  ;;  %v1034_v44 = vmul.f32 %v5110_v40, %v6197_v2  ;;  %v6400_v2 = vld [vmem:[%s7998_s3 + $0x18] sm:$0xff] }
 0x932   :  { %1387 = vmatpush1.msra.mxu0 %v5799_v45  ;;  %8150 = vst [vmem:[#allocation33_spill] sm:$0xff] %v6400_v2 }
 0x933   :  { %1388 = vmatprep.subr.mxu0 %v5803_v46 }
 0x934   :  { %1389 = vmatpush1.msra.mxu0 %v5807_v47 }
 0x935   :  { %1390 = vmatprep.subr.mxu0 %v5811_v48  ;;  %v4666_v48 = vmul.f32 -1.442695, %v6302_v17  ;;  %v6418_v17 = vld [vmem:[%s7998_s3] sm:$0xff] }
 0x936   :  { %1391 = vmatpush1.msra.mxu0 %v5815_v49  ;;  %8153 = vst [vmem:[#allocation36_spill] sm:$0xff] %v6418_v17 }
 0x937   :  { %1392 = vmatprep.subr.mxu0 %v5819_v50  ;;  %v8146_v50 = vld [vmem:[#allocation9_spill] sm:$0xff] }
 0x938   :  { %1393 = vmatpush1.msra.mxu0 %v5823_v51  ;;  %v226_v51 = vadd.f32 %v8146_v50, %v8117_v25  ;;  %v6459_v50 = vld [vmem:[#allocation3 + $0xc0] sm:$0xff] }
 0x939   :  { %1394 = vmatprep.subr.mxu0 %v5827_v52 }
 0x93a   :  { %1395 = vmatpush1.msra.mxu0 %v5831_v53 }
 0x93b   :  { %1396 = vmatprep.subr.mxu0 %v5835_v54 }
 0x93c   :  { %1397 = vmatpush1.msra.mxu0 %v5839_v55 }
 0x93d   :  { %1398 = vmatprep.subr.mxu0 %v5843_v56  ;;  %v8147_v56 = vld [vmem:[#allocation10_spill] sm:$0xff] }
 0x93e   :  { %1399 = vmatpush1.msra.mxu0 %v5847_v57  ;;  %v228_v57 = vadd.f32 %v8147_v56, %v8118_v28  ;;  %v6477_v56 = vld [vmem:[#allocation3 + $0x90] sm:$0xff] }
 0x93f   :  { %1400 = vmatprep.subr.mxu0 %v5851_v58 }
 0x940   :  { %1401 = vmatpush1.msra.mxu0 %v5855_v59 }
 0x941   :  { %1402 = vmatprep.subr.mxu0 %v5859_v60 }
 0x942   :  { %1403 = vmatpush1.msra.mxu0 %v5863_v61 }
 0x943   :  { %1404 = vmatprep.subr.mxu0 %v5867_v62 }
 0x944   :  { %1405 = vmatpush1.msra.mxu0 %v5871_v63 }
 0x945   :  { %1406 = vmatprep.subr.mxu0 %v5875_v7 }
 0x946   :  { %1407 = vmatpush1.msra.mxu0 %v5879_v9 }
 0x947   :  { %1408 = vmatprep.subr.mxu0 %v5883_v11 }
 0x948   :  { %1409 = vmatpush1.msra.mxu0 %v5887_v20 }
 0x949   :  { %1410 = vmatprep.subr.mxu0 %v5891_v23 }
 0x94a   :  { %1411 = vmatpush1.msra.mxu0 %v5895_v26 }
 0x94b   :  { %1412 = vmatprep.subr.mxu0 %v5899_v27 }
 0x94c   :  { %1413 = vmatpush1.msra.mxu0 %v8113_v4  ;;  %v6382_v4 = vld [vmem:[%s7998_s3 + $0x30] sm:$0xff] }
 0x94d   :  { %1414 = vmatprep.subr.mxu0 %v8114_v5  ;;  %v6388_v5 = vld [vmem:[%s7998_s3 + $0x28] sm:$0xff] }
 0x94e   :  { %1415 = vmatpush1.msra.mxu0 %v8115_v6  ;;  %8148 = vst [vmem:[#allocation9_spill] sm:$0xff] %v6388_v5  ;;  %v6394_v6 = vld [vmem:[%s7998_s3 + $0x20] sm:$0xff] }
 0x94f   :  { %1726 = vmatprep.subr.mxu0 %v6352_v43  ;;  %8149 = vst [vmem:[#allocation10_spill] sm:$0xff] %v6394_v6 }
 0x981   :  { %v1042_v45 = vpop.permute.xlu1 %1041 }
 0x982   :  { %v6356_v46 = vadd.f32 %v1042_v45, %v1034_v44  ;;  %v6444_v44 = vld [vmem:[#allocation3 + $0xe8] sm:$0xff]  ;;  %v6447_v45 = vld [vmem:[#allocation3 + $0xe0] sm:$0xff] }
 0x984   :  { %5115 = vtanh.f32 %v6356_v46 }
 0x985   :  { %5117 = vpow2.f32 %v4666_v48  ;;  %v6453_v48 = vld [vmem:[#allocation3 + $0xd0] sm:$0xff] }
 0x991   :  { %v5116_v47 = vpop.eup %5115 }
 0x992   :  { %1047 = vrot.lane.b32.xlu1 %v5116_v47, %s5609_s2  ;;  %v5118_v49 = vpop.eup %5117  ;;  %v6450_v47 = vld [vmem:[#allocation3 + $0xd8] sm:$0xff] }
 0x993   :  { %v1028_v53 = vadd.f32 1.0, %v5118_v49  ;;  %v6456_v49 = vld [vmem:[#allocation3 + $0xc8] sm:$0xff] }
 0x995   :  { %5119 = vrcp.f32 %v1028_v53  ;;  %v6468_v53 = vld [vmem:[#allocation3 + $0xa8] sm:$0xff] }
 0x9a2   :  { %v5120_v59 = vpop.eup %5119 }
 0x9ef   :  { %v1342_v52 = vpop.f32.mrf.mxu0 }
 0x9f0   :  { %v1347_v54 = vadd.f32 %v1342_v52, %v226_v51  ;;  %v6462_v51 = vld [vmem:[#allocation3 + $0xb8] sm:$0xff]  ;;  %v6465_v52 = vld [vmem:[#allocation3 + $0xb0] sm:$0xff] }
 0x9f1   :  { %v1344_v55 = vpop.f32.mrf.mxu0 }
 0x9f2   :  { %v1348_v58 = vadd.f32 %v1344_v55, %v228_v57  ;;  %v4673_v63 = vmul.f32 -1.442695, %v1347_v54  ;;  %v6471_v54 = vld [vmem:[#allocation3 + $0xa0] sm:$0xff]  ;;  %v6474_v55 = vld [vmem:[#allocation3 + $0x98] sm:$0xff]  ;;  %v6480_v57 = vld [vmem:[#allocation3 + $0x88] sm:$0xff] }
 0x9f4   :  { %5121 = vtanh.f32 %v1348_v58 }
 0x9f5   :  { %5123 = vpow2.f32 %v4673_v63  ;;  %v6498_v63 = vld [vmem:[#allocation3 + $0x58] sm:$0xff] }
 0xa01   :  { %v5122_v62 = vpop.eup %5121 }
 0xa02   :  { %v5124_v7 = vpop.eup %5123 }
 0xa03   :  { %v1355_v9 = vadd.f32 1.0, %v5124_v7  ;;  %v6501_v7 = vld [vmem:[#allocation3 + $0x50] sm:$0xff] }
 0xa04   :  { %v1048_v60 = vpop.permute.xlu1 %1047 }
 0xa05   :  { %v1050_v61 = vmul.f32 %v5120_v59, %v1048_v60  ;;  %5125 = vrcp.f32 %v1355_v9  ;;  %v6486_v59 = vld [vmem:[#allocation3 + $0x78] sm:$0xff]  ;;  %v6489_v60 = vld [vmem:[#allocation3 + $0x70] sm:$0xff]  ;;  %v6504_v9 = vld [vmem:[#allocation3 + $0x48] sm:$0xff] }
 0xa07   :  { %1163 = vrot.lane.b32.xlu1 %v1050_v61, %s5609_s2  ;;  %v6492_v61 = vld [vmem:[#allocation3 + $0x68] sm:$0xff] }
 0xa0b   :  { %1364 = vrot.lane.b32.xlu1 %v5122_v62, %s5609_s2  ;;  %v6495_v62 = vld [vmem:[#allocation3 + $0x60] sm:$0xff] }
 0xa12   :  { %v5126_v23 = vpop.eup %5125 }
 0xa13   :  { %v1362_v8 = vmul.f32 %v5126_v23, %v6307_v34  ;;  %v4674_v34 = vmul.f32 -1.442695, %v1348_v58  ;;  %v6483_v58 = vld [vmem:[#allocation3 + $0x80] sm:$0xff] }
 0xa79   :  { %v1164_v11 = vpop.permute.xlu1 %1163 }
 0xa7a   :  { %v1166_v20 = vsel %vm408_vm2, %v6313_v19, %v1164_v11  ;;  %v6440_v19 = vld [vmem:[#allocation3 + $0xf0] sm:$0xff]  ;;  %v6507_v11 = vld [vmem:[#allocation3 + $0x40] sm:$0xff] }
 0xa7b   :  { %1232 = vmatmul.mubr.f32.vlgmr.msra.gmra.mxu1 %v1166_v20  ;;  %v6510_v20 = vld [vmem:[#allocation3 + $0x38] sm:$0xff] }
 0xa7c   :  { %1510 = vmatpush1.msra.mxu1 %v6246_v1  ;;  %1557 = vmatprep.mubr.f32.mxu1 %v8112_v29 }
 0xa7d   :  { %v1365_v26 = vpop.permute.xlu1 %1364  ;;  %1511 = vmatprep.subr.mxu1 %v6253_v39 }
 0xa7e   :  { %v1367_v27 = vmul.f32 %v5126_v23, %v1365_v26  ;;  %1512 = vmatpush1.msra.mxu1 %v6259_v33  ;;  %v6513_v23 = vld [vmem:[#allocation3 + $0x30] sm:$0xff]  ;;  %v6516_v26 = vld [vmem:[#allocation3 + $0x28] sm:$0xff] }
 0xa7f   :  { %1513 = vmatprep.subr.mxu1 %v6265_v37 }
 0xa80   :  { %1369 = vrot.lane.b32.xlu1 %v1367_v27, %s5609_s2  ;;  %1514 = vmatpush1.msra.mxu1 %v6271_v38  ;;  %v6519_v27 = vld [vmem:[#allocation3 + $0x20] sm:$0xff] }
 0xa81   :  { %1515 = vmatprep.subr.mxu1 %v6277_v21  ;;  %8154 = vst [vmem:[#allocation37_spill] sm:$0xff] %v6519_v27 }
 0xa82   :  { %1516 = vmatpush1.msra.mxu1 %v6283_v24 }
 0xa83   :  { %1517 = vmatprep.subr.mxu1 %v6289_v3 }
 0xa84   :  { %1518 = vmatpush1.msra.mxu1 %v6382_v4 }
 0xa85   :  { %1519 = vmatprep.subr.mxu1 %v6388_v5 }
 0xa86   :  { %1520 = vmatpush1.msra.mxu1 %v6394_v6 }
 0xa87   :  { %1521 = vmatprep.subr.mxu1 %v6400_v2 }
 0xa88   :  { %1522 = vmatpush1.msra.mxu1 %v6406_v22 }
 0xa89   :  { %1523 = vmatprep.subr.mxu1 %v6412_v15 }
 0xa8a   :  { %1524 = vmatpush1.msra.mxu1 %v6418_v17 }
 0xa8b   :  { %1601 = vmatprep.subr.mxu1 %v6421_v42 }
 0xaf2   :  { %v1370_v36 = vpop.permute.xlu1 %1369 }
 0xaf3   :  { %v6425_v31 = vadd.f32 %v1370_v36, %v1362_v8  ;;  %v6522_v8 = vld [vmem:[#allocation3 + $0x18] sm:$0xff]  ;;  %v6525_v36 = vld [vmem:[#allocation3 + $0x10] sm:$0xff] }
 0xaf4   :  { %8155 = vst [vmem:[#allocation38_spill] sm:$0xff] %v6522_v8  ;;  %8156 = vst [vmem:[#allocation39_spill] sm:$0xff] %v6525_v36 }
 0xaf5   :  { %5127 = vtanh.f32 %v6425_v31 }
 0xb02   :  { %v5128_v32 = vpop.eup %5127 }
 0xb03   :  { %1375 = vrot.lane.b32.xlu1 %v5128_v32, %s5609_s2  ;;  %v6528_v32 = vld [vmem:[#allocation3 + $0x8] sm:$0xff] }
 0xb04   :  { %8157 = vst [vmem:[#allocation40_spill] sm:$0xff] %v6528_v32 }
 0xb3b   :  { %v6429_v10 = vpop.f32.mrf.mxu1 }
 0xb3d   :  { %v1235_v41 = vpop.f32.mrf.mxu1 }
 0xb3e   :  { %v6432_v40 = vadd.f32 %v1235_v41, %v8144_v35  ;;  %v6531_v41 = vld [vmem:[#allocation3] sm:$0xff] }
 0xb3f   :  { %8158 = vst [vmem:[#allocation41_spill] sm:$0xff] %v6531_v41 }
 0xb40   :  { %5129 = vtanh.f32 %v6432_v40 }
 0xb41   :  { %5131 = vpow2.f32 %v4674_v34 }
 0xb4d   :  { %v5130_v0 = vpop.eup %5129 }
 0xb4e   :  { %1253 = vrot.lane.b32.xlu0 %v5130_v0, %s5609_s2  ;;  %v5132_v14 = vpop.eup %5131  ;;  %v1234_v0 = vadd.f32 %v6429_v10, %v5989_v30 }
 0xb4f   :  { %v1356_v12 = vadd.f32 1.0, %v5132_v14 }
 0xb50   :  { %v4670_v34 = vmul.f32 -1.442695, %v1234_v0 }
 0xb51   :  { %5133 = vrcp.f32 %v1356_v12 }
 0xb52   :  { %5135 = vpow2.f32 %v4670_v34 }
 0xb5e   :  { %v5134_v13 = vpop.eup %5133 }
 0xb5f   :  { %v5136_v14 = vpop.eup %5135 }
 0xb60   :  { %v1244_v12 = vadd.f32 1.0, %v5136_v14  ;;  %v4671_v14 = vmul.f32 -1.442695, %v6432_v40 }
 0xb62   :  { %5137 = vrcp.f32 %v1244_v12 }
 0xb75   :  { %v1376_v16 = vpop.permute.xlu1 %1375 }
 0xb76   :  { %v6436_v18 = vmul.f32 %v5134_v13, %v1376_v16  ;;  %v5138_v13 = vpop.eup %5137 }
 0xb78   :  { %4677 = vmatmul.mubr.msk.f32.vlgmr.msra.gmra.mxu1 %vm408_vm2, %v6436_v18 }
 0xb79   :  { %1602 = vmatpush1.msra.mxu1 %v6440_v19  ;;  %1665 = vmatprep.mubr.f32.mxu1 %v8112_v29 }
 0xb7a   :  { %1603 = vmatprep.subr.mxu1 %v6444_v44 }
 0xb7b   :  { %1604 = vmatpush1.msra.mxu1 %v6447_v45 }
 0xb7c   :  { %1605 = vmatprep.subr.mxu1 %v6450_v47 }
 0xb7d   :  { %1606 = vmatpush1.msra.mxu1 %v6453_v48 }
 0xb7e   :  { %1607 = vmatprep.subr.mxu1 %v6456_v49 }
 0xb7f   :  { %1608 = vmatpush1.msra.mxu1 %v6459_v50 }
 0xb80   :  { %1609 = vmatprep.subr.mxu1 %v6462_v51 }
 0xb81   :  { %1610 = vmatpush1.msra.mxu1 %v6465_v52 }
 0xb82   :  { %1611 = vmatprep.subr.mxu1 %v6468_v53 }
 0xb83   :  { %1612 = vmatpush1.msra.mxu1 %v6471_v54 }
 0xb84   :  { %1613 = vmatprep.subr.mxu1 %v6474_v55 }
 0xb85   :  { %1614 = vmatpush1.msra.mxu1 %v6477_v56 }
 0xb86   :  { %1615 = vmatprep.subr.mxu1 %v6480_v57 }
 0xb87   :  { %1616 = vmatpush1.msra.mxu1 %v6483_v58 }
 0xb88   :  { %1617 = vmatprep.subr.mxu1 %v6486_v59 }
 0xb89   :  { %1618 = vmatpush1.msra.mxu1 %v6489_v60 }
 0xb8a   :  { %1619 = vmatprep.subr.mxu1 %v6492_v61 }
 0xb8b   :  { %1620 = vmatpush1.msra.mxu1 %v6495_v62 }
 0xb8c   :  { %1621 = vmatprep.subr.mxu1 %v6498_v63 }
 0xb8d   :  { %1622 = vmatpush1.msra.mxu1 %v6501_v7 }
 0xb8e   :  { %1623 = vmatprep.subr.mxu1 %v6504_v9 }
 0xb8f   :  { %1624 = vmatpush1.msra.mxu1 %v6507_v11 }
 0xb90   :  { %1625 = vmatprep.subr.mxu1 %v6510_v20 }
 0xb91   :  { %1626 = vmatpush1.msra.mxu1 %v6513_v23 }
 0xb92   :  { %1627 = vmatprep.subr.mxu1 %v6516_v26 }
 0xb93   :  { %1628 = vmatpush1.msra.mxu1 %v6519_v27 }
 0xb94   :  { %1629 = vmatprep.subr.mxu1 %v6522_v8 }
 0xb95   :  { %1630 = vmatpush1.msra.mxu1 %v6525_v36 }
 0xb96   :  { %1631 = vmatprep.subr.mxu1 %v6528_v32  ;;  %v1251_v32 = vmul.f32 %v5138_v13, %v6356_v46  ;;  %v8160_v46 = vld [vmem:[#allocation6_spill] sm:$0xff] }
 0xb97   :  { %1632 = vmatpush1.msra.mxu1 %v6531_v41  ;;  %v8159_v41 = vld [vmem:[#allocation11_spill] sm:$0xff] }
 0xb98   :  { %4841 = vmatprep.subr.mxu1 %v8112_v29  ;;  %v232_v8 = vadd.f32 %v8159_v41, %v8117_v25 }
 0xbc0   :  { %v1254_v16 = vpop.permute.xlu0 %1253 }
 0xbc1   :  { %v1256_v43 = vmul.f32 %v5138_v13, %v1254_v16  ;;  %v234_v13 = vadd.f32 %v8160_v46, %v8118_v28 }
 0xbc3   :  { %1258 = vrot.lane.b32.xlu0 %v1256_v43, %s5609_s2 }
 0xc35   :  { %v1259_v36 = vpop.permute.xlu0 %1258 }
 0xc36   :  { %v6541_v27 = vadd.f32 %v1259_v36, %v1251_v32 }
 0xc38   :  { %v1559_v10 = vpop.f32.mrf.mxu1  ;;  %5139 = vtanh.f32 %v6541_v27 }
 0xc39   :  { %v1564_v0 = vadd.f32 %v1559_v10, %v232_v8  ;;  %5141 = vpow2.f32 %v4671_v14 }
 0xc3a   :  { %v1561_v16 = vpop.f32.mrf.mxu1 }
 0xc3b   :  { %v1565_v41 = vadd.f32 %v1561_v16, %v234_v13  ;;  %v4678_v10 = vmul.f32 -1.442695, %v1564_v0 }
 0xc45   :  { %v5140_v34 = vpop.eup %5139 }
 0xc46   :  { %1264 = vrot.lane.b32.xlu0 %v5140_v34, %s5609_s2  ;;  %v5142_v12 = vpop.eup %5141 }
 0xc47   :  { %v1245_v43 = vadd.f32 1.0, %v5142_v12 }
 0xc49   :  { %5143 = vrcp.f32 %v1245_v43 }
 0xc4a   :  { %5145 = vtanh.f32 %v1565_v41 }
 0xc4b   :  { %5147 = vpow2.f32 %v4678_v10 }
 0xc56   :  { %v5144_v36 = vpop.eup %5143 }
 0xc57   :  { %v5146_v8 = vpop.eup %5145 }
 0xc58   :  { %v5148_v40 = vpop.eup %5147 }
 0xc59   :  { %v1572_v34 = vadd.f32 1.0, %v5148_v40  ;;  %v4679_v40 = vmul.f32 -1.442695, %v1565_v41  ;;  %v8161_v41 = vld [vmem:[#allocation37_spill] sm:$0xff] }
 0xc5b   :  { %5149 = vrcp.f32 %v1572_v34 }
 0xc68   :  { %v5150_v43 = vpop.eup %5149 }
 0xcb8   :  { %v1265_v32 = vpop.permute.xlu0 %1264 }
 0xcb9   :  { %v1267_v25 = vmul.f32 %v5144_v36, %v1265_v32 }
 0xcbb   :  { %1380 = vrot.lane.b32.xlu0 %v1267_v25, %s5609_s2 }
 0xcbf   :  { %1581 = vrot.lane.b32.xlu0 %v5146_v8, %s5609_s2 }
 0xd2d   :  { %v1381_v14 = vpop.permute.xlu0 %1380 }
 0xd2e   :  { %v1383_v12 = vsel %vm408_vm2, %v6436_v18, %v1381_v14  ;;  %v1579_v18 = vmul.f32 %v5150_v43, %v6425_v31 }
 0xd2f   :  { %1449 = vmatmul.mubr.f32.vlgmr.msra.gmra.mxu0 %v1383_v12 }
 0xd30   :  { %1727 = vmatpush1.msra.mxu0 %v6246_v1  ;;  %1774 = vmatprep.mubr.f32.mxu0 %v8112_v29 }
 0xd31   :  { %v1582_v16 = vpop.permute.xlu0 %1581  ;;  %1728 = vmatprep.subr.mxu0 %v6253_v39 }
 0xd32   :  { %v1584_v25 = vmul.f32 %v5150_v43, %v1582_v16  ;;  %1729 = vmatpush1.msra.mxu0 %v6259_v33  ;;  %v8162_v16 = vld [vmem:[#allocation38_spill] sm:$0xff] }
 0xd33   :  { %1730 = vmatprep.subr.mxu0 %v6265_v37 }
 0xd34   :  { %1586 = vrot.lane.b32.xlu0 %v1584_v25, %s5609_s2  ;;  %1731 = vmatpush1.msra.mxu0 %v6271_v38  ;;  %v8163_v25 = vld [vmem:[#allocation39_spill] sm:$0xff] }
 0xd35   :  { %1732 = vmatprep.subr.mxu0 %v6277_v21 }
 0xd36   :  { %1733 = vmatpush1.msra.mxu0 %v6283_v24 }
 0xd37   :  { %1734 = vmatprep.subr.mxu0 %v6289_v3 }
 0xd38   :  { %1735 = vmatpush1.msra.mxu0 %v6382_v4 }
 0xd39   :  { %1736 = vmatprep.subr.mxu0 %v6388_v5 }
 0xd3a   :  { %1737 = vmatpush1.msra.mxu0 %v6394_v6 }
 0xd3b   :  { %1738 = vmatprep.subr.mxu0 %v6400_v2 }
 0xd3c   :  { %1739 = vmatpush1.msra.mxu0 %v6406_v22  ;;  %v8167_v22 = vld [vmem:[#allocation8_spill] sm:$0xff] }
 0xd3d   :  { %1740 = vmatprep.subr.mxu0 %v6412_v15  ;;  %v8166_v15 = vld [vmem:[#allocation7_spill] sm:$0xff] }
 0xd3e   :  { %1741 = vmatpush1.msra.mxu0 %v6418_v17  ;;  %v238_v2 = vadd.f32 %v8167_v22, %v8166_v15 }
 0xd3f   :  { %1818 = vmatprep.subr.mxu0 %v6421_v42 }
 0xda6   :  { %v1587_v0 = vpop.permute.xlu0 %1586 }
 0xda7   :  { %v6571_v46 = vadd.f32 %v1587_v0, %v1579_v18  ;;  %v8164_v18 = vld [vmem:[#allocation40_spill] sm:$0xff]  ;;  %v8165_v0 = vld [vmem:[#allocation41_spill] sm:$0xff] }
 0xda9   :  { %5151 = vtanh.f32 %v6571_v46 }
 0xdb6   :  { %v5152_v13 = vpop.eup %5151 }
 0xdb7   :  { %1592 = vrot.lane.b32.xlu0 %v5152_v13, %s5609_s2 }
 0xdef   :  { %v1450_v36 = vpop.f32.mrf.mxu0 }
 0xdf0   :  { %v1451_v13 = vadd.f32 %v1450_v36, %v5989_v30 }
 0xdf1   :  { %v1452_v32 = vpop.f32.mrf.mxu0 }
 0xdf2   :  { %v6576_v8 = vadd.f32 %v1452_v32, %v8144_v35  ;;  %v4675_v32 = vmul.f32 -1.442695, %v1451_v13 }
 0xdf4   :  { %5153 = vtanh.f32 %v6576_v8 }
 0xdf5   :  { %5155 = vpow2.f32 %v4679_v40 }
 0xe01   :  { %v5154_v10 = vpop.eup %5153 }
 0xe02   :  { %1470 = vrot.lane.b32.xlu1 %v5154_v10, %s5609_s2  ;;  %v5156_v31 = vpop.eup %5155 }
 0xe03   :  { %v1573_v34 = vadd.f32 1.0, %v5156_v31 }
 0xe05   :  { %5157 = vrcp.f32 %v1573_v34 }
 0xe06   :  { %5159 = vpow2.f32 %v4675_v32  ;;  %v4676_v32 = vmul.f32 -1.442695, %v6576_v8 }
 0xe12   :  { %v5158_v14 = vpop.eup %5157 }
 0xe13   :  { %v5160_v10 = vpop.eup %5159 }
 0xe14   :  { %v1461_v40 = vadd.f32 1.0, %v5160_v10 }
 0xe16   :  { %5161 = vrcp.f32 %v1461_v40 }
 0xe23   :  { %v5162_v31 = vpop.eup %5161 }
 0xe29   :  { %v1593_v12 = vpop.permute.xlu0 %1592 }
 0xe2a   :  { %v6580_v43 = vmul.f32 %v5158_v14, %v1593_v12  ;;  %v1468_v12 = vmul.f32 %v5162_v31, %v6541_v27 }
 0xe2c   :  { %4682 = vmatmul.mubr.msk.f32.vlgmr.msra.gmra.mxu0 %vm408_vm2, %v6580_v43 }
 0xe2d   :  { %1819 = vmatpush1.msra.mxu0 %v6440_v19  ;;  %1882 = vmatprep.mubr.f32.mxu0 %v8112_v29 }
 0xe2e   :  { %1820 = vmatprep.subr.mxu0 %v6444_v44 }
 0xe2f   :  { %1821 = vmatpush1.msra.mxu0 %v6447_v45 }
 0xe30   :  { %1822 = vmatprep.subr.mxu0 %v6450_v47 }
 0xe31   :  { %1823 = vmatpush1.msra.mxu0 %v6453_v48 }
 0xe32   :  { %1824 = vmatprep.subr.mxu0 %v6456_v49 }
 0xe33   :  { %1825 = vmatpush1.msra.mxu0 %v6459_v50 }
 0xe34   :  { %1826 = vmatprep.subr.mxu0 %v6462_v51 }
 0xe35   :  { %1827 = vmatpush1.msra.mxu0 %v6465_v52 }
 0xe36   :  { %1828 = vmatprep.subr.mxu0 %v6468_v53 }
 0xe37   :  { %1829 = vmatpush1.msra.mxu0 %v6471_v54 }
 0xe38   :  { %1830 = vmatprep.subr.mxu0 %v6474_v55 }
 0xe39   :  { %1831 = vmatpush1.msra.mxu0 %v6477_v56 }
 0xe3a   :  { %1832 = vmatprep.subr.mxu0 %v6480_v57 }
 0xe3b   :  { %1833 = vmatpush1.msra.mxu0 %v6483_v58 }
 0xe3c   :  { %1834 = vmatprep.subr.mxu0 %v6486_v59 }
 0xe3d   :  { %1835 = vmatpush1.msra.mxu0 %v6489_v60 }
 0xe3e   :  { %1836 = vmatprep.subr.mxu0 %v6492_v61 }
 0xe3f   :  { %1837 = vmatpush1.msra.mxu0 %v6495_v62 }
 0xe40   :  { %1838 = vmatprep.subr.mxu0 %v6498_v63 }
 0xe41   :  { %1839 = vmatpush1.msra.mxu0 %v6501_v7 }
 0xe42   :  { %1840 = vmatprep.subr.mxu0 %v6504_v9 }
 0xe43   :  { %1841 = vmatpush1.msra.mxu0 %v6507_v11 }
 0xe44   :  { %1842 = vmatprep.subr.mxu0 %v6510_v20 }
 0xe45   :  { %1843 = vmatpush1.msra.mxu0 %v6513_v23 }
 0xe46   :  { %1844 = vmatprep.subr.mxu0 %v6516_v26 }
 0xe47   :  { %1845 = vmatpush1.msra.mxu0 %v8161_v41 }
 0xe48   :  { %1846 = vmatprep.subr.mxu0 %v8162_v16 }
 0xe49   :  { %1847 = vmatpush1.msra.mxu0 %v8163_v25 }
 0xe4a   :  { %1848 = vmatprep.subr.mxu0 %v8164_v18 }
 0xe4b   :  { %1849 = vmatpush1.msra.mxu0 %v8165_v0 }
 0xe4c   :  { %2108 = vmatprep.subr.mxu0 %v6421_v42 }
 0xe74   :  { %v1471_v34 = vpop.permute.xlu1 %1470 }
 0xe75   :  { %v1473_v14 = vmul.f32 %v5162_v31, %v1471_v34 }
 0xe77   :  { %1475 = vrot.lane.b32.xlu1 %v1473_v14, %s5609_s2  ;;  %v8168_v14 = vld [vmem:[#allocation14_spill] sm:$0xff] }
 0xe78   :  { %v240_v27 = vadd.f32 %v8168_v14, %v8118_v28 }
 0xee9   :  { %v1476_v17 = vpop.permute.xlu1 %1475 }
 0xeea   :  { %v1478_v6 = vadd.f32 %v1476_v17, %v1468_v12 }
 0xeec   :  { %v1776_v36 = vpop.f32.mrf.mxu0  ;;  %5163 = vtanh.f32 %v1478_v6 }
 0xeed   :  { %v1781_v5 = vadd.f32 %v1776_v36, %v238_v2  ;;  %5165 = vpow2.f32 %v4676_v32 }
 0xeee   :  { %v1778_v34 = vpop.f32.mrf.mxu0 }
 0xeef   :  { %v1782_v31 = vadd.f32 %v1778_v34, %v240_v27  ;;  %v4683_v36 = vmul.f32 -1.442695, %v1781_v5 }
 0xef9   :  { %v5164_v13 = vpop.eup %5163 }
 0xefa   :  { %1481 = vrot.lane.b32.xlu1 %v5164_v13, %s5609_s2  ;;  %v5166_v10 = vpop.eup %5165 }
 0xefb   :  { %v1462_v40 = vadd.f32 1.0, %v5166_v10 }
 0xefd   :  { %5167 = vrcp.f32 %v1462_v40 }
 0xefe   :  { %5169 = vtanh.f32 %v1782_v31 }
 0xeff   :  { %5171 = vpow2.f32 %v4683_v36 }
 0xf0a   :  { %v5168_v22 = vpop.eup %5167 }
 0xf0b   :  { %v5170_v2 = vpop.eup %5169 }
 0xf0c   :  { %v5172_v8 = vpop.eup %5171 }
 0xf0d   :  { %v1789_v13 = vadd.f32 1.0, %v5172_v8 }
 0xf0f   :  { %5173 = vrcp.f32 %v1789_v13 }
 0xf1c   :  { %v5174_v40 = vpop.eup %5173 }
 0xf1d   :  { %v1796_v27 = vmul.f32 %v5174_v40, %v6571_v46 }
 0xf6c   :  { %v1482_v17 = vpop.permute.xlu1 %1481 }
 0xf6d   :  { %v1484_v12 = vmul.f32 %v5168_v22, %v1482_v17 }
 0xf6f   :  { %1597 = vrot.lane.b32.xlu1 %v1484_v12, %s5609_s2 }
 0xf73   :  { %1798 = vrot.lane.b32.xlu1 %v5170_v2, %s5609_s2 }
 0xfe1   :  { %v1598_v32 = vpop.permute.xlu1 %1597 }
 0xfe2   :  { %v1600_v10 = vsel %vm408_vm2, %v6580_v43, %v1598_v32 }
 0xfe3   :  { %1666 = vmatmul.mubr.f32.vlgmr.msra.gmra.mxu1 %v1600_v10 }
 0xfe4   :  { %4857 = vmatprep.mubr.msk.f32.mxu1 %vm5610_vm3, %v8112_v29 }
 0xfe5   :  { %v1799_v34 = vpop.permute.xlu1 %1798 }
 0xfe6   :  { %v1801_v14 = vmul.f32 %v5174_v40, %v1799_v34 }
 0xfe8   :  { %1803 = vrot.lane.b32.xlu1 %v1801_v14, %s5609_s2 }
0x105a   :  { %v1804_v22 = vpop.permute.xlu1 %1803 }
0x105b   :  { %v6632_v17 = vadd.f32 %v1804_v22, %v1796_v27 }
0x105d   :  { %5175 = vtanh.f32 %v6632_v17 }
0x106a   :  { %v5176_v5 = vpop.eup %5175 }
0x106b   :  { %1809 = vrot.lane.b32.xlu1 %v5176_v5, %s5609_s2 }
0x10a3   :  { %v1667_v12 = vpop.f32.mrf.mxu1 }
0x10a4   :  { %v1668_v8 = vadd.f32 %v1667_v12, %v5989_v30 }
0x10a5   :  { %v1669_v2 = vpop.f32.mrf.mxu1 }
0x10a6   :  { %v1670_v43 = vadd.f32 %v1669_v2, %v8144_v35  ;;  %v4680_v13 = vmul.f32 -1.442695, %v1668_v8 }
0x10a8   :  { %5177 = vtanh.f32 %v1670_v43  ;;  %v4681_v12 = vmul.f32 -1.442695, %v1670_v43 }
0x10a9   :  { %5179 = vpow2.f32 %v4680_v13 }
0x10b5   :  { %v5178_v36 = vpop.eup %5177 }
0x10b6   :  { %1687 = vrot.lane.b32.xlu0 %v5178_v36, %s5609_s2  ;;  %v5180_v46 = vpop.eup %5179 }
0x10b7   :  { %v1678_v32 = vadd.f32 1.0, %v5180_v46 }
0x10b9   :  { %5181 = vrcp.f32 %v1678_v32  ;;  %v4684_v32 = vmul.f32 -1.442695, %v1782_v31 }
0x10c6   :  { %v5182_v10 = vpop.eup %5181 }
0x10c7   :  { %v1685_v14 = vmul.f32 %v5182_v10, %v1478_v6 }
0x1128   :  { %v1688_v40 = vpop.permute.xlu0 %1687 }
0x1129   :  { %v1690_v34 = vmul.f32 %v5182_v10, %v1688_v40  ;;  %v1810_v40 = vpop.permute.xlu1 %1809 }
0x112b   :  { %1692 = vrot.lane.b32.xlu0 %v1690_v34, %s5609_s2 }
0x119d   :  { %v1693_v27 = vpop.permute.xlu0 %1692 }
0x119e   :  { %v6640_v22 = vadd.f32 %v1693_v27, %v1685_v14 }
0x11a0   :  { %5183 = vtanh.f32 %v6640_v22 }
0x11a1   :  { %5185 = vpow2.f32 %v4681_v12 }
0x11ad   :  { %v5184_v5 = vpop.eup %5183 }
0x11ae   :  { %1698 = vrot.lane.b32.xlu0 %v5184_v5, %s5609_s2  ;;  %v5186_v2 = vpop.eup %5185 }
0x11af   :  { %v1679_v36 = vadd.f32 1.0, %v5186_v2 }
0x11b1   :  { %5187 = vrcp.f32 %v1679_v36 }
0x11b2   :  { %5189 = vpow2.f32 %v4684_v32 }
0x11be   :  { %v5188_v8 = vpop.eup %5187 }
0x11bf   :  { %v5190_v6 = vpop.eup %5189 }
0x11c0   :  { %v1790_v10 = vadd.f32 1.0, %v5190_v6 }
0x11c2   :  { %5191 = vrcp.f32 %v1790_v10 }
0x11cf   :  { %v5192_v34 = vpop.eup %5191 }
0x11d0   :  { %v6645_v14 = vmul.f32 %v5192_v34, %v1810_v40  ;;  %v6689_v40 = vld [vmem:[%s8001_s6 + $0x38] sm:$0xff]  ;;  %v6694_v34 = vld [vmem:[%s8001_s6 + $0x30] sm:$0xff] }
0x11d1   :  { %4842 = vmatpush3.msra.mxu1 %v6689_v40 }
0x11d2   :  { %4843 = vmatprep.subr.mxu1 %v8112_v29 }
0x11d3   :  { %4844 = vmatpush3.msra.mxu1 %v6694_v34 }
0x11d4   :  { %4845 = vmatprep.subr.mxu1 %v8112_v29 }
0x1220   :  { %v1699_v13 = vpop.permute.xlu0 %1698 }
0x1221   :  { %v1701_v46 = vmul.f32 %v5188_v8, %v1699_v13 }
0x1223   :  { %1814 = vrot.lane.b32.xlu0 %v1701_v46, %s5609_s2 }
0x1295   :  { %v1815_v27 = vpop.permute.xlu0 %1814 }
0x1296   :  { %v1817_v43 = vsel %vm408_vm2, %v6645_v14, %v1815_v27  ;;  %v6701_v27 = vld [vmem:[%s8001_s6 + $0x28] sm:$0xff] }
0x1297   :  { %1883 = vmatmul.mubr.f32.vlgmr.msra.gmra.mxu0 %v1817_v43  ;;  %v6708_v43 = vld [vmem:[%s8001_s6 + $0x20] sm:$0xff]  ;;  %4846 = vmatpush3.msra.mxu1 %v6701_v27 }
0x1298   :  { %2109 = vmatpush1.msra.mxu0 %v6440_v19  ;;  %2172 = vmatprep.mubr.f32.mxu0 %v8112_v29 }
0x1299   :  { %2110 = vmatprep.subr.mxu0 %v6444_v44  ;;  %4847 = vmatprep.subr.mxu1 %v8112_v29 }
0x129a   :  { %2111 = vmatpush1.msra.mxu0 %v6447_v45  ;;  %4848 = vmatpush3.msra.mxu1 %v6708_v43 }
0x129b   :  { %2112 = vmatprep.subr.mxu0 %v6450_v47  ;;  %4849 = vmatprep.subr.mxu1 %v8112_v29 }
0x129c   :  { %2113 = vmatpush1.msra.mxu0 %v6453_v48 }
0x129d   :  { %2114 = vmatprep.subr.mxu0 %v6456_v49 }
0x129e   :  { %2115 = vmatpush1.msra.mxu0 %v6459_v50 }
0x129f   :  { %2116 = vmatprep.subr.mxu0 %v6462_v51 }
0x12a0   :  { %2117 = vmatpush1.msra.mxu0 %v6465_v52 }
0x12a1   :  { %2118 = vmatprep.subr.mxu0 %v6468_v53 }
0x12a2   :  { %2119 = vmatpush1.msra.mxu0 %v6471_v54 }
0x12a3   :  { %2120 = vmatprep.subr.mxu0 %v6474_v55 }
0x12a4   :  { %2121 = vmatpush1.msra.mxu0 %v6477_v56 }
0x12a5   :  { %2122 = vmatprep.subr.mxu0 %v6480_v57 }
0x12a6   :  { %2123 = vmatpush1.msra.mxu0 %v6483_v58 }
0x12a7   :  { %2124 = vmatprep.subr.mxu0 %v6486_v59 }
0x12a8   :  { %2125 = vmatpush1.msra.mxu0 %v6489_v60 }
0x12a9   :  { %2126 = vmatprep.subr.mxu0 %v6492_v61 }
0x12aa   :  { %2127 = vmatpush1.msra.mxu0 %v6495_v62 }
0x12ab   :  { %2128 = vmatprep.subr.mxu0 %v6498_v63 }
0x12ac   :  { %2129 = vmatpush1.msra.mxu0 %v6501_v7 }
0x12ad   :  { %2130 = vmatprep.subr.mxu0 %v6504_v9 }
0x12ae   :  { %2131 = vmatpush1.msra.mxu0 %v6507_v11 }
0x12af   :  { %2132 = vmatprep.subr.mxu0 %v6510_v20 }
0x12b0   :  { %2133 = vmatpush1.msra.mxu0 %v6513_v23 }
0x12b1   :  { %2134 = vmatprep.subr.mxu0 %v6516_v26 }
0x12b2   :  { %2135 = vmatpush1.msra.mxu0 %v8161_v41 }
0x12b3   :  { %2136 = vmatprep.subr.mxu0 %v8162_v16 }
0x12b4   :  { %2137 = vmatpush1.msra.mxu0 %v8163_v25 }
0x12b5   :  { %2138 = vmatprep.subr.mxu0 %v8164_v18 }
0x12b6   :  { %2139 = vmatpush1.msra.mxu0 %v8165_v0 }
0x12b7   :  { %2399 = vmatprep.subr.mxu0 %v6421_v42 }
0x1357   :  { %v1884_v31 = vpop.f32.mrf.mxu0 }
0x1358   :  { %v1885_v36 = vadd.f32 %v1884_v31, %v5989_v30  ;;  %v6715_v31 = vld [vmem:[%s8001_s6 + $0x18] sm:$0xff] }
0x1359   :  { %v1886_v5 = vpop.f32.mrf.mxu0  ;;  %4850 = vmatpush3.msra.mxu1 %v6715_v31 }
0x135a   :  { %v1887_v12 = vadd.f32 %v1886_v5, %v8144_v35  ;;  %v4685_v8 = vmul.f32 -1.442695, %v1885_v36  ;;  %v6722_v5 = vld [vmem:[%s8001_s6 + $0x10] sm:$0xff]  ;;  %4851 = vmatprep.subr.mxu1 %v8112_v29 }
0x135b   :  { %4852 = vmatpush3.msra.mxu1 %v6722_v5 }
0x135c   :  { %5193 = vtanh.f32 %v1887_v12  ;;  %4853 = vmatprep.subr.mxu1 %v8112_v29 }
0x135d   :  { %5195 = vpow2.f32 %v4685_v8 }
0x1369   :  { %v5194_v2 = vpop.eup %5193 }
0x136a   :  { %1904 = vrot.lane.b32.xlu1 %v5194_v2, %s5609_s2  ;;  %v5196_v13 = vpop.eup %5195  ;;  %v6729_v2 = vld [vmem:[%s8001_s6 + $0x8] sm:$0xff] }
0x136b   :  { %v1895_v46 = vadd.f32 1.0, %v5196_v13  ;;  %4854 = vmatpush3.msra.mxu1 %v6729_v2 }
0x136c   :  { %4855 = vmatprep.subr.mxu1 %v8112_v29 }
0x136d   :  { %5197 = vrcp.f32 %v1895_v46  ;;  %v6742_v46 = vld [vmem:[%s8001_s6] sm:$0xff] }
0x136e   :  { %4856 = vmatpush3.msra.mxu1 %v6742_v46 }
0x137a   :  { %v5198_v32 = vpop.eup %5197 }
0x137b   :  { %v1902_v36 = vmul.f32 %v5198_v32, %v6640_v22  ;;  %v4686_v22 = vmul.f32 -1.442695, %v1887_v12  ;;  %v8171_v12 = vld [vmem:[#allocation9_spill] sm:$0xff] }
0x13dc   :  { %v1905_v6 = vpop.permute.xlu1 %1904 }
0x13dd   :  { %v1907_v10 = vmul.f32 %v5198_v32, %v1905_v6  ;;  %v8170_v6 = vld [vmem:[#allocation12_spill] sm:$0xff] }
0x13de   :  { %2017 = vmatprep.subr.mxu1 %v8170_v6 }
0x13df   :  { %1909 = vrot.lane.b32.xlu0 %v1907_v10, %s5609_s2 }
0x1451   :  { %v1910_v8 = vpop.permute.xlu0 %1909 }
0x1452   :  { %v6736_v13 = vadd.f32 %v1910_v8, %v1902_v36 }
0x1454   :  { %8169 = vst [vmem:[#allocation11_spill] sm:$0xff] %v6736_v13  ;;  %5199 = vtanh.f32 %v6736_v13 }
0x1455   :  { %5201 = vpow2.f32 %v4686_v22 }
0x1461   :  { %v5200_v10 = vpop.eup %5199 }
0x1462   :  { %1915 = vrot.lane.b32.xlu1 %v5200_v10, %s5609_s2  ;;  %v5202_v32 = vpop.eup %5201 }
0x1463   :  { %v1896_v36 = vadd.f32 1.0, %v5202_v32 }
0x1465   :  { %5203 = vrcp.f32 %v1896_v36 }
0x1472   :  { %v5204_v8 = vpop.eup %5203 }
0x14d4   :  { %v1916_v13 = vpop.permute.xlu1 %1915 }
0x14d5   :  { %v1918_v30 = vmul.f32 %v5204_v8, %v1916_v13  ;;  %v8173_v13 = vld [vmem:[#allocation33_spill] sm:$0xff] }
0x14d7   :  { %4858 = vmatmul.mubr.msk.f32.vlgmr.msra.gmra.mxu1 %vm408_vm2, %v1918_v30 }
0x14d8   :  { %2018 = vmatpush1.msra.mxu1 %v6246_v1  ;;  %2065 = vmatprep.mubr.f32.mxu1 %v8112_v29  ;;  %v8172_v1 = vld [vmem:[#allocation10_spill] sm:$0xff] }
0x14d9   :  { %2019 = vmatprep.subr.mxu1 %v6253_v39  ;;  %v8174_v39 = vld [vmem:[#allocation34_spill] sm:$0xff] }
0x14da   :  { %2020 = vmatpush1.msra.mxu1 %v6259_v33  ;;  %v8175_v33 = vld [vmem:[#allocation35_spill] sm:$0xff] }
0x14db   :  { %2021 = vmatprep.subr.mxu1 %v6265_v37  ;;  %v8176_v37 = vld [vmem:[#allocation36_spill] sm:$0xff] }
0x14dc   :  { %2022 = vmatpush1.msra.mxu1 %v6271_v38  ;;  %v6790_v38 = vld [vmem:[%s8002_s7] ss:$0 sm:$0xff] }
0x14dd   :  { %2023 = vmatprep.subr.mxu1 %v6277_v21  ;;  %8177 = vst [vmem:[#allocation6_spill] sm:$0xff] %v6790_v38 }
0x14de   :  { %2024 = vmatpush1.msra.mxu1 %v6283_v24 }
0x14df   :  { %2025 = vmatprep.subr.mxu1 %v6289_v3 }
0x14e0   :  { %2026 = vmatpush1.msra.mxu1 %v6382_v4  ;;  %v8178_v4 = vld [vmem:[#allocation15_spill] sm:$0xff] }
0x14e1   :  { %2027 = vmatprep.subr.mxu1 %v8171_v12 }
0x14e2   :  { %2028 = vmatpush1.msra.mxu1 %v8172_v1 }
0x14e3   :  { %2029 = vmatprep.subr.mxu1 %v8173_v13 }
0x14e4   :  { %2030 = vmatpush1.msra.mxu1 %v8174_v39 }
0x14e5   :  { %2031 = vmatprep.subr.mxu1 %v8175_v33 }
0x14e6   :  { %2032 = vmatpush1.msra.mxu1 %v8176_v37 }
0x14e7   :  { %4688 = vmatmul.mubr.msk.f32.vlgmr.msra.gmra.mxu1 %vm408_vm2, %v6645_v14  ;;  %4860 = vmatprep.subr.mxu1 %v8112_v29  ;;  %v244_v14 = vadd.f32 %v8178_v4, %v8166_v15 }
0x14e8   :  { %4861 = vmatpush3.msra.mxu1 %v6689_v40  ;;  %4876 = vmatprep.mubr.msk.f32.mxu1 %vm5610_vm3, %v8112_v29 }
0x14e9   :  { %4862 = vmatprep.subr.mxu1 %v8112_v29 }
0x14ea   :  { %4863 = vmatpush3.msra.mxu1 %v6694_v34 }
0x14eb   :  { %4864 = vmatprep.subr.mxu1 %v8112_v29 }
0x14ec   :  { %4865 = vmatpush3.msra.mxu1 %v6701_v27 }
0x14ed   :  { %4866 = vmatprep.subr.mxu1 %v8112_v29 }
0x14ee   :  { %4867 = vmatpush3.msra.mxu1 %v6708_v43 }
0x14ef   :  { %4868 = vmatprep.subr.mxu1 %v8112_v29 }
0x14f0   :  { %4869 = vmatpush3.msra.mxu1 %v6715_v31 }
0x14f1   :  { %4870 = vmatprep.subr.mxu1 %v8112_v29 }
0x14f2   :  { %4871 = vmatpush3.msra.mxu1 %v6722_v5 }
0x14f3   :  { %4872 = vmatprep.subr.mxu1 %v8112_v29 }
0x14f4   :  { %4873 = vmatpush3.msra.mxu1 %v6729_v2 }
0x14f5   :  { %4874 = vmatprep.subr.mxu1 %v8112_v29 }
0x14f6   :  { %4875 = vmatpush3.msra.mxu1 %v6742_v46 }
0x14f7   :  { %2308 = vmatprep.subr.mxu1 %v8170_v6  ;;  %v8179_v6 = vld [vmem:[#allocation16_spill] sm:$0xff] }
0x14f8   :  { %v246_v22 = vadd.f32 %v8179_v6, %v8118_v28 }
0x1597   :  { %v1988_v21 = vpop.f32.mrf.mxu1 }
0x1598   :  { %v1989_v24 = vadd.f32 %v6790_v38, %v1988_v21 }
0x1599   :  { %v4859_v3 = vpop.f32.mrf.mxu1 }
0x159a   :  { %1992 = vst.msk [vmem:[%s8003_s8] sm:$0xff] %vm81_vm1, %v1989_v24 }
0x15a7   :  { %v2067_v10 = vpop.f32.mrf.mxu1 }
0x15a8   :  { %v2072_v32 = vadd.f32 %v2067_v10, %v244_v14 }
0x15a9   :  { %v2069_v36 = vpop.f32.mrf.mxu1 }
0x15aa   :  { %v2073_v8 = vadd.f32 %v2069_v36, %v246_v22  ;;  %v4689_v1 = vmul.f32 -1.442695, %v2072_v32 }
0x15ac   :  { %5205 = vtanh.f32 %v2073_v8  ;;  %v4690_v10 = vmul.f32 -1.442695, %v2073_v8  ;;  %v6917_v8 = vld [vmem:[%s7998_s3 + $0x28] sm:$0xff] }
0x15ad   :  { %5207 = vpow2.f32 %v4689_v1  ;;  %v6923_v1 = vld [vmem:[%s7998_s3 + $0x20] sm:$0xff] }
0x15b9   :  { %v5206_v12 = vpop.eup %5205 }
0x15ba   :  { %2089 = vrot.lane.b32.xlu0 %v5206_v12, %s5609_s2  ;;  %v5208_v13 = vpop.eup %5207 }
0x15bb   :  { %v2080_v39 = vadd.f32 1.0, %v5208_v13  ;;  %v6929_v13 = vld [vmem:[%s7998_s3 + $0x18] sm:$0xff] }
0x15bd   :  { %5209 = vrcp.f32 %v2080_v39  ;;  %v6935_v39 = vld [vmem:[%s7998_s3 + $0x10] sm:$0xff] }
0x15ca   :  { %v5210_v33 = vpop.eup %5209 }
0x15cb   :  { %v2087_v24 = vmul.f32 %v5210_v33, %v6632_v17 }
0x162c   :  { %v2090_v37 = vpop.permute.xlu0 %2089 }
0x162d   :  { %v2092_v21 = vmul.f32 %v5210_v33, %v2090_v37  ;;  %v6941_v33 = vld [vmem:[%s7998_s3 + $0x8] sm:$0xff]  ;;  %v6947_v37 = vld [vmem:[%s7998_s3] sm:$0xff] }
0x162f   :  { %2094 = vrot.lane.b32.xlu1 %v2092_v21, %s5609_s2  ;;  %v6973_v21 = vld [vmem:[%s7998_s3 + $0x78] sm:$0xff] }
0x1630   :  { %8182 = vst [vmem:[#allocation37_spill] sm:$0xff] %v6973_v21 }
0x1633   :  { %2104 = vrot.lane.b32.xlu1 %v1918_v30, %s5609_s2 }
0x16a1   :  { %v2095_v3 = vpop.permute.xlu1 %2094 }
0x16a2   :  { %v6805_v4 = vadd.f32 %v2095_v3, %v2087_v24 }
0x16a4   :  { %5211 = vtanh.f32 %v6805_v4 }
0x16a5   :  { %5213 = vpow2.f32 %v4690_v10  ;;  %v2105_v30 = vpop.permute.xlu1 %2104  ;;  %v8183_v10 = vld [vmem:[#allocation17_spill] sm:$0xff] }
0x16b1   :  { %v5212_v14 = vpop.eup %5211 }
0x16b2   :  { %2100 = vrot.lane.b32.xlu0 %v5212_v14, %s5609_s2  ;;  %v5214_v6 = vpop.eup %5213 }
0x16b3   :  { %v2081_v22 = vadd.f32 1.0, %v5214_v6  ;;  %v250_v6 = vadd.f32 %v8183_v10, %v8166_v15  ;;  %v7017_v10 = vld [vmem:[#allocation3 + $0xc0] sm:$0xff] }
0x16b5   :  { %5215 = vrcp.f32 %v2081_v22 }
0x16c2   :  { %v5216_v32 = vpop.eup %5215 }
0x1724   :  { %v2101_v36 = vpop.permute.xlu0 %2100 }
0x1725   :  { %v6809_v12 = vmul.f32 %v5216_v32, %v2101_v36  ;;  %v8184_v32 = vld [vmem:[#allocation18_spill] sm:$0xff] }
0x1726   :  { %v252_v36 = vadd.f32 %v8184_v32, %v8118_v28  ;;  %v7026_v32 = vld [vmem:[#allocation3 + $0xa8] sm:$0xff] }
0x1727   :  { %v2107_v17 = vsel %vm408_vm2, %v6809_v12, %v2105_v30 }
0x1728   :  { %2173 = vmatmul.mubr.f32.vlgmr.msra.gmra.mxu0 %v2107_v17 }
0x1729   :  { %2400 = vmatpush1.msra.mxu0 %v6440_v19  ;;  %2463 = vmatprep.mubr.f32.mxu0 %v8112_v29 }
0x172a   :  { %2401 = vmatprep.subr.mxu0 %v6444_v44 }
0x172b   :  { %2402 = vmatpush1.msra.mxu0 %v6447_v45 }
0x172c   :  { %2403 = vmatprep.subr.mxu0 %v6450_v47 }
0x172d   :  { %2404 = vmatpush1.msra.mxu0 %v6453_v48  ;;  %v8180_v48 = vld [vmem:[#allocation13_spill] sm:$0xff] }
0x172e   :  { %2405 = vmatprep.subr.mxu0 %v6456_v49 }
0x172f   :  { %2406 = vmatpush1.msra.mxu0 %v6459_v50 }
0x1730   :  { %2407 = vmatprep.subr.mxu0 %v6462_v51 }
0x1731   :  { %2408 = vmatpush1.msra.mxu0 %v6465_v52 }
0x1732   :  { %2409 = vmatprep.subr.mxu0 %v6468_v53 }
0x1733   :  { %2410 = vmatpush1.msra.mxu0 %v6471_v54 }
0x1734   :  { %2411 = vmatprep.subr.mxu0 %v6474_v55 }
0x1735   :  { %2412 = vmatpush1.msra.mxu0 %v6477_v56 }
0x1736   :  { %2413 = vmatprep.subr.mxu0 %v6480_v57 }
0x1737   :  { %2414 = vmatpush1.msra.mxu0 %v6483_v58 }
0x1738   :  { %2415 = vmatprep.subr.mxu0 %v6486_v59 }
0x1739   :  { %2416 = vmatpush1.msra.mxu0 %v6489_v60 }
0x173a   :  { %2417 = vmatprep.subr.mxu0 %v6492_v61 }
0x173b   :  { %2418 = vmatpush1.msra.mxu0 %v6495_v62 }
0x173c   :  { %2419 = vmatprep.subr.mxu0 %v6498_v63 }
0x173d   :  { %2420 = vmatpush1.msra.mxu0 %v6501_v7 }
0x173e   :  { %2421 = vmatprep.subr.mxu0 %v6504_v9 }
0x173f   :  { %2422 = vmatpush1.msra.mxu0 %v6507_v11  ;;  %v6862_v11 = vld [vmem:[%s7998_s3 + $0x70] sm:$0xff] }
0x1740   :  { %2423 = vmatprep.subr.mxu0 %v6510_v20  ;;  %v6869_v20 = vld [vmem:[%s7998_s3 + $0x68] sm:$0xff] }
0x1741   :  { %2424 = vmatpush1.msra.mxu0 %v6513_v23  ;;  %v6875_v23 = vld [vmem:[%s7998_s3 + $0x60] sm:$0xff] }
0x1742   :  { %2425 = vmatprep.subr.mxu0 %v6516_v26  ;;  %v6881_v26 = vld [vmem:[%s7998_s3 + $0x58] sm:$0xff] }
0x1743   :  { %2426 = vmatpush1.msra.mxu0 %v8161_v41  ;;  %v6887_v41 = vld [vmem:[%s7998_s3 + $0x50] sm:$0xff] }
0x1744   :  { %2427 = vmatprep.subr.mxu0 %v8162_v16  ;;  %v6893_v16 = vld [vmem:[%s7998_s3 + $0x48] sm:$0xff] }
0x1745   :  { %2428 = vmatpush1.msra.mxu0 %v8163_v25  ;;  %v6899_v25 = vld [vmem:[%s7998_s3 + $0x40] sm:$0xff] }
0x1746   :  { %2429 = vmatprep.subr.mxu0 %v8164_v18  ;;  %v6905_v18 = vld [vmem:[%s7998_s3 + $0x38] sm:$0xff] }
0x1747   :  { %2430 = vmatpush1.msra.mxu0 %v8165_v0  ;;  %v6911_v0 = vld [vmem:[%s7998_s3 + $0x30] sm:$0xff] }
0x1748   :  { %2690 = vmatprep.subr.mxu0 %v6421_v42  ;;  %v8181_v42 = vld [vmem:[#allocation11_spill] sm:$0xff] }
0x17e8   :  { %v2174_v19 = vpop.f32.mrf.mxu0 }
0x17e9   :  { %v2175_v49 = vadd.f32 %v2174_v19, %v8180_v48 }
0x17ea   :  { %v2176_v44 = vpop.f32.mrf.mxu0 }
0x17eb   :  { %v2177_v45 = vadd.f32 %v2176_v44, %v8144_v35  ;;  %v4691_v50 = vmul.f32 -1.442695, %v2175_v49 }
0x17ed   :  { %5217 = vtanh.f32 %v2177_v45  ;;  %v4692_v60 = vmul.f32 -1.442695, %v2177_v45 }
0x17ee   :  { %5219 = vpow2.f32 %v4691_v50 }
0x17fa   :  { %v5218_v47 = vpop.eup %5217 }
0x17fb   :  { %2194 = vrot.lane.b32.xlu0 %v5218_v47, %s5609_s2  ;;  %v5220_v51 = vpop.eup %5219 }
0x17fc   :  { %v2185_v52 = vadd.f32 1.0, %v5220_v51 }
0x17fe   :  { %5221 = vrcp.f32 %v2185_v52 }
0x180b   :  { %v5222_v53 = vpop.eup %5221 }
0x180c   :  { %v2192_v56 = vmul.f32 %v5222_v53, %v8181_v42 }
0x186d   :  { %v2195_v54 = vpop.permute.xlu0 %2194 }
0x186e   :  { %v2197_v55 = vmul.f32 %v5222_v53, %v2195_v54 }
0x1870   :  { %2199 = vrot.lane.b32.xlu1 %v2197_v55, %s5609_s2 }
0x18e2   :  { %v2200_v57 = vpop.permute.xlu1 %2199 }
0x18e3   :  { %v6851_v58 = vadd.f32 %v2200_v57, %v2192_v56 }
0x18e5   :  { %5223 = vtanh.f32 %v6851_v58 }
0x18e6   :  { %5225 = vpow2.f32 %v4692_v60 }
0x18f2   :  { %v5224_v59 = vpop.eup %5223 }
0x18f3   :  { %2205 = vrot.lane.b32.xlu0 %v5224_v59, %s5609_s2  ;;  %v5226_v61 = vpop.eup %5225 }
0x18f4   :  { %v2186_v62 = vadd.f32 1.0, %v5226_v61 }
0x18f6   :  { %5227 = vrcp.f32 %v2186_v62 }
0x1903   :  { %v5228_v63 = vpop.eup %5227 }
0x1965   :  { %v2206_v7 = vpop.permute.xlu0 %2205 }
0x1966   :  { %v6855_v9 = vmul.f32 %v5228_v63, %v2206_v7  ;;  %v6998_v63 = vld [vmem:[#allocation3 + $0xf0] sm:$0xff]  ;;  %v7002_v7 = vld [vmem:[#allocation3 + $0xe8] sm:$0xff] }
0x1968   :  { %4877 = vmatmul.mubr.msk.f32.vlgmr.msra.gmra.mxu1 %vm408_vm2, %v6855_v9 }
0x1969   :  { %2309 = vmatpush1.msra.mxu1 %v6862_v11  ;;  %2356 = vmatprep.mubr.f32.mxu1 %v8112_v29 }
0x196a   :  { %2310 = vmatprep.subr.mxu1 %v6869_v20 }
0x196b   :  { %2311 = vmatpush1.msra.mxu1 %v6875_v23 }
0x196c   :  { %2312 = vmatprep.subr.mxu1 %v6881_v26 }
0x196d   :  { %2313 = vmatpush1.msra.mxu1 %v6887_v41 }
0x196e   :  { %2314 = vmatprep.subr.mxu1 %v6893_v16 }
0x196f   :  { %2315 = vmatpush1.msra.mxu1 %v6899_v25 }
0x1970   :  { %2316 = vmatprep.subr.mxu1 %v6905_v18 }
0x1971   :  { %2317 = vmatpush1.msra.mxu1 %v6911_v0 }
0x1972   :  { %2318 = vmatprep.subr.mxu1 %v6917_v8 }
0x1973   :  { %2319 = vmatpush1.msra.mxu1 %v6923_v1 }
0x1974   :  { %2320 = vmatprep.subr.mxu1 %v6929_v13 }
0x1975   :  { %2321 = vmatpush1.msra.mxu1 %v6935_v39 }
0x1976   :  { %2322 = vmatprep.subr.mxu1 %v6941_v33 }
0x1977   :  { %2323 = vmatpush1.msra.mxu1 %v6947_v37 }
0x1978   :  { %4695 = vmatmul.mubr.msk.f32.vlgmr.msra.gmra.mxu1 %vm408_vm2, %v6809_v12  ;;  %4879 = vmatprep.subr.mxu1 %v8112_v29 }
0x1979   :  { %4880 = vmatpush3.msra.mxu1 %v6689_v40  ;;  %4895 = vmatprep.mubr.msk.f32.mxu1 %vm5610_vm3, %v8112_v29 }
0x197a   :  { %4881 = vmatprep.subr.mxu1 %v8112_v29 }
0x197b   :  { %4882 = vmatpush3.msra.mxu1 %v6694_v34 }
0x197c   :  { %4883 = vmatprep.subr.mxu1 %v8112_v29 }
0x197d   :  { %4884 = vmatpush3.msra.mxu1 %v6701_v27 }
0x197e   :  { %4885 = vmatprep.subr.mxu1 %v8112_v29 }
0x197f   :  { %4886 = vmatpush3.msra.mxu1 %v6708_v43 }
0x1980   :  { %4887 = vmatprep.subr.mxu1 %v8112_v29 }
0x1981   :  { %4888 = vmatpush3.msra.mxu1 %v6715_v31 }
0x1982   :  { %4889 = vmatprep.subr.mxu1 %v8112_v29 }
0x1983   :  { %4890 = vmatpush3.msra.mxu1 %v6722_v5 }
0x1984   :  { %4891 = vmatprep.subr.mxu1 %v8112_v29 }
0x1985   :  { %4892 = vmatpush3.msra.mxu1 %v6729_v2 }
0x1986   :  { %4893 = vmatprep.subr.mxu1 %v8112_v29 }
0x1987   :  { %4894 = vmatpush3.msra.mxu1 %v6742_v46 }
0x1988   :  { %2599 = vmatprep.subr.mxu1 %v6973_v21 }
0x1a28   :  { %v2278_v24 = vpop.f32.mrf.mxu1 }
0x1a29   :  { %v2279_v3 = vadd.f32 %v6790_v38, %v2278_v24  ;;  %v7008_v24 = vld [vmem:[#allocation3 + $0xd8] sm:$0xff] }
0x1a2a   :  { %v4878_v14 = vpop.f32.mrf.mxu1 }
0x1a2b   :  { %4694 = vst.msk [vmem:[%s8003_s8 + $0x8] sm:$0xff] %vm81_vm1, %v2279_v3  ;;  %v7011_v3 = vld [vmem:[#allocation3 + $0xd0] sm:$0xff]  ;;  %v7014_v14 = vld [vmem:[#allocation3 + $0xc8] sm:$0xff] }
0x1a38   :  { %v2358_v22 = vpop.f32.mrf.mxu1 }
0x1a39   :  { %v2363_v12 = vadd.f32 %v2358_v22, %v250_v6  ;;  %v7020_v6 = vld [vmem:[#allocation3 + $0xb8] sm:$0xff]  ;;  %v7023_v22 = vld [vmem:[#allocation3 + $0xb0] sm:$0xff] }
0x1a3a   :  { %v2360_v30 = vpop.f32.mrf.mxu1 }
0x1a3b   :  { %v2364_v17 = vadd.f32 %v2360_v30, %v252_v36  ;;  %v4696_v44 = vmul.f32 -1.442695, %v2363_v12  ;;  %v7029_v36 = vld [vmem:[#allocation3 + $0xa0] sm:$0xff]  ;;  %v7032_v12 = vld [vmem:[#allocation3 + $0x98] sm:$0xff]  ;;  %v7035_v30 = vld [vmem:[#allocation3 + $0x90] sm:$0xff] }
0x1a3d   :  { %5229 = vtanh.f32 %v2364_v17  ;;  %v4697_v42 = vmul.f32 -1.442695, %v2364_v17  ;;  %v7038_v17 = vld [vmem:[#allocation3 + $0x88] sm:$0xff] }
0x1a3e   :  { %5231 = vpow2.f32 %v4696_v44  ;;  %v7044_v44 = vld [vmem:[#allocation3 + $0x78] sm:$0xff] }
0x1a4a   :  { %v5230_v19 = vpop.eup %5229 }
0x1a4b   :  { %2380 = vrot.lane.b32.xlu1 %v5230_v19, %s5609_s2  ;;  %v5232_v45 = vpop.eup %5231  ;;  %v7041_v19 = vld [vmem:[#allocation3 + $0x80] sm:$0xff] }
0x1a4c   :  { %v2371_v47 = vadd.f32 1.0, %v5232_v45  ;;  %v7047_v45 = vld [vmem:[#allocation3 + $0x70] sm:$0xff] }
0x1a4e   :  { %5233 = vrcp.f32 %v2371_v47  ;;  %v7050_v47 = vld [vmem:[#allocation3 + $0x68] sm:$0xff] }
0x1a5b   :  { %v5234_v49 = vpop.eup %5233 }
0x1a5c   :  { %v2378_v52 = vmul.f32 %v5234_v49, %v6805_v4 }
0x1abd   :  { %v2381_v50 = vpop.permute.xlu1 %2380 }
0x1abe   :  { %v2383_v51 = vmul.f32 %v5234_v49, %v2381_v50  ;;  %v7053_v49 = vld [vmem:[#allocation3 + $0x60] sm:$0xff]  ;;  %v7056_v50 = vld [vmem:[#allocation3 + $0x58] sm:$0xff] }
0x1abf   :  { %8185 = vst [vmem:[#allocation38_spill] sm:$0xff] %v7053_v49  ;;  %8186 = vst [vmem:[#allocation39_spill] sm:$0xff] %v7056_v50 }
0x1ac0   :  { %2385 = vrot.lane.b32.xlu0 %v2383_v51, %s5609_s2  ;;  %v7059_v51 = vld [vmem:[#allocation3 + $0x50] sm:$0xff] }
0x1ac1   :  { %8187 = vst [vmem:[#allocation40_spill] sm:$0xff] %v7059_v51 }
0x1ac4   :  { %2395 = vrot.lane.b32.xlu0 %v6855_v9, %s5609_s2  ;;  %v7005_v9 = vld [vmem:[#allocation3 + $0xe0] sm:$0xff] }
0x1b32   :  { %v2386_v53 = vpop.permute.xlu0 %2385 }
0x1b33   :  { %v6990_v54 = vadd.f32 %v2386_v53, %v2378_v52  ;;  %v7062_v52 = vld [vmem:[#allocation3 + $0x48] sm:$0xff]  ;;  %v7065_v53 = vld [vmem:[#allocation3 + $0x40] sm:$0xff] }
0x1b34   :  { %8188 = vst [vmem:[#allocation41_spill] sm:$0xff] %v7062_v52  ;;  %8189 = vst [vmem:[#allocation7_spill] sm:$0xff] %v7065_v53 }
0x1b35   :  { %5235 = vtanh.f32 %v6990_v54 }
0x1b36   :  { %5237 = vpow2.f32 %v4697_v42  ;;  %v2396_v62 = vpop.permute.xlu0 %2395  ;;  %v7071_v42 = vld [vmem:[#allocation3 + $0x30] sm:$0xff] }
0x1b37   :  { %8191 = vst [vmem:[#allocation14_spill] sm:$0xff] %v7071_v42 }
0x1b42   :  { %v5236_v55 = vpop.eup %5235 }
0x1b43   :  { %2391 = vrot.lane.b32.xlu1 %v5236_v55, %s5609_s2  ;;  %v5238_v56 = vpop.eup %5237  ;;  %v7068_v55 = vld [vmem:[#allocation3 + $0x38] sm:$0xff] }
0x1b44   :  { %v2372_v57 = vadd.f32 1.0, %v5238_v56  ;;  %8190 = vst [vmem:[#allocation8_spill] sm:$0xff] %v7068_v55  ;;  %v7074_v56 = vld [vmem:[#allocation3 + $0x28] sm:$0xff] }
0x1b45   :  { %8192 = vst [vmem:[#allocation12_spill] sm:$0xff] %v7074_v56 }
0x1b46   :  { %5239 = vrcp.f32 %v2372_v57  ;;  %v7077_v57 = vld [vmem:[#allocation3 + $0x20] sm:$0xff] }
0x1b47   :  { %8193 = vst [vmem:[#allocation9_spill] sm:$0xff] %v7077_v57 }
0x1b53   :  { %v5240_v59 = vpop.eup %5239 }
0x1bb5   :  { %v2392_v60 = vpop.permute.xlu1 %2391 }
0x1bb6   :  { %v6994_v61 = vmul.f32 %v5240_v59, %v2392_v60  ;;  %v7080_v59 = vld [vmem:[#allocation3 + $0x18] sm:$0xff]  ;;  %v7083_v60 = vld [vmem:[#allocation3 + $0x10] sm:$0xff] }
0x1bb7   :  { %8194 = vst [vmem:[#allocation10_spill] sm:$0xff] %v7080_v59  ;;  %8195 = vst [vmem:[#allocation33_spill] sm:$0xff] %v7083_v60 }
0x1bb8   :  { %v2398_v4 = vsel %vm408_vm2, %v6994_v61, %v2396_v62  ;;  %v7086_v62 = vld [vmem:[#allocation3 + $0x8] sm:$0xff] }
0x1bb9   :  { %2464 = vmatmul.mubr.f32.vlgmr.msra.gmra.mxu0 %v2398_v4  ;;  %8196 = vst [vmem:[#allocation34_spill] sm:$0xff] %v7086_v62  ;;  %v7089_v4 = vld [vmem:[#allocation3] sm:$0xff] }
0x1bba   :  { %2691 = vmatpush1.msra.mxu0 %v6998_v63  ;;  %2754 = vmatprep.mubr.f32.mxu0 %v8112_v29  ;;  %8197 = vst [vmem:[#allocation35_spill] sm:$0xff] %v7089_v4 }
0x1bbb   :  { %2692 = vmatprep.subr.mxu0 %v7002_v7 }
0x1bbc   :  { %2693 = vmatpush1.msra.mxu0 %v7005_v9 }
0x1bbd   :  { %2694 = vmatprep.subr.mxu0 %v7008_v24 }
0x1bbe   :  { %2695 = vmatpush1.msra.mxu0 %v7011_v3 }
0x1bbf   :  { %2696 = vmatprep.subr.mxu0 %v7014_v14 }
0x1bc0   :  { %2697 = vmatpush1.msra.mxu0 %v7017_v10 }
0x1bc1   :  { %2698 = vmatprep.subr.mxu0 %v7020_v6 }
0x1bc2   :  { %2699 = vmatpush1.msra.mxu0 %v7023_v22 }
0x1bc3   :  { %2700 = vmatprep.subr.mxu0 %v7026_v32 }
0x1bc4   :  { %2701 = vmatpush1.msra.mxu0 %v7029_v36 }
0x1bc5   :  { %2702 = vmatprep.subr.mxu0 %v7032_v12 }
0x1bc6   :  { %2703 = vmatpush1.msra.mxu0 %v7035_v30 }
0x1bc7   :  { %2704 = vmatprep.subr.mxu0 %v7038_v17 }
0x1bc8   :  { %2705 = vmatpush1.msra.mxu0 %v7041_v19 }
0x1bc9   :  { %2706 = vmatprep.subr.mxu0 %v7044_v44 }
0x1bca   :  { %2707 = vmatpush1.msra.mxu0 %v7047_v45 }
0x1bcb   :  { %2708 = vmatprep.subr.mxu0 %v7050_v47 }
0x1bcc   :  { %2709 = vmatpush1.msra.mxu0 %v7053_v49 }
0x1bcd   :  { %2710 = vmatprep.subr.mxu0 %v7056_v50 }
0x1bce   :  { %2711 = vmatpush1.msra.mxu0 %v7059_v51 }
0x1bcf   :  { %2712 = vmatprep.subr.mxu0 %v7062_v52 }
0x1bd0   :  { %2713 = vmatpush1.msra.mxu0 %v7065_v53 }
0x1bd1   :  { %2714 = vmatprep.subr.mxu0 %v7068_v55 }
0x1bd2   :  { %2715 = vmatpush1.msra.mxu0 %v7071_v42 }
0x1bd3   :  { %2716 = vmatprep.subr.mxu0 %v7074_v56  ;;  %v7092_v56 = vld [vmem:[#allocation3 + $0xf8] sm:$0xff] }
0x1bd4   :  { %2717 = vmatpush1.msra.mxu0 %v7077_v57  ;;  %8198 = vst [vmem:[#allocation36_spill] sm:$0xff] %v7092_v56 }
0x1bd5   :  { %2718 = vmatprep.subr.mxu0 %v7080_v59 }
0x1bd6   :  { %2719 = vmatpush1.msra.mxu0 %v7083_v60 }
0x1bd7   :  { %2720 = vmatprep.subr.mxu0 %v7086_v62 }
0x1bd8   :  { %2721 = vmatpush1.msra.mxu0 %v7089_v4 }
0x1bd9   :  { %2981 = vmatprep.subr.mxu0 %v7092_v56 }
0x1c79   :  { %v2465_v57 = vpop.f32.mrf.mxu0 }
0x1c7a   :  { %v2466_v60 = vadd.f32 %v2465_v57, %v8180_v48 }
0x1c7b   :  { %v2467_v42 = vpop.f32.mrf.mxu0 }
0x1c7c   :  { %v2468_v59 = vadd.f32 %v2467_v42, %v8144_v35  ;;  %v4698_v53 = vmul.f32 -1.442695, %v2466_v60 }
0x1c7e   :  { %5241 = vtanh.f32 %v2468_v59  ;;  %v4699_v57 = vmul.f32 -1.442695, %v2468_v59 }
0x1c7f   :  { %5243 = vpow2.f32 %v4698_v53 }
0x1c8b   :  { %v5242_v55 = vpop.eup %5241 }
0x1c8c   :  { %2485 = vrot.lane.b32.xlu1 %v5242_v55, %s5609_s2  ;;  %v5244_v62 = vpop.eup %5243 }
0x1c8d   :  { %v2476_v52 = vadd.f32 1.0, %v5244_v62 }
0x1c8f   :  { %5245 = vrcp.f32 %v2476_v52 }
0x1c9c   :  { %v5246_v4 = vpop.eup %5245 }
0x1c9d   :  { %v2483_v56 = vmul.f32 %v5246_v4, %v6851_v58 }
0x1cfe   :  { %v2486_v51 = vpop.permute.xlu1 %2485 }
0x1cff   :  { %v2488_v50 = vmul.f32 %v5246_v4, %v2486_v51  ;;  %v8200_v4 = vld [vmem:[#allocation20_spill] sm:$0xff] }
0x1d01   :  { %2490 = vrot.lane.b32.xlu0 %v2488_v50, %s5609_s2  ;;  %v8199_v50 = vld [vmem:[#allocation19_spill] sm:$0xff] }
0x1d73   :  { %v2491_v49 = vpop.permute.xlu0 %2490 }
0x1d74   :  { %v7100_v42 = vadd.f32 %v2491_v49, %v2483_v56  ;;  %v256_v56 = vadd.f32 %v8199_v50, %v8166_v15 }
0x1d76   :  { %5247 = vtanh.f32 %v7100_v42 }
0x1d77   :  { %5249 = vpow2.f32 %v4699_v57 }
0x1d83   :  { %v5248_v55 = vpop.eup %5247 }
0x1d84   :  { %2496 = vrot.lane.b32.xlu1 %v5248_v55, %s5609_s2  ;;  %v5250_v53 = vpop.eup %5249  ;;  %v258_v55 = vadd.f32 %v8200_v4, %v8118_v28 }
0x1d85   :  { %v2477_v60 = vadd.f32 1.0, %v5250_v53 }
0x1d87   :  { %5251 = vrcp.f32 %v2477_v60 }
0x1d94   :  { %v5252_v52 = vpop.eup %5251 }
0x1df6   :  { %v2497_v62 = vpop.permute.xlu1 %2496 }
0x1df7   :  { %v2499_v51 = vmul.f32 %v5252_v52, %v2497_v62 }
0x1df9   :  { %4896 = vmatmul.mubr.msk.f32.vlgmr.msra.gmra.mxu1 %vm408_vm2, %v2499_v51 }
0x1dfa   :  { %2600 = vmatpush1.msra.mxu1 %v6862_v11  ;;  %2647 = vmatprep.mubr.f32.mxu1 %v8112_v29 }
0x1dfb   :  { %2601 = vmatprep.subr.mxu1 %v6869_v20 }
0x1dfc   :  { %2602 = vmatpush1.msra.mxu1 %v6875_v23 }
0x1dfd   :  { %2603 = vmatprep.subr.mxu1 %v6881_v26 }
0x1dfe   :  { %2604 = vmatpush1.msra.mxu1 %v6887_v41 }
0x1dff   :  { %2605 = vmatprep.subr.mxu1 %v6893_v16 }
0x1e00   :  { %2606 = vmatpush1.msra.mxu1 %v6899_v25 }
0x1e01   :  { %2607 = vmatprep.subr.mxu1 %v6905_v18 }
0x1e02   :  { %2608 = vmatpush1.msra.mxu1 %v6911_v0 }
0x1e03   :  { %2609 = vmatprep.subr.mxu1 %v6917_v8 }
0x1e04   :  { %2610 = vmatpush1.msra.mxu1 %v6923_v1 }
0x1e05   :  { %2611 = vmatprep.subr.mxu1 %v6929_v13 }
0x1e06   :  { %2612 = vmatpush1.msra.mxu1 %v6935_v39 }
0x1e07   :  { %2613 = vmatprep.subr.mxu1 %v6941_v33 }
0x1e08   :  { %2614 = vmatpush1.msra.mxu1 %v6947_v37 }
0x1e09   :  { %4702 = vmatmul.mubr.msk.f32.vlgmr.msra.gmra.mxu1 %vm408_vm2, %v6994_v61  ;;  %4898 = vmatprep.subr.mxu1 %v8112_v29 }
0x1e0a   :  { %4899 = vmatpush3.msra.mxu1 %v6689_v40  ;;  %4914 = vmatprep.mubr.msk.f32.mxu1 %vm5610_vm3, %v8112_v29 }
0x1e0b   :  { %4900 = vmatprep.subr.mxu1 %v8112_v29 }
0x1e0c   :  { %4901 = vmatpush3.msra.mxu1 %v6694_v34 }
0x1e0d   :  { %4902 = vmatprep.subr.mxu1 %v8112_v29 }
0x1e0e   :  { %4903 = vmatpush3.msra.mxu1 %v6701_v27 }
0x1e0f   :  { %4904 = vmatprep.subr.mxu1 %v8112_v29 }
0x1e10   :  { %4905 = vmatpush3.msra.mxu1 %v6708_v43 }
0x1e11   :  { %4906 = vmatprep.subr.mxu1 %v8112_v29 }
0x1e12   :  { %4907 = vmatpush3.msra.mxu1 %v6715_v31 }
0x1e13   :  { %4908 = vmatprep.subr.mxu1 %v8112_v29 }
0x1e14   :  { %4909 = vmatpush3.msra.mxu1 %v6722_v5 }
0x1e15   :  { %4910 = vmatprep.subr.mxu1 %v8112_v29 }
0x1e16   :  { %4911 = vmatpush3.msra.mxu1 %v6729_v2 }
0x1e17   :  { %4912 = vmatprep.subr.mxu1 %v8112_v29 }
0x1e18   :  { %4913 = vmatpush3.msra.mxu1 %v6742_v46 }
0x1e19   :  { %2890 = vmatprep.subr.mxu1 %v6973_v21 }
0x1eb9   :  { %v2569_v58 = vpop.f32.mrf.mxu1 }
0x1eba   :  { %v2570_v61 = vadd.f32 %v6790_v38, %v2569_v58 }
0x1ebb   :  { %v4897_v49 = vpop.f32.mrf.mxu1 }
0x1ebc   :  { %4701 = vst.msk [vmem:[%s8003_s8 + $0x10] sm:$0xff] %vm81_vm1, %v2570_v61 }
0x1ec9   :  { %v2649_v59 = vpop.f32.mrf.mxu1 }
0x1eca   :  { %v2654_v57 = vadd.f32 %v2649_v59, %v256_v56 }
0x1ecb   :  { %v2651_v53 = vpop.f32.mrf.mxu1 }
0x1ecc   :  { %v2655_v60 = vadd.f32 %v2651_v53, %v258_v55  ;;  %v4703_v62 = vmul.f32 -1.442695, %v2654_v57 }
0x1ece   :  { %5253 = vtanh.f32 %v2655_v60  ;;  %v4704_v55 = vmul.f32 -1.442695, %v2655_v60  ;;  %v8201_v60 = vld [vmem:[#allocation38_spill] sm:$0xff] }
0x1ecf   :  { %5255 = vpow2.f32 %v4703_v62  ;;  %v8202_v62 = vld [vmem:[#allocation39_spill] sm:$0xff] }
0x1edb   :  { %v5254_v52 = vpop.eup %5253 }
0x1edc   :  { %2671 = vrot.lane.b32.xlu0 %v5254_v52, %s5609_s2  ;;  %v5256_v58 = vpop.eup %5255 }
0x1edd   :  { %v2662_v49 = vadd.f32 1.0, %v5256_v58  ;;  %v8203_v58 = vld [vmem:[#allocation40_spill] sm:$0xff] }
0x1edf   :  { %5257 = vrcp.f32 %v2662_v49  ;;  %v8204_v49 = vld [vmem:[#allocation41_spill] sm:$0xff] }
0x1eec   :  { %v5258_v61 = vpop.eup %5257 }
0x1eed   :  { %v2669_v50 = vmul.f32 %v5258_v61, %v6990_v54 }
0x1f4e   :  { %v2672_v38 = vpop.permute.xlu0 %2671 }
0x1f4f   :  { %v2674_v21 = vmul.f32 %v5258_v61, %v2672_v38  ;;  %v8205_v61 = vld [vmem:[#allocation7_spill] sm:$0xff] }
0x1f51   :  { %2676 = vrot.lane.b32.xlu1 %v2674_v21, %s5609_s2 }
0x1f55   :  { %2686 = vrot.lane.b32.xlu1 %v2499_v51, %s5609_s2 }
0x1fc3   :  { %v2677_v56 = vpop.permute.xlu1 %2676 }
0x1fc4   :  { %v7155_v59 = vadd.f32 %v2677_v56, %v2669_v50  ;;  %v8206_v50 = vld [vmem:[#allocation8_spill] sm:$0xff]  ;;  %v8207_v56 = vld [vmem:[#allocation14_spill] sm:$0xff] }
0x1fc6   :  { %5259 = vtanh.f32 %v7155_v59 }
0x1fc7   :  { %5261 = vpow2.f32 %v4704_v55  ;;  %v2687_v51 = vpop.permute.xlu1 %2686  ;;  %v8209_v55 = vld [vmem:[#allocation9_spill] sm:$0xff] }
0x1fd3   :  { %v5260_v4 = vpop.eup %5259 }
0x1fd4   :  { %2682 = vrot.lane.b32.xlu0 %v5260_v4, %s5609_s2  ;;  %v5262_v57 = vpop.eup %5261  ;;  %v8208_v4 = vld [vmem:[#allocation12_spill] sm:$0xff] }
0x1fd5   :  { %v2663_v53 = vadd.f32 1.0, %v5262_v57  ;;  %v8210_v57 = vld [vmem:[#allocation10_spill] sm:$0xff] }
0x1fd7   :  { %5263 = vrcp.f32 %v2663_v53  ;;  %v8211_v53 = vld [vmem:[#allocation33_spill] sm:$0xff] }
0x1fe4   :  { %v5264_v38 = vpop.eup %5263 }
0x2046   :  { %v2683_v52 = vpop.permute.xlu0 %2682 }
0x2047   :  { %v7159_v21 = vmul.f32 %v5264_v38, %v2683_v52  ;;  %v8212_v38 = vld [vmem:[#allocation34_spill] sm:$0xff]  ;;  %v8213_v52 = vld [vmem:[#allocation35_spill] sm:$0xff] }
0x2049   :  { %v2689_v54 = vsel %vm408_vm2, %v7159_v21, %v2687_v51  ;;  %v8214_v51 = vld [vmem:[#allocation36_spill] sm:$0xff] }
0x204a   :  { %2755 = vmatmul.mubr.f32.vlgmr.msra.gmra.mxu0 %v2689_v54 }
0x204b   :  { %2982 = vmatpush1.msra.mxu0 %v6998_v63  ;;  %3045 = vmatprep.mubr.f32.mxu0 %v8112_v29 }
0x204c   :  { %2983 = vmatprep.subr.mxu0 %v7002_v7 }
0x204d   :  { %2984 = vmatpush1.msra.mxu0 %v7005_v9 }
0x204e   :  { %2985 = vmatprep.subr.mxu0 %v7008_v24 }
0x204f   :  { %2986 = vmatpush1.msra.mxu0 %v7011_v3 }
0x2050   :  { %2987 = vmatprep.subr.mxu0 %v7014_v14 }
0x2051   :  { %2988 = vmatpush1.msra.mxu0 %v7017_v10 }
0x2052   :  { %2989 = vmatprep.subr.mxu0 %v7020_v6 }
0x2053   :  { %2990 = vmatpush1.msra.mxu0 %v7023_v22 }
0x2054   :  { %2991 = vmatprep.subr.mxu0 %v7026_v32 }
0x2055   :  { %2992 = vmatpush1.msra.mxu0 %v7029_v36 }
0x2056   :  { %2993 = vmatprep.subr.mxu0 %v7032_v12 }
0x2057   :  { %2994 = vmatpush1.msra.mxu0 %v7035_v30 }
0x2058   :  { %2995 = vmatprep.subr.mxu0 %v7038_v17 }
0x2059   :  { %2996 = vmatpush1.msra.mxu0 %v7041_v19 }
0x205a   :  { %2997 = vmatprep.subr.mxu0 %v7044_v44 }
0x205b   :  { %2998 = vmatpush1.msra.mxu0 %v7047_v45 }
0x205c   :  { %2999 = vmatprep.subr.mxu0 %v7050_v47 }
0x205d   :  { %3000 = vmatpush1.msra.mxu0 %v8201_v60 }
0x205e   :  { %3001 = vmatprep.subr.mxu0 %v8202_v62 }
0x205f   :  { %3002 = vmatpush1.msra.mxu0 %v8203_v58 }
0x2060   :  { %3003 = vmatprep.subr.mxu0 %v8204_v49 }
0x2061   :  { %3004 = vmatpush1.msra.mxu0 %v8205_v61 }
0x2062   :  { %3005 = vmatprep.subr.mxu0 %v8206_v50 }
0x2063   :  { %3006 = vmatpush1.msra.mxu0 %v8207_v56 }
0x2064   :  { %3007 = vmatprep.subr.mxu0 %v8208_v4 }
0x2065   :  { %3008 = vmatpush1.msra.mxu0 %v8209_v55 }
0x2066   :  { %3009 = vmatprep.subr.mxu0 %v8210_v57 }
0x2067   :  { %3010 = vmatpush1.msra.mxu0 %v8211_v53 }
0x2068   :  { %3011 = vmatprep.subr.mxu0 %v8212_v38 }
0x2069   :  { %3012 = vmatpush1.msra.mxu0 %v8213_v52 }
0x206a   :  { %3272 = vmatprep.subr.mxu0 %v8214_v51 }
0x210a   :  { %v2756_v54 = vpop.f32.mrf.mxu0 }
0x210b   :  { %v2757_v55 = vadd.f32 %v2756_v54, %v8180_v48 }
0x210c   :  { %v2758_v61 = vpop.f32.mrf.mxu0 }
0x210d   :  { %v2759_v50 = vadd.f32 %v2758_v61, %v8144_v35  ;;  %v4705_v4 = vmul.f32 -1.442695, %v2757_v55 }
0x210f   :  { %5265 = vtanh.f32 %v2759_v50  ;;  %v4706_v55 = vmul.f32 -1.442695, %v2759_v50 }
0x2110   :  { %5267 = vpow2.f32 %v4705_v4 }
0x211c   :  { %v5266_v56 = vpop.eup %5265 }
0x211d   :  { %2776 = vrot.lane.b32.xlu0 %v5266_v56, %s5609_s2  ;;  %v5268_v57 = vpop.eup %5267 }
0x211e   :  { %v2767_v53 = vadd.f32 1.0, %v5268_v57 }
0x2120   :  { %5269 = vrcp.f32 %v2767_v53 }
0x212d   :  { %v5270_v38 = vpop.eup %5269 }
0x212e   :  { %v2774_v51 = vmul.f32 %v5270_v38, %v7100_v42 }
0x218f   :  { %v2777_v49 = vpop.permute.xlu0 %2776 }
0x2190   :  { %v2779_v52 = vmul.f32 %v5270_v38, %v2777_v49 }
0x2192   :  { %2781 = vrot.lane.b32.xlu1 %v2779_v52, %s5609_s2 }
0x2204   :  { %v2782_v58 = vpop.permute.xlu1 %2781 }
0x2205   :  { %v7201_v61 = vadd.f32 %v2782_v58, %v2774_v51 }
0x2207   :  { %5271 = vtanh.f32 %v7201_v61 }
0x2208   :  { %5273 = vpow2.f32 %v4706_v55 }
0x2214   :  { %v5272_v56 = vpop.eup %5271 }
0x2215   :  { %2787 = vrot.lane.b32.xlu0 %v5272_v56, %s5609_s2  ;;  %v5274_v4 = vpop.eup %5273 }
0x2216   :  { %v2768_v57 = vadd.f32 1.0, %v5274_v4 }
0x2218   :  { %5275 = vrcp.f32 %v2768_v57 }
0x2225   :  { %v5276_v53 = vpop.eup %5275 }
0x2287   :  { %v2788_v54 = vpop.permute.xlu0 %2787 }
0x2288   :  { %v2790_v49 = vmul.f32 %v5276_v53, %v2788_v54 }
0x228a   :  { %4915 = vmatmul.mubr.msk.f32.vlgmr.msra.gmra.mxu1 %vm408_vm2, %v2790_v49 }
0x228b   :  { %2891 = vmatpush1.msra.mxu1 %v6862_v11  ;;  %2938 = vmatprep.mubr.f32.mxu1 %v8112_v29 }
0x228c   :  { %2892 = vmatprep.subr.mxu1 %v6869_v20 }
0x228d   :  { %2893 = vmatpush1.msra.mxu1 %v6875_v23 }
0x228e   :  { %2894 = vmatprep.subr.mxu1 %v6881_v26 }
0x228f   :  { %2895 = vmatpush1.msra.mxu1 %v6887_v41 }
0x2290   :  { %2896 = vmatprep.subr.mxu1 %v6893_v16 }
0x2291   :  { %2897 = vmatpush1.msra.mxu1 %v6899_v25 }
0x2292   :  { %2898 = vmatprep.subr.mxu1 %v6905_v18 }
0x2293   :  { %2899 = vmatpush1.msra.mxu1 %v6911_v0 }
0x2294   :  { %2900 = vmatprep.subr.mxu1 %v6917_v8 }
0x2295   :  { %2901 = vmatpush1.msra.mxu1 %v6923_v1 }
0x2296   :  { %2902 = vmatprep.subr.mxu1 %v6929_v13 }
0x2297   :  { %2903 = vmatpush1.msra.mxu1 %v6935_v39 }
0x2298   :  { %2904 = vmatprep.subr.mxu1 %v6941_v33 }
0x2299   :  { %2905 = vmatpush1.msra.mxu1 %v6947_v37 }
0x229a   :  { %4709 = vmatmul.mubr.msk.f32.vlgmr.msra.gmra.mxu1 %vm408_vm2, %v7159_v21  ;;  %4917 = vmatprep.subr.mxu1 %v8112_v29 }
0x229b   :  { %4918 = vmatpush3.msra.mxu1 %v6689_v40  ;;  %4933 = vmatprep.mubr.msk.f32.mxu1 %vm5610_vm3, %v8112_v29  ;;  %v8215_v40 = vld [vmem:[#allocation37_spill] sm:$0xff] }
0x229c   :  { %4919 = vmatprep.subr.mxu1 %v8112_v29 }
0x229d   :  { %4920 = vmatpush3.msra.mxu1 %v6694_v34 }
0x229e   :  { %4921 = vmatprep.subr.mxu1 %v8112_v29 }
0x229f   :  { %4922 = vmatpush3.msra.mxu1 %v6701_v27  ;;  %v8216_v27 = vld [vmem:[#allocation6_spill] sm:$0xff] }
0x22a0   :  { %4923 = vmatprep.subr.mxu1 %v8112_v29 }
0x22a1   :  { %4924 = vmatpush3.msra.mxu1 %v6708_v43 }
0x22a2   :  { %4925 = vmatprep.subr.mxu1 %v8112_v29 }
0x22a3   :  { %4926 = vmatpush3.msra.mxu1 %v6715_v31  ;;  %v8217_v31 = vld [vmem:[#allocation21_spill] sm:$0xff] }
0x22a4   :  { %4927 = vmatprep.subr.mxu1 %v8112_v29 }
0x22a5   :  { %4928 = vmatpush3.msra.mxu1 %v6722_v5  ;;  %v262_v5 = vadd.f32 %v8217_v31, %v8166_v15 }
0x22a6   :  { %4929 = vmatprep.subr.mxu1 %v8112_v29 }
0x22a7   :  { %4930 = vmatpush3.msra.mxu1 %v6729_v2  ;;  %v8218_v2 = vld [vmem:[#allocation22_spill] sm:$0xff] }
0x22a8   :  { %4931 = vmatprep.subr.mxu1 %v8112_v29  ;;  %v264_v58 = vadd.f32 %v8218_v2, %v8118_v28 }
0x22a9   :  { %4932 = vmatpush3.msra.mxu1 %v6742_v46 }
0x22aa   :  { %3181 = vmatprep.subr.mxu1 %v8215_v40 }
0x234a   :  { %v2860_v34 = vpop.f32.mrf.mxu1 }
0x234b   :  { %v2861_v43 = vadd.f32 %v8216_v27, %v2860_v34 }
0x234c   :  { %v4916_v42 = vpop.f32.mrf.mxu1 }
0x234d   :  { %4708 = vst.msk [vmem:[%s8003_s8 + $0x18] sm:$0xff] %vm81_vm1, %v2861_v43 }
0x235a   :  { %v2940_v21 = vpop.f32.mrf.mxu1 }
0x235b   :  { %v2945_v50 = vadd.f32 %v2940_v21, %v262_v5 }
0x235c   :  { %v2942_v46 = vpop.f32.mrf.mxu1 }
0x235d   :  { %v2946_v38 = vadd.f32 %v2942_v46, %v264_v58  ;;  %v4710_v51 = vmul.f32 -1.442695, %v2945_v50  ;;  %v8219_v50 = vld [vmem:[#allocation40_spill] sm:$0xff]  ;;  %v8220_v46 = vld [vmem:[#allocation41_spill] sm:$0xff] }
0x235f   :  { %5277 = vtanh.f32 %v2946_v38  ;;  %v4711_v42 = vmul.f32 -1.442695, %v2946_v38  ;;  %v8221_v38 = vld [vmem:[#allocation7_spill] sm:$0xff] }
0x2360   :  { %5279 = vpow2.f32 %v4710_v51  ;;  %v8223_v51 = vld [vmem:[#allocation14_spill] sm:$0xff] }
0x236c   :  { %v5278_v52 = vpop.eup %5277 }
0x236d   :  { %2962 = vrot.lane.b32.xlu1 %v5278_v52, %s5609_s2  ;;  %v5280_v56 = vpop.eup %5279  ;;  %v8222_v52 = vld [vmem:[#allocation8_spill] sm:$0xff] }
0x236e   :  { %v2953_v55 = vadd.f32 1.0, %v5280_v56  ;;  %v8224_v56 = vld [vmem:[#allocation12_spill] sm:$0xff] }
0x2370   :  { %5281 = vrcp.f32 %v2953_v55  ;;  %v8225_v55 = vld [vmem:[#allocation9_spill] sm:$0xff] }
0x237d   :  { %v5282_v4 = vpop.eup %5281 }
0x237e   :  { %v2960_v54 = vmul.f32 %v5282_v4, %v7155_v59 }
0x23df   :  { %v2963_v57 = vpop.permute.xlu1 %2962 }
0x23e0   :  { %v2965_v53 = vmul.f32 %v5282_v4, %v2963_v57  ;;  %v8226_v4 = vld [vmem:[#allocation10_spill] sm:$0xff]  ;;  %v8227_v57 = vld [vmem:[#allocation33_spill] sm:$0xff] }
0x23e2   :  { %2967 = vrot.lane.b32.xlu0 %v2965_v53, %s5609_s2  ;;  %v8228_v53 = vld [vmem:[#allocation34_spill] sm:$0xff] }
0x23e6   :  { %2977 = vrot.lane.b32.xlu0 %v2790_v49, %s5609_s2 }
0x2454   :  { %v2968_v34 = vpop.permute.xlu0 %2967 }
0x2455   :  { %v7256_v27 = vadd.f32 %v2968_v34, %v2960_v54  ;;  %v8229_v54 = vld [vmem:[#allocation35_spill] sm:$0xff]  ;;  %v8230_v34 = vld [vmem:[#allocation36_spill] sm:$0xff] }
0x2457   :  { %5283 = vtanh.f32 %v7256_v27 }
0x2458   :  { %5285 = vpow2.f32 %v4711_v42  ;;  %v2978_v49 = vpop.permute.xlu0 %2977 }
0x2464   :  { %v5284_v43 = vpop.eup %5283 }
0x2465   :  { %2973 = vrot.lane.b32.xlu1 %v5284_v43, %s5609_s2  ;;  %v5286_v31 = vpop.eup %5285 }
0x2466   :  { %v2954_v5 = vadd.f32 1.0, %v5286_v31 }
0x2468   :  { %5287 = vrcp.f32 %v2954_v5 }
0x2475   :  { %v5288_v21 = vpop.eup %5287 }
0x24d7   :  { %v2974_v2 = vpop.permute.xlu1 %2973 }
0x24d8   :  { %v7260_v58 = vmul.f32 %v5288_v21, %v2974_v2 }
0x24da   :  { %v2980_v59 = vsel %vm408_vm2, %v7260_v58, %v2978_v49 }
0x24db   :  { %3046 = vmatmul.mubr.f32.vlgmr.msra.gmra.mxu0 %v2980_v59 }
0x24dc   :  { %3273 = vmatpush1.msra.mxu0 %v6998_v63  ;;  %3336 = vmatprep.mubr.f32.mxu0 %v8112_v29 }
0x24dd   :  { %3274 = vmatprep.subr.mxu0 %v7002_v7 }
0x24de   :  { %3275 = vmatpush1.msra.mxu0 %v7005_v9 }
0x24df   :  { %3276 = vmatprep.subr.mxu0 %v7008_v24 }
0x24e0   :  { %3277 = vmatpush1.msra.mxu0 %v7011_v3 }
0x24e1   :  { %3278 = vmatprep.subr.mxu0 %v7014_v14 }
0x24e2   :  { %3279 = vmatpush1.msra.mxu0 %v7017_v10 }
0x24e3   :  { %3280 = vmatprep.subr.mxu0 %v7020_v6 }
0x24e4   :  { %3281 = vmatpush1.msra.mxu0 %v7023_v22 }
0x24e5   :  { %3282 = vmatprep.subr.mxu0 %v7026_v32 }
0x24e6   :  { %3283 = vmatpush1.msra.mxu0 %v7029_v36 }
0x24e7   :  { %3284 = vmatprep.subr.mxu0 %v7032_v12 }
0x24e8   :  { %3285 = vmatpush1.msra.mxu0 %v7035_v30 }
0x24e9   :  { %3286 = vmatprep.subr.mxu0 %v7038_v17 }
0x24ea   :  { %3287 = vmatpush1.msra.mxu0 %v7041_v19 }
0x24eb   :  { %3288 = vmatprep.subr.mxu0 %v7044_v44 }
0x24ec   :  { %3289 = vmatpush1.msra.mxu0 %v7047_v45 }
0x24ed   :  { %3290 = vmatprep.subr.mxu0 %v7050_v47 }
0x24ee   :  { %3291 = vmatpush1.msra.mxu0 %v8201_v60 }
0x24ef   :  { %3292 = vmatprep.subr.mxu0 %v8202_v62 }
0x24f0   :  { %3293 = vmatpush1.msra.mxu0 %v8219_v50 }
0x24f1   :  { %3294 = vmatprep.subr.mxu0 %v8220_v46 }
0x24f2   :  { %3295 = vmatpush1.msra.mxu0 %v8221_v38 }
0x24f3   :  { %3296 = vmatprep.subr.mxu0 %v8222_v52 }
0x24f4   :  { %3297 = vmatpush1.msra.mxu0 %v8223_v51 }
0x24f5   :  { %3298 = vmatprep.subr.mxu0 %v8224_v56 }
0x24f6   :  { %3299 = vmatpush1.msra.mxu0 %v8225_v55 }
0x24f7   :  { %3300 = vmatprep.subr.mxu0 %v8226_v4 }
0x24f8   :  { %3301 = vmatpush1.msra.mxu0 %v8227_v57 }
0x24f9   :  { %3302 = vmatprep.subr.mxu0 %v8228_v53 }
0x24fa   :  { %3303 = vmatpush1.msra.mxu0 %v8229_v54 }
0x24fb   :  { %3563 = vmatprep.subr.mxu0 %v8230_v34 }
0x259b   :  { %v3047_v43 = vpop.f32.mrf.mxu0 }
0x259c   :  { %v3048_v21 = vadd.f32 %v3047_v43, %v8180_v48 }
0x259d   :  { %v3049_v42 = vpop.f32.mrf.mxu0 }
0x259e   :  { %v3050_v31 = vadd.f32 %v3049_v42, %v8144_v35  ;;  %v4712_v2 = vmul.f32 -1.442695, %v3048_v21 }
0x25a0   :  { %5289 = vtanh.f32 %v3050_v31  ;;  %v4713_v43 = vmul.f32 -1.442695, %v3050_v31 }
0x25a1   :  { %5291 = vpow2.f32 %v4712_v2 }
0x25ad   :  { %v5290_v5 = vpop.eup %5289 }
0x25ae   :  { %3067 = vrot.lane.b32.xlu1 %v5290_v5, %s5609_s2  ;;  %v5292_v49 = vpop.eup %5291 }
0x25af   :  { %v3058_v59 = vadd.f32 1.0, %v5292_v49 }
0x25b1   :  { %5293 = vrcp.f32 %v3058_v59 }
0x25be   :  { %v5294_v53 = vpop.eup %5293 }
0x25bf   :  { %v3065_v34 = vmul.f32 %v5294_v53, %v7201_v61  ;;  %v8233_v61 = vld [vmem:[#allocation24_spill] sm:$0xff] }
0x2620   :  { %v3068_v57 = vpop.permute.xlu1 %3067 }
0x2621   :  { %v3070_v54 = vmul.f32 %v5294_v53, %v3068_v57 }
0x2623   :  { %3072 = vrot.lane.b32.xlu0 %v3070_v54, %s5609_s2 }
0x2695   :  { %v3073_v4 = vpop.permute.xlu0 %3072 }
0x2696   :  { %v7302_v42 = vadd.f32 %v3073_v4, %v3065_v34 }
0x2698   :  { %5295 = vtanh.f32 %v7302_v42 }
0x2699   :  { %5297 = vpow2.f32 %v4713_v43 }
0x26a5   :  { %v5296_v5 = vpop.eup %5295 }
0x26a6   :  { %3078 = vrot.lane.b32.xlu1 %v5296_v5, %s5609_s2  ;;  %v5298_v21 = vpop.eup %5297 }
0x26a7   :  { %v3059_v2 = vadd.f32 1.0, %v5298_v21 }
0x26a9   :  { %5299 = vrcp.f32 %v3059_v2 }
0x26b6   :  { %v5300_v49 = vpop.eup %5299 }
0x2718   :  { %v3079_v59 = vpop.permute.xlu1 %3078 }
0x2719   :  { %v7306_v57 = vmul.f32 %v5300_v49, %v3079_v59 }
0x271b   :  { %4934 = vmatmul.mubr.msk.f32.vlgmr.msra.gmra.mxu1 %vm408_vm2, %v7306_v57 }
0x271c   :  { %3182 = vmatpush1.msra.mxu1 %v6862_v11  ;;  %3229 = vmatprep.mubr.f32.mxu1 %v8112_v29  ;;  %v7332_v11 = vld [vmem:[%s8001_s6 + $0x38] sm:$0xff] }
0x271d   :  { %3183 = vmatprep.subr.mxu1 %v6869_v20  ;;  %v7341_v20 = vld [vmem:[%s8001_s6 + $0x30] sm:$0xff] }
0x271e   :  { %3184 = vmatpush1.msra.mxu1 %v6875_v23  ;;  %v7348_v23 = vld [vmem:[%s8001_s6 + $0x28] sm:$0xff] }
0x271f   :  { %3185 = vmatprep.subr.mxu1 %v6881_v26  ;;  %v7355_v26 = vld [vmem:[%s8001_s6 + $0x20] sm:$0xff] }
0x2720   :  { %3186 = vmatpush1.msra.mxu1 %v6887_v41  ;;  %v7362_v41 = vld [vmem:[%s8001_s6 + $0x18] sm:$0xff] }
0x2721   :  { %3187 = vmatprep.subr.mxu1 %v6893_v16  ;;  %v7369_v16 = vld [vmem:[%s8001_s6 + $0x10] sm:$0xff] }
0x2722   :  { %3188 = vmatpush1.msra.mxu1 %v6899_v25  ;;  %v7376_v25 = vld [vmem:[%s8001_s6 + $0x8] sm:$0xff] }
0x2723   :  { %3189 = vmatprep.subr.mxu1 %v6905_v18  ;;  %v7383_v18 = vld [vmem:[%s8001_s6] sm:$0xff] }
0x2724   :  { %3190 = vmatpush1.msra.mxu1 %v6911_v0 }
0x2725   :  { %3191 = vmatprep.subr.mxu1 %v6917_v8  ;;  %v7390_v8 = vld [vmem:[%s8002_s7] ss:$0 sm:$0xff] }
0x2726   :  { %3192 = vmatpush1.msra.mxu1 %v6923_v1  ;;  %8231 = vst [vmem:[#allocation15_spill] sm:$0xff] %v7390_v8 }
0x2727   :  { %3193 = vmatprep.subr.mxu1 %v6929_v13 }
0x2728   :  { %3194 = vmatpush1.msra.mxu1 %v6935_v39  ;;  %v8232_v39 = vld [vmem:[#allocation23_spill] sm:$0xff] }
0x2729   :  { %3195 = vmatprep.subr.mxu1 %v6941_v33  ;;  %v268_v33 = vadd.f32 %v8232_v39, %v8166_v15 }
0x272a   :  { %3196 = vmatpush1.msra.mxu1 %v6947_v37 }
0x272b   :  { %4716 = vmatmul.mubr.msk.f32.vlgmr.msra.gmra.mxu1 %vm408_vm2, %v7260_v58  ;;  %4936 = vmatprep.subr.mxu1 %v8112_v29 }
0x272c   :  { %4937 = vmatpush3.msra.mxu1 %v7332_v11  ;;  %4952 = vmatprep.mubr.msk.f32.mxu1 %vm5610_vm3, %v8112_v29 }
0x272d   :  { %4938 = vmatprep.subr.mxu1 %v8112_v29 }
0x272e   :  { %4939 = vmatpush3.msra.mxu1 %v7341_v20 }
0x272f   :  { %4940 = vmatprep.subr.mxu1 %v8112_v29 }
0x2730   :  { %4941 = vmatpush3.msra.mxu1 %v7348_v23 }
0x2731   :  { %4942 = vmatprep.subr.mxu1 %v8112_v29 }
0x2732   :  { %4943 = vmatpush3.msra.mxu1 %v7355_v26 }
0x2733   :  { %4944 = vmatprep.subr.mxu1 %v8112_v29 }
0x2734   :  { %4945 = vmatpush3.msra.mxu1 %v7362_v41 }
0x2735   :  { %4946 = vmatprep.subr.mxu1 %v8112_v29 }
0x2736   :  { %4947 = vmatpush3.msra.mxu1 %v7369_v16 }
0x2737   :  { %4948 = vmatprep.subr.mxu1 %v8112_v29 }
0x2738   :  { %4949 = vmatpush3.msra.mxu1 %v7376_v25 }
0x2739   :  { %4950 = vmatprep.subr.mxu1 %v8112_v29 }
0x273a   :  { %4951 = vmatpush3.msra.mxu1 %v7383_v18 }
0x273b   :  { %3472 = vmatprep.subr.mxu1 %v8215_v40  ;;  %v270_v40 = vadd.f32 %v8233_v61, %v8118_v28 }
0x27db   :  { %v3151_v0 = vpop.f32.mrf.mxu1 }
0x27dc   :  { %v3152_v1 = vadd.f32 %v7390_v8, %v3151_v0 }
0x27dd   :  { %v4935_v13 = vpop.f32.mrf.mxu1 }
0x27de   :  { %4715 = vst.msk [vmem:[%s8003_s8 + $0x20] sm:$0xff] %vm81_vm1, %v3152_v1 }
0x27eb   :  { %v3231_v37 = vpop.f32.mrf.mxu1 }
0x27ec   :  { %v3236_v58 = vadd.f32 %v3231_v37, %v268_v33 }
0x27ed   :  { %v3233_v4 = vpop.f32.mrf.mxu1 }
0x27ee   :  { %v3237_v53 = vadd.f32 %v3233_v4, %v270_v40  ;;  %v4717_v34 = vmul.f32 -1.442695, %v3236_v58  ;;  %v7476_v58 = vld [vmem:[%s7998_s3 + $0x60] sm:$0xff]  ;;  %v7482_v4 = vld [vmem:[%s7998_s3 + $0x58] sm:$0xff] }
0x27f0   :  { %5301 = vtanh.f32 %v3237_v53  ;;  %v4718_v13 = vmul.f32 -1.442695, %v3237_v53  ;;  %v7488_v53 = vld [vmem:[%s7998_s3 + $0x50] sm:$0xff] }
0x27f1   :  { %5303 = vpow2.f32 %v4717_v34  ;;  %v7500_v34 = vld [vmem:[%s7998_s3 + $0x40] sm:$0xff] }
0x27fd   :  { %v5302_v54 = vpop.eup %5301 }
0x27fe   :  { %3253 = vrot.lane.b32.xlu0 %v5302_v54, %s5609_s2  ;;  %v5304_v31 = vpop.eup %5303  ;;  %v7494_v54 = vld [vmem:[%s7998_s3 + $0x48] sm:$0xff] }
0x27ff   :  { %v3244_v5 = vadd.f32 1.0, %v5304_v31  ;;  %v7506_v31 = vld [vmem:[%s7998_s3 + $0x38] sm:$0xff] }
0x2801   :  { %5305 = vrcp.f32 %v3244_v5  ;;  %v7512_v5 = vld [vmem:[%s7998_s3 + $0x30] sm:$0xff] }
0x280e   :  { %v5306_v43 = vpop.eup %5305 }
0x280f   :  { %v3251_v49 = vmul.f32 %v5306_v43, %v7256_v27 }
0x2870   :  { %v3254_v21 = vpop.permute.xlu0 %3253 }
0x2871   :  { %v3256_v2 = vmul.f32 %v5306_v43, %v3254_v21  ;;  %v7518_v43 = vld [vmem:[%s7998_s3 + $0x28] sm:$0xff]  ;;  %v7524_v21 = vld [vmem:[%s7998_s3 + $0x20] sm:$0xff] }
0x2873   :  { %3258 = vrot.lane.b32.xlu1 %v3256_v2, %s5609_s2  ;;  %v7530_v2 = vld [vmem:[%s7998_s3 + $0x18] sm:$0xff] }
0x2877   :  { %3268 = vrot.lane.b32.xlu1 %v7306_v57, %s5609_s2 }
0x28e5   :  { %v3259_v59 = vpop.permute.xlu1 %3258 }
0x28e6   :  { %v7406_v0 = vadd.f32 %v3259_v59, %v3251_v49  ;;  %v7536_v49 = vld [vmem:[%s7998_s3 + $0x10] sm:$0xff]  ;;  %v7542_v59 = vld [vmem:[%s7998_s3 + $0x8] sm:$0xff] }
0x28e8   :  { %5307 = vtanh.f32 %v7406_v0 }
0x28e9   :  { %5309 = vpow2.f32 %v4718_v13  ;;  %v3269_v57 = vpop.permute.xlu1 %3268  ;;  %v7574_v13 = vld [vmem:[%s7998_s3 + $0x78] sm:$0xff] }
0x28ea   :  { %8239 = vst [vmem:[#allocation16_spill] sm:$0xff] %v7574_v13 }
0x28f5   :  { %v5308_v1 = vpop.eup %5307 }
0x28f6   :  { %3264 = vrot.lane.b32.xlu0 %v5308_v1, %s5609_s2  ;;  %v5310_v39 = vpop.eup %5309  ;;  %v7548_v1 = vld [vmem:[%s7998_s3] sm:$0xff] }
0x28f7   :  { %v3245_v33 = vadd.f32 1.0, %v5310_v39 }
0x28f9   :  { %5311 = vrcp.f32 %v3245_v33 }
0x2906   :  { %v5312_v37 = vpop.eup %5311 }
0x2968   :  { %v3265_v61 = vpop.permute.xlu0 %3264 }
0x2969   :  { %v7410_v40 = vmul.f32 %v5312_v37, %v3265_v61  ;;  %v8240_v61 = vld [vmem:[#allocation25_spill] sm:$0xff] }
0x296b   :  { %v3271_v27 = vsel %vm408_vm2, %v7410_v40, %v3269_v57 }
0x296c   :  { %3337 = vmatmul.mubr.f32.vlgmr.msra.gmra.mxu0 %v3271_v27  ;;  %v8241_v27 = vld [vmem:[#allocation26_spill] sm:$0xff] }
0x296d   :  { %3564 = vmatpush1.msra.mxu0 %v6998_v63  ;;  %3627 = vmatprep.mubr.f32.mxu0 %v8112_v29  ;;  %v8234_v63 = vld [vmem:[#allocation10_spill] sm:$0xff] }
0x296e   :  { %3565 = vmatprep.subr.mxu0 %v7002_v7  ;;  %v8235_v7 = vld [vmem:[#allocation33_spill] sm:$0xff] }
0x296f   :  { %3566 = vmatpush1.msra.mxu0 %v7005_v9  ;;  %v8236_v9 = vld [vmem:[#allocation34_spill] sm:$0xff] }
0x2970   :  { %3567 = vmatprep.subr.mxu0 %v7008_v24  ;;  %v8237_v24 = vld [vmem:[#allocation35_spill] sm:$0xff] }
0x2971   :  { %3568 = vmatpush1.msra.mxu0 %v7011_v3  ;;  %v8238_v3 = vld [vmem:[#allocation36_spill] sm:$0xff] }
0x2972   :  { %3569 = vmatprep.subr.mxu0 %v7014_v14 }
0x2973   :  { %3570 = vmatpush1.msra.mxu0 %v7017_v10 }
0x2974   :  { %3571 = vmatprep.subr.mxu0 %v7020_v6 }
0x2975   :  { %3572 = vmatpush1.msra.mxu0 %v7023_v22 }
0x2976   :  { %3573 = vmatprep.subr.mxu0 %v7026_v32 }
0x2977   :  { %3574 = vmatpush1.msra.mxu0 %v7029_v36 }
0x2978   :  { %3575 = vmatprep.subr.mxu0 %v7032_v12 }
0x2979   :  { %3576 = vmatpush1.msra.mxu0 %v7035_v30 }
0x297a   :  { %3577 = vmatprep.subr.mxu0 %v7038_v17 }
0x297b   :  { %3578 = vmatpush1.msra.mxu0 %v7041_v19 }
0x297c   :  { %3579 = vmatprep.subr.mxu0 %v7044_v44 }
0x297d   :  { %3580 = vmatpush1.msra.mxu0 %v7047_v45 }
0x297e   :  { %3581 = vmatprep.subr.mxu0 %v7050_v47 }
0x297f   :  { %3582 = vmatpush1.msra.mxu0 %v8201_v60 }
0x2980   :  { %3583 = vmatprep.subr.mxu0 %v8202_v62 }
0x2981   :  { %3584 = vmatpush1.msra.mxu0 %v8219_v50 }
0x2982   :  { %3585 = vmatprep.subr.mxu0 %v8220_v46 }
0x2983   :  { %3586 = vmatpush1.msra.mxu0 %v8221_v38 }
0x2984   :  { %3587 = vmatprep.subr.mxu0 %v8222_v52 }
0x2985   :  { %3588 = vmatpush1.msra.mxu0 %v8223_v51 }
0x2986   :  { %3589 = vmatprep.subr.mxu0 %v8224_v56 }
0x2987   :  { %3590 = vmatpush1.msra.mxu0 %v8225_v55  ;;  %v7463_v55 = vld [vmem:[%s7998_s3 + $0x70] sm:$0xff] }
0x2988   :  { %3591 = vmatprep.subr.mxu0 %v8234_v63  ;;  %v276_v63 = vadd.f32 %v8241_v27, %v8118_v28  ;;  %v7627_v27 = vld [vmem:[#allocation3 + $0xa8] sm:$0xff] }
0x2989   :  { %3592 = vmatpush1.msra.mxu0 %v8235_v7 }
0x298a   :  { %3593 = vmatprep.subr.mxu0 %v8236_v9 }
0x298b   :  { %3594 = vmatpush1.msra.mxu0 %v8237_v24 }
0x298c   :  { %3854 = vmatprep.subr.mxu0 %v8238_v3 }
0x2a2c   :  { %v3338_v14 = vpop.f32.mrf.mxu0 }
0x2a2d   :  { %v3339_v32 = vadd.f32 %v3338_v14, %v8180_v48 }
0x2a2e   :  { %v3340_v10 = vpop.f32.mrf.mxu0 }
0x2a2f   :  { %v3341_v6 = vadd.f32 %v3340_v10, %v8144_v35  ;;  %v4719_v36 = vmul.f32 -1.442695, %v3339_v32 }
0x2a31   :  { %5313 = vtanh.f32 %v3341_v6  ;;  %v4720_v50 = vmul.f32 -1.442695, %v3341_v6 }
0x2a32   :  { %5315 = vpow2.f32 %v4719_v36 }
0x2a3e   :  { %v5314_v22 = vpop.eup %5313 }
0x2a3f   :  { %3358 = vrot.lane.b32.xlu0 %v5314_v22, %s5609_s2  ;;  %v5316_v12 = vpop.eup %5315 }
0x2a40   :  { %v3349_v30 = vadd.f32 1.0, %v5316_v12 }
0x2a42   :  { %5317 = vrcp.f32 %v3349_v30 }
0x2a4f   :  { %v5318_v17 = vpop.eup %5317 }
0x2a50   :  { %v3356_v45 = vmul.f32 %v5318_v17, %v7302_v42  ;;  %v7470_v42 = vld [vmem:[%s7998_s3 + $0x68] sm:$0xff] }
0x2ab1   :  { %v3359_v19 = vpop.permute.xlu0 %3358 }
0x2ab2   :  { %v3361_v44 = vmul.f32 %v5318_v17, %v3359_v19 }
0x2ab4   :  { %3363 = vrot.lane.b32.xlu1 %v3361_v44, %s5609_s2 }
0x2b26   :  { %v3364_v47 = vpop.permute.xlu1 %3363 }
0x2b27   :  { %v7452_v60 = vadd.f32 %v3364_v47, %v3356_v45 }
0x2b29   :  { %5319 = vtanh.f32 %v7452_v60 }
0x2b2a   :  { %5321 = vpow2.f32 %v4720_v50 }
0x2b36   :  { %v5320_v62 = vpop.eup %5319 }
0x2b37   :  { %3369 = vrot.lane.b32.xlu0 %v5320_v62, %s5609_s2  ;;  %v5322_v46 = vpop.eup %5321 }
0x2b38   :  { %v3350_v38 = vadd.f32 1.0, %v5322_v46 }
0x2b3a   :  { %5323 = vrcp.f32 %v3350_v38 }
0x2b47   :  { %v5324_v52 = vpop.eup %5323 }
0x2ba9   :  { %v3370_v51 = vpop.permute.xlu0 %3369 }
0x2baa   :  { %v7456_v56 = vmul.f32 %v5324_v52, %v3370_v51  ;;  %v7599_v52 = vld [vmem:[#allocation3 + $0xf0] sm:$0xff]  ;;  %v7603_v51 = vld [vmem:[#allocation3 + $0xe8] sm:$0xff] }
0x2bac   :  { %4953 = vmatmul.mubr.msk.f32.vlgmr.msra.gmra.mxu1 %vm408_vm2, %v7456_v56 }
0x2bad   :  { %3473 = vmatpush1.msra.mxu1 %v7463_v55  ;;  %3520 = vmatprep.mubr.f32.mxu1 %v8112_v29 }
0x2bae   :  { %3474 = vmatprep.subr.mxu1 %v7470_v42 }
0x2baf   :  { %3475 = vmatpush1.msra.mxu1 %v7476_v58 }
0x2bb0   :  { %3476 = vmatprep.subr.mxu1 %v7482_v4 }
0x2bb1   :  { %3477 = vmatpush1.msra.mxu1 %v7488_v53 }
0x2bb2   :  { %3478 = vmatprep.subr.mxu1 %v7494_v54 }
0x2bb3   :  { %3479 = vmatpush1.msra.mxu1 %v7500_v34 }
0x2bb4   :  { %3480 = vmatprep.subr.mxu1 %v7506_v31 }
0x2bb5   :  { %3481 = vmatpush1.msra.mxu1 %v7512_v5 }
0x2bb6   :  { %3482 = vmatprep.subr.mxu1 %v7518_v43 }
0x2bb7   :  { %3483 = vmatpush1.msra.mxu1 %v7524_v21 }
0x2bb8   :  { %3484 = vmatprep.subr.mxu1 %v7530_v2 }
0x2bb9   :  { %3485 = vmatpush1.msra.mxu1 %v7536_v49 }
0x2bba   :  { %3486 = vmatprep.subr.mxu1 %v7542_v59 }
0x2bbb   :  { %3487 = vmatpush1.msra.mxu1 %v7548_v1 }
0x2bbc   :  { %4723 = vmatmul.mubr.msk.f32.vlgmr.msra.gmra.mxu1 %vm408_vm2, %v7410_v40  ;;  %4955 = vmatprep.subr.mxu1 %v8112_v29  ;;  %v274_v40 = vadd.f32 %v8240_v61, %v8166_v15  ;;  %v7618_v61 = vld [vmem:[#allocation3 + $0xc0] sm:$0xff] }
0x2bbd   :  { %4956 = vmatpush3.msra.mxu1 %v7332_v11  ;;  %4971 = vmatprep.mubr.msk.f32.mxu1 %vm5610_vm3, %v8112_v29 }
0x2bbe   :  { %4957 = vmatprep.subr.mxu1 %v8112_v29 }
0x2bbf   :  { %4958 = vmatpush3.msra.mxu1 %v7341_v20 }
0x2bc0   :  { %4959 = vmatprep.subr.mxu1 %v8112_v29 }
0x2bc1   :  { %4960 = vmatpush3.msra.mxu1 %v7348_v23 }
0x2bc2   :  { %4961 = vmatprep.subr.mxu1 %v8112_v29 }
0x2bc3   :  { %4962 = vmatpush3.msra.mxu1 %v7355_v26 }
0x2bc4   :  { %4963 = vmatprep.subr.mxu1 %v8112_v29 }
0x2bc5   :  { %4964 = vmatpush3.msra.mxu1 %v7362_v41 }
0x2bc6   :  { %4965 = vmatprep.subr.mxu1 %v8112_v29 }
0x2bc7   :  { %4966 = vmatpush3.msra.mxu1 %v7369_v16 }
0x2bc8   :  { %4967 = vmatprep.subr.mxu1 %v8112_v29 }
0x2bc9   :  { %4968 = vmatpush3.msra.mxu1 %v7376_v25 }
0x2bca   :  { %4969 = vmatprep.subr.mxu1 %v8112_v29 }
0x2bcb   :  { %4970 = vmatpush3.msra.mxu1 %v7383_v18 }
0x2bcc   :  { %3763 = vmatprep.subr.mxu1 %v7574_v13 }
0x2c6c   :  { %v3442_v39 = vpop.f32.mrf.mxu1 }
0x2c6d   :  { %v3443_v33 = vadd.f32 %v7390_v8, %v3442_v39  ;;  %v7609_v39 = vld [vmem:[#allocation3 + $0xd8] sm:$0xff] }
0x2c6e   :  { %v4954_v37 = vpop.f32.mrf.mxu1 }
0x2c6f   :  { %4722 = vst.msk [vmem:[%s8003_s8 + $0x28] sm:$0xff] %vm81_vm1, %v3443_v33  ;;  %v7612_v33 = vld [vmem:[#allocation3 + $0xd0] sm:$0xff]  ;;  %v7615_v37 = vld [vmem:[#allocation3 + $0xc8] sm:$0xff] }
0x2c7c   :  { %v3522_v57 = vpop.f32.mrf.mxu1 }
0x2c7d   :  { %v3527_v7 = vadd.f32 %v3522_v57, %v274_v40  ;;  %v7621_v40 = vld [vmem:[#allocation3 + $0xb8] sm:$0xff]  ;;  %v7624_v57 = vld [vmem:[#allocation3 + $0xb0] sm:$0xff] }
0x2c7e   :  { %v3524_v9 = vpop.f32.mrf.mxu1 }
0x2c7f   :  { %v3528_v24 = vadd.f32 %v3524_v9, %v276_v63  ;;  %v4724_v14 = vmul.f32 -1.442695, %v3527_v7  ;;  %v7630_v63 = vld [vmem:[#allocation3 + $0xa0] sm:$0xff]  ;;  %v7633_v7 = vld [vmem:[#allocation3 + $0x98] sm:$0xff]  ;;  %v7636_v9 = vld [vmem:[#allocation3 + $0x90] sm:$0xff] }
0x2c81   :  { %5325 = vtanh.f32 %v3528_v24  ;;  %v4725_v44 = vmul.f32 -1.442695, %v3528_v24  ;;  %v7639_v24 = vld [vmem:[#allocation3 + $0x88] sm:$0xff] }
0x2c82   :  { %5327 = vpow2.f32 %v4724_v14  ;;  %v7645_v14 = vld [vmem:[#allocation3 + $0x78] sm:$0xff] }
0x2c8e   :  { %v5326_v3 = vpop.eup %5325 }
0x2c8f   :  { %3544 = vrot.lane.b32.xlu1 %v5326_v3, %s5609_s2  ;;  %v5328_v10 = vpop.eup %5327  ;;  %v7642_v3 = vld [vmem:[#allocation3 + $0x80] sm:$0xff] }
0x2c90   :  { %v3535_v6 = vadd.f32 1.0, %v5328_v10  ;;  %v7648_v10 = vld [vmem:[#allocation3 + $0x70] sm:$0xff] }
0x2c92   :  { %5329 = vrcp.f32 %v3535_v6  ;;  %v7651_v6 = vld [vmem:[#allocation3 + $0x68] sm:$0xff] }
0x2c9f   :  { %v5330_v22 = vpop.eup %5329 }
0x2ca0   :  { %v3542_v12 = vmul.f32 %v5330_v22, %v7406_v0 }
0x2d01   :  { %v3545_v32 = vpop.permute.xlu1 %3544 }
0x2d02   :  { %v3547_v36 = vmul.f32 %v5330_v22, %v3545_v32  ;;  %v7654_v22 = vld [vmem:[#allocation3 + $0x60] sm:$0xff]  ;;  %v7657_v32 = vld [vmem:[#allocation3 + $0x58] sm:$0xff] }
0x2d03   :  { %8242 = vst [vmem:[#allocation13_spill] sm:$0xff] %v7654_v22  ;;  %8243 = vst [vmem:[#allocation11_spill] sm:$0xff] %v7657_v32 }
0x2d04   :  { %3549 = vrot.lane.b32.xlu0 %v3547_v36, %s5609_s2  ;;  %v7660_v36 = vld [vmem:[#allocation3 + $0x50] sm:$0xff] }
0x2d05   :  { %8244 = vst [vmem:[#allocation17_spill] sm:$0xff] %v7660_v36 }
0x2d08   :  { %3559 = vrot.lane.b32.xlu0 %v7456_v56, %s5609_s2  ;;  %v7606_v56 = vld [vmem:[#allocation3 + $0xe0] sm:$0xff] }
0x2d76   :  { %v3550_v30 = vpop.permute.xlu0 %3549 }
0x2d77   :  { %v7591_v17 = vadd.f32 %v3550_v30, %v3542_v12  ;;  %v7663_v12 = vld [vmem:[#allocation3 + $0x48] sm:$0xff]  ;;  %v7666_v30 = vld [vmem:[#allocation3 + $0x40] sm:$0xff] }
0x2d78   :  { %8245 = vst [vmem:[#allocation18_spill] sm:$0xff] %v7663_v12  ;;  %8246 = vst [vmem:[#allocation19_spill] sm:$0xff] %v7666_v30 }
0x2d79   :  { %5331 = vtanh.f32 %v7591_v17 }
0x2d7a   :  { %5333 = vpow2.f32 %v4725_v44  ;;  %v3560_v38 = vpop.permute.xlu0 %3559  ;;  %v7672_v44 = vld [vmem:[#allocation3 + $0x30] sm:$0xff] }
0x2d7b   :  { %8248 = vst [vmem:[#allocation38_spill] sm:$0xff] %v7672_v44 }
0x2d86   :  { %v5332_v19 = vpop.eup %5331 }
0x2d87   :  { %3555 = vrot.lane.b32.xlu1 %v5332_v19, %s5609_s2  ;;  %v5334_v45 = vpop.eup %5333  ;;  %v7669_v19 = vld [vmem:[#allocation3 + $0x38] sm:$0xff] }
0x2d88   :  { %v3536_v47 = vadd.f32 1.0, %v5334_v45  ;;  %8247 = vst [vmem:[#allocation20_spill] sm:$0xff] %v7669_v19  ;;  %v7675_v45 = vld [vmem:[#allocation3 + $0x28] sm:$0xff] }
0x2d89   :  { %8249 = vst [vmem:[#allocation39_spill] sm:$0xff] %v7675_v45 }
0x2d8a   :  { %5335 = vrcp.f32 %v3536_v47  ;;  %v7678_v47 = vld [vmem:[#allocation3 + $0x20] sm:$0xff] }
0x2d8b   :  { %8250 = vst [vmem:[#allocation37_spill] sm:$0xff] %v7678_v47 }
0x2d97   :  { %v5336_v62 = vpop.eup %5335 }
0x2df9   :  { %v3556_v50 = vpop.permute.xlu1 %3555 }
0x2dfa   :  { %v7595_v46 = vmul.f32 %v5336_v62, %v3556_v50  ;;  %v7681_v62 = vld [vmem:[#allocation3 + $0x18] sm:$0xff]  ;;  %v7684_v50 = vld [vmem:[#allocation3 + $0x10] sm:$0xff] }
0x2dfb   :  { %8251 = vst [vmem:[#allocation6_spill] sm:$0xff] %v7681_v62  ;;  %8252 = vst [vmem:[#allocation21_spill] sm:$0xff] %v7684_v50 }
0x2dfc   :  { %v3562_v0 = vsel %vm408_vm2, %v7595_v46, %v3560_v38  ;;  %v7687_v38 = vld [vmem:[#allocation3 + $0x8] sm:$0xff] }
0x2dfd   :  { %3628 = vmatmul.mubr.f32.vlgmr.msra.gmra.mxu0 %v3562_v0  ;;  %8253 = vst [vmem:[#allocation22_spill] sm:$0xff] %v7687_v38  ;;  %v7690_v0 = vld [vmem:[#allocation3] sm:$0xff] }
0x2dfe   :  { %3855 = vmatpush1.msra.mxu0 %v7599_v52  ;;  %3918 = vmatprep.mubr.f32.mxu0 %v8112_v29  ;;  %8254 = vst [vmem:[#allocation40_spill] sm:$0xff] %v7690_v0 }
0x2dff   :  { %3856 = vmatprep.subr.mxu0 %v7603_v51 }
0x2e00   :  { %3857 = vmatpush1.msra.mxu0 %v7606_v56 }
0x2e01   :  { %3858 = vmatprep.subr.mxu0 %v7609_v39 }
0x2e02   :  { %3859 = vmatpush1.msra.mxu0 %v7612_v33 }
0x2e03   :  { %3860 = vmatprep.subr.mxu0 %v7615_v37 }
0x2e04   :  { %3861 = vmatpush1.msra.mxu0 %v7618_v61 }
0x2e05   :  { %3862 = vmatprep.subr.mxu0 %v7621_v40 }
0x2e06   :  { %3863 = vmatpush1.msra.mxu0 %v7624_v57 }
0x2e07   :  { %3864 = vmatprep.subr.mxu0 %v7627_v27 }
0x2e08   :  { %3865 = vmatpush1.msra.mxu0 %v7630_v63 }
0x2e09   :  { %3866 = vmatprep.subr.mxu0 %v7633_v7 }
0x2e0a   :  { %3867 = vmatpush1.msra.mxu0 %v7636_v9 }
0x2e0b   :  { %3868 = vmatprep.subr.mxu0 %v7639_v24 }
0x2e0c   :  { %3869 = vmatpush1.msra.mxu0 %v7642_v3 }
0x2e0d   :  { %3870 = vmatprep.subr.mxu0 %v7645_v14 }
0x2e0e   :  { %3871 = vmatpush1.msra.mxu0 %v7648_v10 }
0x2e0f   :  { %3872 = vmatprep.subr.mxu0 %v7651_v6 }
0x2e10   :  { %3873 = vmatpush1.msra.mxu0 %v7654_v22 }
0x2e11   :  { %3874 = vmatprep.subr.mxu0 %v7657_v32 }
0x2e12   :  { %3875 = vmatpush1.msra.mxu0 %v7660_v36 }
0x2e13   :  { %3876 = vmatprep.subr.mxu0 %v7663_v12 }
0x2e14   :  { %3877 = vmatpush1.msra.mxu0 %v7666_v30 }
0x2e15   :  { %3878 = vmatprep.subr.mxu0 %v7669_v19 }
0x2e16   :  { %3879 = vmatpush1.msra.mxu0 %v7672_v44 }
0x2e17   :  { %3880 = vmatprep.subr.mxu0 %v7675_v45  ;;  %v7693_v45 = vld [vmem:[#allocation3 + $0xf8] sm:$0xff] }
0x2e18   :  { %3881 = vmatpush1.msra.mxu0 %v7678_v47  ;;  %8255 = vst [vmem:[#allocation41_spill] sm:$0xff] %v7693_v45 }
0x2e19   :  { %3882 = vmatprep.subr.mxu0 %v7681_v62 }
0x2e1a   :  { %3883 = vmatpush1.msra.mxu0 %v7684_v50 }
0x2e1b   :  { %3884 = vmatprep.subr.mxu0 %v7687_v38 }
0x2e1c   :  { %3885 = vmatpush1.msra.mxu0 %v7690_v0 }
0x2e1d   :  { %4145 = vmatprep.subr.mxu0 %v7693_v45 }
0x2ebd   :  { %v3629_v47 = vpop.f32.mrf.mxu0 }
0x2ebe   :  { %v3630_v50 = vadd.f32 %v3629_v47, %v8180_v48 }
0x2ebf   :  { %v3631_v44 = vpop.f32.mrf.mxu0 }
0x2ec0   :  { %v3632_v62 = vadd.f32 %v3631_v44, %v8144_v35  ;;  %v4726_v30 = vmul.f32 -1.442695, %v3630_v50 }
0x2ec2   :  { %5337 = vtanh.f32 %v3632_v62  ;;  %v4727_v47 = vmul.f32 -1.442695, %v3632_v62 }
0x2ec3   :  { %5339 = vpow2.f32 %v4726_v30 }
0x2ecf   :  { %v5338_v19 = vpop.eup %5337 }
0x2ed0   :  { %3649 = vrot.lane.b32.xlu1 %v5338_v19, %s5609_s2  ;;  %v5340_v38 = vpop.eup %5339 }
0x2ed1   :  { %v3640_v12 = vadd.f32 1.0, %v5340_v38 }
0x2ed3   :  { %5341 = vrcp.f32 %v3640_v12 }
0x2ee0   :  { %v5342_v0 = vpop.eup %5341 }
0x2ee1   :  { %v3647_v45 = vmul.f32 %v5342_v0, %v7452_v60 }
0x2f42   :  { %v3650_v36 = vpop.permute.xlu1 %3649 }
0x2f43   :  { %v3652_v32 = vmul.f32 %v5342_v0, %v3650_v36  ;;  %v8257_v0 = vld [vmem:[#allocation28_spill] sm:$0xff] }
0x2f45   :  { %3654 = vrot.lane.b32.xlu0 %v3652_v32, %s5609_s2  ;;  %v8256_v32 = vld [vmem:[#allocation27_spill] sm:$0xff] }
0x2fb7   :  { %v3655_v22 = vpop.permute.xlu0 %3654 }
0x2fb8   :  { %v7701_v44 = vadd.f32 %v3655_v22, %v3647_v45  ;;  %v280_v45 = vadd.f32 %v8256_v32, %v8166_v15 }
0x2fba   :  { %5343 = vtanh.f32 %v7701_v44 }
0x2fbb   :  { %5345 = vpow2.f32 %v4727_v47 }
0x2fc7   :  { %v5344_v19 = vpop.eup %5343 }
0x2fc8   :  { %3660 = vrot.lane.b32.xlu1 %v5344_v19, %s5609_s2  ;;  %v5346_v30 = vpop.eup %5345  ;;  %v282_v19 = vadd.f32 %v8257_v0, %v8118_v28 }
0x2fc9   :  { %v3641_v50 = vadd.f32 1.0, %v5346_v30 }
0x2fcb   :  { %5347 = vrcp.f32 %v3641_v50 }
0x2fd8   :  { %v5348_v12 = vpop.eup %5347 }
0x303a   :  { %v3661_v38 = vpop.permute.xlu1 %3660 }
0x303b   :  { %v3663_v36 = vmul.f32 %v5348_v12, %v3661_v38 }
0x303d   :  { %4972 = vmatmul.mubr.msk.f32.vlgmr.msra.gmra.mxu1 %vm408_vm2, %v3663_v36 }
0x303e   :  { %3764 = vmatpush1.msra.mxu1 %v7463_v55  ;;  %3811 = vmatprep.mubr.f32.mxu1 %v8112_v29 }
0x303f   :  { %3765 = vmatprep.subr.mxu1 %v7470_v42 }
0x3040   :  { %3766 = vmatpush1.msra.mxu1 %v7476_v58 }
0x3041   :  { %3767 = vmatprep.subr.mxu1 %v7482_v4 }
0x3042   :  { %3768 = vmatpush1.msra.mxu1 %v7488_v53 }
0x3043   :  { %3769 = vmatprep.subr.mxu1 %v7494_v54 }
0x3044   :  { %3770 = vmatpush1.msra.mxu1 %v7500_v34 }
0x3045   :  { %3771 = vmatprep.subr.mxu1 %v7506_v31 }
0x3046   :  { %3772 = vmatpush1.msra.mxu1 %v7512_v5 }
0x3047   :  { %3773 = vmatprep.subr.mxu1 %v7518_v43 }
0x3048   :  { %3774 = vmatpush1.msra.mxu1 %v7524_v21 }
0x3049   :  { %3775 = vmatprep.subr.mxu1 %v7530_v2 }
0x304a   :  { %3776 = vmatpush1.msra.mxu1 %v7536_v49 }
0x304b   :  { %3777 = vmatprep.subr.mxu1 %v7542_v59 }
0x304c   :  { %3778 = vmatpush1.msra.mxu1 %v7548_v1 }
0x304d   :  { %4730 = vmatmul.mubr.msk.f32.vlgmr.msra.gmra.mxu1 %vm408_vm2, %v7595_v46  ;;  %4974 = vmatprep.subr.mxu1 %v8112_v29 }
0x304e   :  { %4975 = vmatpush3.msra.mxu1 %v7332_v11  ;;  %4990 = vmatprep.mubr.msk.f32.mxu1 %vm5610_vm3, %v8112_v29 }
0x304f   :  { %4976 = vmatprep.subr.mxu1 %v8112_v29 }
0x3050   :  { %4977 = vmatpush3.msra.mxu1 %v7341_v20 }
0x3051   :  { %4978 = vmatprep.subr.mxu1 %v8112_v29 }
0x3052   :  { %4979 = vmatpush3.msra.mxu1 %v7348_v23 }
0x3053   :  { %4980 = vmatprep.subr.mxu1 %v8112_v29 }
0x3054   :  { %4981 = vmatpush3.msra.mxu1 %v7355_v26 }
0x3055   :  { %4982 = vmatprep.subr.mxu1 %v8112_v29 }
0x3056   :  { %4983 = vmatpush3.msra.mxu1 %v7362_v41 }
0x3057   :  { %4984 = vmatprep.subr.mxu1 %v8112_v29 }
0x3058   :  { %4985 = vmatpush3.msra.mxu1 %v7369_v16 }
0x3059   :  { %4986 = vmatprep.subr.mxu1 %v8112_v29 }
0x305a   :  { %4987 = vmatpush3.msra.mxu1 %v7376_v25 }
0x305b   :  { %4988 = vmatprep.subr.mxu1 %v8112_v29 }
0x305c   :  { %4989 = vmatpush3.msra.mxu1 %v7383_v18 }
0x305d   :  { %4054 = vmatprep.subr.mxu1 %v7574_v13 }
0x30fd   :  { %v3733_v60 = vpop.f32.mrf.mxu1 }
0x30fe   :  { %v3734_v46 = vadd.f32 %v7390_v8, %v3733_v60 }
0x30ff   :  { %v4973_v22 = vpop.f32.mrf.mxu1 }
0x3100   :  { %4729 = vst.msk [vmem:[%s8003_s8 + $0x30] sm:$0xff] %vm81_vm1, %v3734_v46 }
0x310d   :  { %v3813_v62 = vpop.f32.mrf.mxu1 }
0x310e   :  { %v3818_v47 = vadd.f32 %v3813_v62, %v280_v45 }
0x310f   :  { %v3815_v30 = vpop.f32.mrf.mxu1 }
0x3110   :  { %v3819_v50 = vadd.f32 %v3815_v30, %v282_v19  ;;  %v4731_v38 = vmul.f32 -1.442695, %v3818_v47 }
0x3112   :  { %5349 = vtanh.f32 %v3819_v50  ;;  %v4732_v19 = vmul.f32 -1.442695, %v3819_v50  ;;  %v8258_v50 = vld [vmem:[#allocation13_spill] sm:$0xff] }
0x3113   :  { %5351 = vpow2.f32 %v4731_v38  ;;  %v8259_v38 = vld [vmem:[#allocation11_spill] sm:$0xff] }
0x311f   :  { %v5350_v12 = vpop.eup %5349 }
0x3120   :  { %3835 = vrot.lane.b32.xlu0 %v5350_v12, %s5609_s2  ;;  %v5352_v60 = vpop.eup %5351 }
0x3121   :  { %v3826_v22 = vadd.f32 1.0, %v5352_v60  ;;  %v8260_v60 = vld [vmem:[#allocation17_spill] sm:$0xff] }
0x3123   :  { %5353 = vrcp.f32 %v3826_v22  ;;  %v8261_v22 = vld [vmem:[#allocation18_spill] sm:$0xff] }
0x3130   :  { %v5354_v46 = vpop.eup %5353 }
0x3131   :  { %v3833_v32 = vmul.f32 %v5354_v46, %v7591_v17 }
0x3192   :  { %v3836_v8 = vpop.permute.xlu0 %3835 }
0x3193   :  { %v3838_v13 = vmul.f32 %v5354_v46, %v3836_v8  ;;  %v8262_v46 = vld [vmem:[#allocation19_spill] sm:$0xff] }
0x3195   :  { %3840 = vrot.lane.b32.xlu1 %v3838_v13, %s5609_s2 }
0x3199   :  { %3850 = vrot.lane.b32.xlu1 %v3663_v36, %s5609_s2 }
0x3207   :  { %v3841_v45 = vpop.permute.xlu1 %3840 }
0x3208   :  { %v7756_v62 = vadd.f32 %v3841_v45, %v3833_v32  ;;  %v8263_v32 = vld [vmem:[#allocation20_spill] sm:$0xff]  ;;  %v8264_v45 = vld [vmem:[#allocation38_spill] sm:$0xff] }
0x320a   :  { %5355 = vtanh.f32 %v7756_v62 }
0x320b   :  { %5357 = vpow2.f32 %v4732_v19  ;;  %v3851_v36 = vpop.permute.xlu1 %3850  ;;  %v8266_v19 = vld [vmem:[#allocation37_spill] sm:$0xff] }
0x3217   :  { %v5356_v0 = vpop.eup %5355 }
0x3218   :  { %3846 = vrot.lane.b32.xlu0 %v5356_v0, %s5609_s2  ;;  %v5358_v47 = vpop.eup %5357  ;;  %v8265_v0 = vld [vmem:[#allocation39_spill] sm:$0xff] }
0x3219   :  { %v3827_v30 = vadd.f32 1.0, %v5358_v47  ;;  %v8267_v47 = vld [vmem:[#allocation6_spill] sm:$0xff] }
0x321b   :  { %5359 = vrcp.f32 %v3827_v30  ;;  %v8268_v30 = vld [vmem:[#allocation21_spill] sm:$0xff] }
0x3228   :  { %v5360_v8 = vpop.eup %5359 }
0x328a   :  { %v3847_v12 = vpop.permute.xlu0 %3846 }
0x328b   :  { %v7760_v13 = vmul.f32 %v5360_v8, %v3847_v12  ;;  %v8269_v8 = vld [vmem:[#allocation22_spill] sm:$0xff]  ;;  %v8270_v12 = vld [vmem:[#allocation40_spill] sm:$0xff] }
0x328d   :  { %v3853_v17 = vsel %vm408_vm2, %v7760_v13, %v3851_v36  ;;  %v8271_v36 = vld [vmem:[#allocation41_spill] sm:$0xff] }
0x328e   :  { %3919 = vmatmul.mubr.f32.vlgmr.msra.gmra.mxu0 %v3853_v17 }
0x328f   :  { %4146 = vmatpush1.msra.mxu0 %v7599_v52  ;;  %4209 = vmatprep.mubr.f32.mxu0 %v8112_v29 }
0x3290   :  { %4147 = vmatprep.subr.mxu0 %v7603_v51 }
0x3291   :  { %4148 = vmatpush1.msra.mxu0 %v7606_v56 }
0x3292   :  { %4149 = vmatprep.subr.mxu0 %v7609_v39 }
0x3293   :  { %4150 = vmatpush1.msra.mxu0 %v7612_v33 }
0x3294   :  { %4151 = vmatprep.subr.mxu0 %v7615_v37 }
0x3295   :  { %4152 = vmatpush1.msra.mxu0 %v7618_v61 }
0x3296   :  { %4153 = vmatprep.subr.mxu0 %v7621_v40 }
0x3297   :  { %4154 = vmatpush1.msra.mxu0 %v7624_v57 }
0x3298   :  { %4155 = vmatprep.subr.mxu0 %v7627_v27 }
0x3299   :  { %4156 = vmatpush1.msra.mxu0 %v7630_v63 }
0x329a   :  { %4157 = vmatprep.subr.mxu0 %v7633_v7 }
0x329b   :  { %4158 = vmatpush1.msra.mxu0 %v7636_v9 }
0x329c   :  { %4159 = vmatprep.subr.mxu0 %v7639_v24 }
0x329d   :  { %4160 = vmatpush1.msra.mxu0 %v7642_v3 }
0x329e   :  { %4161 = vmatprep.subr.mxu0 %v7645_v14 }
0x329f   :  { %4162 = vmatpush1.msra.mxu0 %v7648_v10 }
0x32a0   :  { %4163 = vmatprep.subr.mxu0 %v7651_v6 }
0x32a1   :  { %4164 = vmatpush1.msra.mxu0 %v8258_v50 }
0x32a2   :  { %4165 = vmatprep.subr.mxu0 %v8259_v38 }
0x32a3   :  { %4166 = vmatpush1.msra.mxu0 %v8260_v60 }
0x32a4   :  { %4167 = vmatprep.subr.mxu0 %v8261_v22 }
0x32a5   :  { %4168 = vmatpush1.msra.mxu0 %v8262_v46 }
0x32a6   :  { %4169 = vmatprep.subr.mxu0 %v8263_v32 }
0x32a7   :  { %4170 = vmatpush1.msra.mxu0 %v8264_v45 }
0x32a8   :  { %4171 = vmatprep.subr.mxu0 %v8265_v0 }
0x32a9   :  { %4172 = vmatpush1.msra.mxu0 %v8266_v19 }
0x32aa   :  { %4173 = vmatprep.subr.mxu0 %v8267_v47 }
0x32ab   :  { %4174 = vmatpush1.msra.mxu0 %v8268_v30 }
0x32ac   :  { %4175 = vmatprep.subr.mxu0 %v8269_v8 }
0x32ad   :  { %4176 = vmatpush1.msra.mxu0 %v8270_v12 }
0x32ae   :  { %4436 = vmatprep.subr.mxu0 %v8271_v36 }
0x334e   :  { %v3920_v17 = vpop.f32.mrf.mxu0 }
0x334f   :  { %v3921_v19 = vadd.f32 %v3920_v17, %v8180_v48 }
0x3350   :  { %v3922_v46 = vpop.f32.mrf.mxu0 }
0x3351   :  { %v3923_v32 = vadd.f32 %v3922_v46, %v8144_v35  ;;  %v4733_v0 = vmul.f32 -1.442695, %v3921_v19 }
0x3353   :  { %5361 = vtanh.f32 %v3923_v32  ;;  %v4734_v19 = vmul.f32 -1.442695, %v3923_v32 }
0x3354   :  { %5363 = vpow2.f32 %v4733_v0 }
0x3360   :  { %v5362_v45 = vpop.eup %5361 }
0x3361   :  { %3940 = vrot.lane.b32.xlu0 %v5362_v45, %s5609_s2  ;;  %v5364_v47 = vpop.eup %5363 }
0x3362   :  { %v3931_v30 = vadd.f32 1.0, %v5364_v47 }
0x3364   :  { %5365 = vrcp.f32 %v3931_v30 }
0x3371   :  { %v5366_v8 = vpop.eup %5365 }
0x3372   :  { %v3938_v36 = vmul.f32 %v5366_v8, %v7701_v44 }
0x33d3   :  { %v3941_v22 = vpop.permute.xlu0 %3940 }
0x33d4   :  { %v3943_v12 = vmul.f32 %v5366_v8, %v3941_v22 }
0x33d6   :  { %3945 = vrot.lane.b32.xlu1 %v3943_v12, %s5609_s2 }
0x3448   :  { %v3946_v60 = vpop.permute.xlu1 %3945 }
0x3449   :  { %v7802_v46 = vadd.f32 %v3946_v60, %v3938_v36 }
0x344b   :  { %5367 = vtanh.f32 %v7802_v46 }
0x344c   :  { %5369 = vpow2.f32 %v4734_v19 }
0x3458   :  { %v5368_v45 = vpop.eup %5367 }
0x3459   :  { %3951 = vrot.lane.b32.xlu0 %v5368_v45, %s5609_s2  ;;  %v5370_v0 = vpop.eup %5369 }
0x345a   :  { %v3932_v47 = vadd.f32 1.0, %v5370_v0 }
0x345c   :  { %5371 = vrcp.f32 %v3932_v47 }
0x3469   :  { %v5372_v30 = vpop.eup %5371 }
0x34cb   :  { %v3952_v17 = vpop.permute.xlu0 %3951 }
0x34cc   :  { %v3954_v22 = vmul.f32 %v5372_v30, %v3952_v17 }
0x34ce   :  { %4991 = vmatmul.mubr.msk.f32.vlgmr.msra.gmra.mxu1 %vm408_vm2, %v3954_v22 }
0x34cf   :  { %4055 = vmatpush1.msra.mxu1 %v7463_v55  ;;  %4102 = vmatprep.mubr.f32.mxu1 %v8112_v29 }
0x34d0   :  { %4056 = vmatprep.subr.mxu1 %v7470_v42 }
0x34d1   :  { %4057 = vmatpush1.msra.mxu1 %v7476_v58 }
0x34d2   :  { %4058 = vmatprep.subr.mxu1 %v7482_v4 }
0x34d3   :  { %4059 = vmatpush1.msra.mxu1 %v7488_v53 }
0x34d4   :  { %4060 = vmatprep.subr.mxu1 %v7494_v54 }
0x34d5   :  { %4061 = vmatpush1.msra.mxu1 %v7500_v34 }
0x34d6   :  { %4062 = vmatprep.subr.mxu1 %v7506_v31 }
0x34d7   :  { %4063 = vmatpush1.msra.mxu1 %v7512_v5 }
0x34d8   :  { %4064 = vmatprep.subr.mxu1 %v7518_v43 }
0x34d9   :  { %4065 = vmatpush1.msra.mxu1 %v7524_v21 }
0x34da   :  { %4066 = vmatprep.subr.mxu1 %v7530_v2 }
0x34db   :  { %4067 = vmatpush1.msra.mxu1 %v7536_v49 }
0x34dc   :  { %4068 = vmatprep.subr.mxu1 %v7542_v59 }
0x34dd   :  { %4069 = vmatpush1.msra.mxu1 %v7548_v1 }
0x34de   :  { %4737 = vmatmul.mubr.msk.f32.vlgmr.msra.gmra.mxu1 %vm408_vm2, %v7760_v13  ;;  %4993 = vmatprep.subr.mxu1 %v8112_v29 }
0x34df   :  { %4994 = vmatpush3.msra.mxu1 %v7332_v11  ;;  %5009 = vmatprep.mubr.msk.f32.mxu1 %vm5610_vm3, %v8112_v29  ;;  %v8272_v11 = vld [vmem:[#allocation16_spill] sm:$0xff] }
0x34e0   :  { %4995 = vmatprep.subr.mxu1 %v8112_v29 }
0x34e1   :  { %4996 = vmatpush3.msra.mxu1 %v7341_v20 }
0x34e2   :  { %4997 = vmatprep.subr.mxu1 %v8112_v29 }
0x34e3   :  { %4998 = vmatpush3.msra.mxu1 %v7348_v23  ;;  %v8273_v23 = vld [vmem:[#allocation15_spill] sm:$0xff] }
0x34e4   :  { %4999 = vmatprep.subr.mxu1 %v8112_v29 }
0x34e5   :  { %5000 = vmatpush3.msra.mxu1 %v7355_v26 }
0x34e6   :  { %5001 = vmatprep.subr.mxu1 %v8112_v29 }
0x34e7   :  { %5002 = vmatpush3.msra.mxu1 %v7362_v41  ;;  %v8274_v41 = vld [vmem:[#allocation29_spill] sm:$0xff] }
0x34e8   :  { %5003 = vmatprep.subr.mxu1 %v8112_v29 }
0x34e9   :  { %5004 = vmatpush3.msra.mxu1 %v7369_v16  ;;  %v286_v16 = vadd.f32 %v8274_v41, %v8166_v15 }
0x34ea   :  { %5005 = vmatprep.subr.mxu1 %v8112_v29 }
0x34eb   :  { %5006 = vmatpush3.msra.mxu1 %v7376_v25  ;;  %v8275_v25 = vld [vmem:[#allocation30_spill] sm:$0xff] }
0x34ec   :  { %5007 = vmatprep.subr.mxu1 %v8112_v29  ;;  %v288_v60 = vadd.f32 %v8275_v25, %v8118_v28 }
0x34ed   :  { %5008 = vmatpush3.msra.mxu1 %v7383_v18 }
0x34ee   :  { %4345 = vmatprep.subr.mxu1 %v8272_v11 }
0x358e   :  { %v4024_v20 = vpop.f32.mrf.mxu1 }
0x358f   :  { %v4025_v26 = vadd.f32 %v8273_v23, %v4024_v20 }
0x3590   :  { %v4992_v44 = vpop.f32.mrf.mxu1 }
0x3591   :  { %4736 = vst.msk [vmem:[%s8003_s8 + $0x38] sm:$0xff] %vm81_vm1, %v4025_v26 }
0x359e   :  { %v4104_v13 = vpop.f32.mrf.mxu1 }
0x359f   :  { %v4109_v32 = vadd.f32 %v4104_v13, %v286_v16 }
0x35a0   :  { %v4106_v18 = vpop.f32.mrf.mxu1 }
0x35a1   :  { %v4110_v8 = vadd.f32 %v4106_v18, %v288_v60  ;;  %v4738_v36 = vmul.f32 -1.442695, %v4109_v32 }
0x35a3   :  { %5373 = vtanh.f32 %v4110_v8  ;;  %v4739_v26 = vmul.f32 -1.442695, %v4110_v8 }
0x35a4   :  { %5375 = vpow2.f32 %v4738_v36 }
0x35b0   :  { %v5374_v12 = vpop.eup %5373 }
0x35b1   :  { %4126 = vrot.lane.b32.xlu1 %v5374_v12, %s5609_s2  ;;  %v5376_v45 = vpop.eup %5375 }
0x35b2   :  { %v4117_v19 = vadd.f32 1.0, %v5376_v45 }
0x35b4   :  { %5377 = vrcp.f32 %v4117_v19 }
0x35c1   :  { %v5378_v0 = vpop.eup %5377 }
0x35c2   :  { %v4124_v17 = vmul.f32 %v5378_v0, %v7756_v62 }
0x3623   :  { %v4127_v47 = vpop.permute.xlu1 %4126 }
0x3624   :  { %v4129_v30 = vmul.f32 %v5378_v0, %v4127_v47 }
0x3626   :  { %4131 = vrot.lane.b32.xlu0 %v4129_v30, %s5609_s2 }
0x362a   :  { %4141 = vrot.lane.b32.xlu0 %v3954_v22, %s5609_s2 }
0x3698   :  { %v4132_v11 = vpop.permute.xlu0 %4131 }
0x3699   :  { %v7857_v20 = vadd.f32 %v4132_v11, %v4124_v17 }
0x369b   :  { %5379 = vtanh.f32 %v7857_v20 }
0x369c   :  { %5381 = vpow2.f32 %v4739_v26  ;;  %v4142_v22 = vpop.permute.xlu0 %4141 }
0x36a8   :  { %v5380_v23 = vpop.eup %5379 }
0x36a9   :  { %4137 = vrot.lane.b32.xlu1 %v5380_v23, %s5609_s2  ;;  %v5382_v44 = vpop.eup %5381 }
0x36aa   :  { %v4118_v41 = vadd.f32 1.0, %v5382_v44 }
0x36ac   :  { %5383 = vrcp.f32 %v4118_v41 }
0x36b9   :  { %v5384_v16 = vpop.eup %5383 }
0x371b   :  { %v4138_v13 = vpop.permute.xlu1 %4137 }
0x371c   :  { %v7861_v25 = vmul.f32 %v5384_v16, %v4138_v13 }
0x371e   :  { %v4144_v62 = vsel %vm408_vm2, %v7861_v25, %v4142_v22 }
0x371f   :  { %4210 = vmatmul.mubr.f32.vlgmr.msra.gmra.mxu0 %v4144_v62 }
0x3720   :  { %4437 = vmatpush1.msra.mxu0 %v7599_v52  ;;  %4500 = vmatprep.mubr.f32.mxu0 %v8112_v29  ;;  %v8276_v52 = vld [vmem:[#allocation17_spill] sm:$0xff] }
0x3721   :  { %4438 = vmatprep.subr.mxu0 %v7603_v51  ;;  %v8277_v51 = vld [vmem:[#allocation18_spill] sm:$0xff] }
0x3722   :  { %4439 = vmatpush1.msra.mxu0 %v7606_v56  ;;  %v8278_v56 = vld [vmem:[#allocation19_spill] sm:$0xff] }
0x3723   :  { %4440 = vmatprep.subr.mxu0 %v7609_v39  ;;  %v8279_v39 = vld [vmem:[#allocation20_spill] sm:$0xff] }
0x3724   :  { %4441 = vmatpush1.msra.mxu0 %v7612_v33  ;;  %v8280_v33 = vld [vmem:[#allocation38_spill] sm:$0xff] }
0x3725   :  { %4442 = vmatprep.subr.mxu0 %v7615_v37  ;;  %v8281_v37 = vld [vmem:[#allocation39_spill] sm:$0xff] }
0x3726   :  { %4443 = vmatpush1.msra.mxu0 %v7618_v61  ;;  %v8282_v61 = vld [vmem:[#allocation37_spill] sm:$0xff] }
0x3727   :  { %4444 = vmatprep.subr.mxu0 %v7621_v40  ;;  %v8283_v40 = vld [vmem:[#allocation6_spill] sm:$0xff] }
0x3728   :  { %4445 = vmatpush1.msra.mxu0 %v7624_v57  ;;  %v8284_v57 = vld [vmem:[#allocation21_spill] sm:$0xff] }
0x3729   :  { %4446 = vmatprep.subr.mxu0 %v7627_v27  ;;  %v8285_v27 = vld [vmem:[#allocation22_spill] sm:$0xff] }
0x372a   :  { %4447 = vmatpush1.msra.mxu0 %v7630_v63  ;;  %v8286_v63 = vld [vmem:[#allocation40_spill] sm:$0xff] }
0x372b   :  { %4448 = vmatprep.subr.mxu0 %v7633_v7 }
0x372c   :  { %4449 = vmatpush1.msra.mxu0 %v7636_v9 }
0x372d   :  { %4450 = vmatprep.subr.mxu0 %v7639_v24 }
0x372e   :  { %4451 = vmatpush1.msra.mxu0 %v7642_v3 }
0x372f   :  { %4452 = vmatprep.subr.mxu0 %v7645_v14 }
0x3730   :  { %4453 = vmatpush1.msra.mxu0 %v7648_v10 }
0x3731   :  { %4454 = vmatprep.subr.mxu0 %v7651_v6 }
0x3732   :  { %4455 = vmatpush1.msra.mxu0 %v8258_v50 }
0x3733   :  { %4456 = vmatprep.subr.mxu0 %v8259_v38 }
0x3734   :  { %4457 = vmatpush1.msra.mxu0 %v8276_v52 }
0x3735   :  { %4458 = vmatprep.subr.mxu0 %v8277_v51 }
0x3736   :  { %4459 = vmatpush1.msra.mxu0 %v8278_v56 }
0x3737   :  { %4460 = vmatprep.subr.mxu0 %v8279_v39 }
0x3738   :  { %4461 = vmatpush1.msra.mxu0 %v8280_v33 }
0x3739   :  { %4462 = vmatprep.subr.mxu0 %v8281_v37 }
0x373a   :  { %4463 = vmatpush1.msra.mxu0 %v8282_v61 }
0x373b   :  { %4464 = vmatprep.subr.mxu0 %v8283_v40 }
0x373c   :  { %4465 = vmatpush1.msra.mxu0 %v8284_v57 }
0x373d   :  { %4466 = vmatprep.subr.mxu0 %v8285_v27 }
0x373e   :  { %4467 = vmatpush1.msra.mxu0 %v8286_v63 }
0x37df   :  { %v4211_v7 = vpop.f32.mrf.mxu0 }
0x37e0   :  { %v4212_v14 = vadd.f32 %v4211_v7, %v8180_v48 }
0x37e1   :  { %v4213_v9 = vpop.f32.mrf.mxu0 }
0x37e2   :  { %v4214_v24 = vadd.f32 %v4213_v9, %v8144_v35  ;;  %v4740_v10 = vmul.f32 -1.442695, %v4212_v14 }
0x37e4   :  { %5385 = vtanh.f32 %v4214_v24  ;;  %v4741_v45 = vmul.f32 -1.442695, %v4214_v24 }
0x37e5   :  { %5387 = vpow2.f32 %v4740_v10 }
0x37f1   :  { %v5386_v3 = vpop.eup %5385 }
0x37f2   :  { %4231 = vrot.lane.b32.xlu1 %v5386_v3, %s5609_s2  ;;  %v5388_v6 = vpop.eup %5387 }
0x37f3   :  { %v4222_v50 = vadd.f32 1.0, %v5388_v6 }
0x37f5   :  { %5389 = vrcp.f32 %v4222_v50 }
0x3802   :  { %v5390_v38 = vpop.eup %5389 }
0x3803   :  { %v4229_v18 = vmul.f32 %v5390_v38, %v7802_v46 }
0x3864   :  { %v4232_v60 = vpop.permute.xlu1 %4231 }
0x3865   :  { %v4234_v32 = vmul.f32 %v5390_v38, %v4232_v60 }
0x3867   :  { %4236 = vrot.lane.b32.xlu0 %v4234_v32, %s5609_s2 }
0x38d9   :  { %v4237_v8 = vpop.permute.xlu0 %4236 }
0x38da   :  { %v7902_v12 = vadd.f32 %v4237_v8, %v4229_v18 }
0x38dc   :  { %5391 = vtanh.f32 %v7902_v12 }
0x38dd   :  { %5393 = vpow2.f32 %v4741_v45 }
0x38e9   :  { %v5392_v36 = vpop.eup %5391 }
0x38ea   :  { %4242 = vrot.lane.b32.xlu1 %v5392_v36, %s5609_s2  ;;  %v5394_v19 = vpop.eup %5393 }
0x38eb   :  { %v4223_v0 = vadd.f32 1.0, %v5394_v19 }
0x38ed   :  { %5395 = vrcp.f32 %v4223_v0 }
0x38fa   :  { %v5396_v47 = vpop.eup %5395 }
0x395c   :  { %v4243_v30 = vpop.permute.xlu1 %4242 }
0x395d   :  { %v7906_v17 = vmul.f32 %v5396_v47, %v4243_v30 }
0x395f   :  { %5010 = vmatmul.mubr.msk.f32.vlgmr.msra.gmra.mxu1 %vm408_vm2, %v7906_v17 }
0x3960   :  { %4346 = vmatpush1.msra.mxu1 %v7463_v55  ;;  %4393 = vmatprep.mubr.f32.mxu1 %v8112_v29  ;;  %v5574_v55 = vld [vmem:[%s8001_s6 + $0x38] sm:$0xff] }
0x3961   :  { %4347 = vmatprep.subr.mxu1 %v7470_v42  ;;  %v5575_v42 = vld [vmem:[%s8001_s6 + $0x30] sm:$0xff] }
0x3962   :  { %4348 = vmatpush1.msra.mxu1 %v7476_v58  ;;  %v5576_v58 = vld [vmem:[%s8001_s6 + $0x28] sm:$0xff] }
0x3963   :  { %4349 = vmatprep.subr.mxu1 %v7482_v4  ;;  %v5577_v4 = vld [vmem:[%s8001_s6 + $0x20] sm:$0xff] }
0x3964   :  { %4350 = vmatpush1.msra.mxu1 %v7488_v53  ;;  %v5578_v53 = vld [vmem:[%s8001_s6 + $0x18] sm:$0xff] }
0x3965   :  { %4351 = vmatprep.subr.mxu1 %v7494_v54  ;;  %v5579_v54 = vld [vmem:[%s8001_s6 + $0x10] sm:$0xff] }
0x3966   :  { %4352 = vmatpush1.msra.mxu1 %v7500_v34  ;;  %v5580_v34 = vld [vmem:[%s8001_s6 + $0x8] sm:$0xff] }
0x3967   :  { %4353 = vmatprep.subr.mxu1 %v7506_v31  ;;  %v5581_v31 = vld [vmem:[%s8001_s6] sm:$0xff] }
0x3968   :  { %4354 = vmatpush1.msra.mxu1 %v7512_v5 }
0x3969   :  { %4355 = vmatprep.subr.mxu1 %v7518_v43  ;;  %v7965_v43 = vld [vmem:[%s8002_s7] ss:$0 sm:$0xff] }
0x396a   :  { %4356 = vmatpush1.msra.mxu1 %v7524_v21 }
0x396b   :  { %4357 = vmatprep.subr.mxu1 %v7530_v2 }
0x396c   :  { %4358 = vmatpush1.msra.mxu1 %v7536_v49 }
0x396d   :  { %4359 = vmatprep.subr.mxu1 %v7542_v59 }
0x396e   :  { %4360 = vmatpush1.msra.mxu1 %v7548_v1  ;;  %v8288_v1 = vld [vmem:[#allocation32_spill] sm:$0xff] }
0x396f   :  { %4744 = vmatmul.mubr.msk.f32.vlgmr.msra.gmra.mxu1 %vm408_vm2, %v7861_v25  ;;  %5012 = vmatprep.subr.mxu1 %v8112_v29  ;;  %v294_v46 = vadd.f32 %v8288_v1, %v8118_v28 }
0x3970   :  { %5013 = vmatpush3.msra.mxu1 %v5574_v55  ;;  %5028 = vmatprep.mubr.msk.f32.mxu1 %vm5610_vm3, %v8112_v29 }
0x3971   :  { %5014 = vmatprep.subr.mxu1 %v8112_v29 }
0x3972   :  { %5015 = vmatpush3.msra.mxu1 %v5575_v42 }
0x3973   :  { %5016 = vmatprep.subr.mxu1 %v8112_v29 }
0x3974   :  { %5017 = vmatpush3.msra.mxu1 %v5576_v58 }
0x3975   :  { %5018 = vmatprep.subr.mxu1 %v8112_v29 }
0x3976   :  { %5019 = vmatpush3.msra.mxu1 %v5577_v4 }
0x3977   :  { %5020 = vmatprep.subr.mxu1 %v8112_v29 }
0x3978   :  { %5021 = vmatpush3.msra.mxu1 %v5578_v53 }
0x3979   :  { %5022 = vmatprep.subr.mxu1 %v8112_v29 }
0x397a   :  { %5023 = vmatpush3.msra.mxu1 %v5579_v54 }
0x397b   :  { %5024 = vmatprep.subr.mxu1 %v8112_v29 }
0x397c   :  { %5025 = vmatpush3.msra.mxu1 %v5580_v34 }
0x397d   :  { %5026 = vmatprep.subr.mxu1 %v8112_v29  ;;  %v8287_v29 = vld [vmem:[#allocation31_spill] sm:$0xff] }
0x397e   :  { %5027 = vmatpush3.msra.mxu1 %v5581_v31  ;;  %v292_v49 = vadd.f32 %v8287_v29, %v8166_v15 }
0x3a1f   :  { %v4315_v5 = vpop.f32.mrf.mxu1 }
0x3a20   :  { %v4316_v21 = vadd.f32 %v7965_v43, %v4315_v5 }
0x3a21   :  { %v5011_v2 = vpop.f32.mrf.mxu1 }
0x3a22   :  { %4743 = vst.msk [vmem:[%s8003_s8 + $0x40] sm:$0xff] %vm81_vm1, %v4316_v21 }
0x3a2f   :  { %v4395_v59 = vpop.f32.mrf.mxu1 }
0x3a30   :  { %v4400_v11 = vadd.f32 %v4395_v59, %v292_v49 }
0x3a31   :  { %v4397_v23 = vpop.f32.mrf.mxu1 }
0x3a32   :  { %v4401_v26 = vadd.f32 %v4397_v23, %v294_v46  ;;  %v4745_v41 = vmul.f32 -1.442695, %v4400_v11 }
0x3a34   :  { %5397 = vtanh.f32 %v4401_v26  ;;  %v4746_v56 = vmul.f32 -1.442695, %v4401_v26 }
0x3a35   :  { %5399 = vpow2.f32 %v4745_v41 }
0x3a41   :  { %v5398_v44 = vpop.eup %5397 }
0x3a42   :  { %4417 = vrot.lane.b32.xlu0 %v5398_v44, %s5609_s2  ;;  %v5400_v16 = vpop.eup %5399 }
0x3a43   :  { %v4408_v13 = vadd.f32 1.0, %v5400_v16 }
0x3a45   :  { %5401 = vrcp.f32 %v4408_v13 }
0x3a52   :  { %v5402_v25 = vpop.eup %5401 }
0x3a53   :  { %v4415_v28 = vmul.f32 %v5402_v25, %v7857_v20 }
0x3ab4   :  { %v4418_v22 = vpop.permute.xlu0 %4417 }
0x3ab5   :  { %v4420_v62 = vmul.f32 %v5402_v25, %v4418_v22 }
0x3ab7   :  { %4422 = vrot.lane.b32.xlu1 %v4420_v62, %s5609_s2 }
0x3abb   :  { %4432 = vrot.lane.b32.xlu1 %v7906_v17, %s5609_s2 }
0x3b29   :  { %v4423_v15 = vpop.permute.xlu1 %4422 }
0x3b2a   :  { %v4425_v52 = vadd.f32 %v4423_v15, %v4415_v28 }
0x3b2c   :  { %5403 = vtanh.f32 %v4425_v52 }
0x3b2d   :  { %5405 = vpow2.f32 %v4746_v56  ;;  %v4433_v57 = vpop.permute.xlu1 %4432 }
0x3b39   :  { %v5404_v51 = vpop.eup %5403 }
0x3b3a   :  { %4428 = vrot.lane.b32.xlu0 %v5404_v51, %s5609_s2  ;;  %v5406_v39 = vpop.eup %5405 }
0x3b3b   :  { %v4409_v33 = vadd.f32 1.0, %v5406_v39 }
0x3b3d   :  { %5407 = vrcp.f32 %v4409_v33 }
0x3b4a   :  { %v5408_v37 = vpop.eup %5407 }
0x3bac   :  { %v4429_v61 = vpop.permute.xlu0 %4428 }
0x3bad   :  { %v4431_v40 = vmul.f32 %v5408_v37, %v4429_v61 }
0x3baf   :  { %v4435_v27 = vsel %vm408_vm2, %v4431_v40, %v4433_v57 }
0x3bb0   :  { %4501 = vmatmul.mubr.f32.vlgmr.msra.gmra.mxu0 %v4435_v27 }
0x3c70   :  { %v4502_v63 = vpop.f32.mrf.mxu0 }
0x3c71   :  { %v4503_v24 = vadd.f32 %v4502_v63, %v8180_v48 }
0x3c72   :  { %v4504_v20 = vpop.f32.mrf.mxu0 }
0x3c73   :  { %v4505_v7 = vadd.f32 %v4504_v20, %v8144_v35  ;;  %v4747_v3 = vmul.f32 -1.442695, %v4503_v24 }
0x3c75   :  { %5409 = vtanh.f32 %v4505_v7  ;;  %v4748_v8 = vmul.f32 -1.442695, %v4505_v7 }
0x3c76   :  { %5411 = vpow2.f32 %v4747_v3 }
0x3c82   :  { %v5410_v9 = vpop.eup %5409 }
0x3c83   :  { %4522 = vrot.lane.b32.xlu0 %v5410_v9, %s5609_s2  ;;  %v5412_v14 = vpop.eup %5411 }
0x3c84   :  { %v4513_v10 = vadd.f32 1.0, %v5412_v14 }
0x3c86   :  { %5413 = vrcp.f32 %v4513_v10 }
0x3c93   :  { %v5414_v6 = vpop.eup %5413 }
0x3c94   :  { %v4520_v60 = vmul.f32 %v5414_v6, %v7902_v12 }
0x3cf5   :  { %v4523_v50 = vpop.permute.xlu0 %4522 }
0x3cf6   :  { %v4525_v38 = vmul.f32 %v5414_v6, %v4523_v50 }
0x3cf8   :  { %4527 = vrot.lane.b32.xlu1 %v4525_v38, %s5609_s2 }
0x3d6a   :  { %v4528_v32 = vpop.permute.xlu1 %4527 }
0x3d6b   :  { %v4530_v35 = vadd.f32 %v4528_v32, %v4520_v60 }
0x3d6d   :  { %5415 = vtanh.f32 %v4530_v35 }
0x3d6e   :  { %5417 = vpow2.f32 %v4748_v8 }
0x3d7a   :  { %v5416_v18 = vpop.eup %5415 }
0x3d7b   :  { %4533 = vrot.lane.b32.xlu0 %v5416_v18, %s5609_s2  ;;  %v5418_v48 = vpop.eup %5417 }
0x3d7c   :  { %v4514_v36 = vadd.f32 1.0, %v5418_v48 }
0x3d7e   :  { %5419 = vrcp.f32 %v4514_v36 }
0x3d8b   :  { %v5420_v45 = vpop.eup %5419 }
0x3ded   :  { %v4534_v19 = vpop.permute.xlu0 %4533 }
0x3dee   :  { %v4536_v0 = vmul.f32 %v5420_v45, %v4534_v19 }
0x3df0   :  { %5029 = vmatmul.mubr.msk.f32.vlgmr.msra.gmra.mxu1 %vm408_vm2, %v4536_v0 }
0x3eb0   :  { %v4606_v47 = vpop.f32.mrf.mxu1 }
0x3eb1   :  { %v4607_v30 = vadd.f32 %v7965_v43, %v4606_v47 }
0x3eb2   :  { %v5030_v12 = vpop.f32.mrf.mxu1 }
0x3eb3   :  { %4750 = vst.msk [vmem:[%s8003_s8 + $0x48] sm:$0xff] %vm81_vm1, %v4607_v30 }
0x3eb4   :  { %4616 = vsyncpa [#allocation4], 1 }

</bundles_post_ra>
